<compile_context>
chip_gen: v5e
topology: v5e:2x2
jax: 0.10.0
libtpu: 0.0.40
codegen_flags: <defaults>
</compile_context>

<pallas_src>
import jax
import jax.numpy as jnp
from jax.experimental import pallas as pl
from jax.experimental.pallas import tpu as pltpu


# ----------------------------------------------------------------------------
# Fused kernel: softmax over K + in-kernel gather/aggregation (one MXU matmul
# against the VMEM-resident source features) + merged 1x1 conv + ReLU.
# One (batch, row-tile) block per grid step.
# ----------------------------------------------------------------------------
def _graph_atten_kernel(x_ref, src_ref, e_ref, idx_ref, w2_ref, b_ref, o_ref):
    # x_ref  : (1, C, TN)    node features of this row tile (compute dtype)
    # src_ref: (1, C, Np)    full per-batch neighbor-source features (resident)
    # e_ref  : (1, K, TN)    attention logits, K in sublanes / nodes in lanes (f32)
    # idx_ref: (1, K, TN)    neighbor indices into the Np source nodes (int32)
    # w2_ref : (Cout, 2C)    merged 1x1 conv weight, columns = [W_x | W_agg]
    # b_ref  : (Cout, 1)     conv bias (f32)
    # o_ref  : (1, Cout, TN) output, lane-dense store (last dim = TN)
    cdt = x_ref.dtype
    K = e_ref.shape[1]
    Np = src_ref.shape[2]
    TN = x_ref.shape[2]

    # --- softmax over K (K in sublanes, nodes in lanes -> ~2 full vregs per op).
    e = e_ref[0]                                              # (K, TN) f32
    m = jnp.max(e, axis=0, keepdims=True)                     # (1, TN)
    p = jnp.exp(e - m)                                        # (K, TN) unnormalized
    l = jnp.sum(p, axis=0, keepdims=True)                     # (1, TN)
    approx = bool(x_ref.dtype != jnp.float32)                 # exact on f32 check path
    inv_l = pl.reciprocal(l, approx=approx)                   # deferred normalization

    # --- gather + weighted neighbor sum as ONE MXU matmul:
    #       P[m, n] = sum_k p[k, n] * [idx[k, n] == m]        (Np, TN)
    #       agg     = src @ P                                 (C, TN)
    #     The (B,K,N,C) x_j slab never exists; src stays resident in VMEM.
    idx = idx_ref[0]                                          # (K, TN) int32
    iota_m = jax.lax.broadcasted_iota(jnp.int32, (Np, TN), 0)
    P = jnp.zeros((Np, TN), jnp.float32)
    for k in range(K):                                        # K is small & static
        P = P + jnp.where(idx[k:k + 1, :] == iota_m, p[k:k + 1, :], 0.0)
    agg = jax.lax.dot_general(src_ref[0], P.astype(cdt),
                              (((1,), (0,)), ((), ())),
                              preferred_element_type=jnp.float32)   # (C, TN) f32
    agg = agg * inv_l                                         # normalize once per node

    # --- merged 1x1 conv: one (Cout,2C) x (2C,TN) matmul + bias + ReLU.
    xa = jnp.concatenate([x_ref[0], agg.astype(cdt)], axis=0)        # (2C, TN)
    h = jax.lax.dot_general(w2_ref[...], xa, (((1,), (0,)), ((), ())),
                            preferred_element_type=jnp.float32)      # (Cout, TN)
    h = h + b_ref[...]                                        # (Cout, 1) broadcast
    o_ref[0] = jnp.maximum(h, 0.0).astype(o_ref.dtype)        # act='relu', norm=None


def _pick_row_tile(n_pad, cap=512):
    """Largest multiple-of-128 row tile (<= cap) dividing the padded node count."""
    for t in (512, 256, 128):
        if t <= cap and n_pad % t == 0:
            return t
    return n_pad


def _graph_atten_pallas(x_cn, src_cn, e_kn, idx_kn, w2, bias_col, *,
                        row_tile, out_dtype):
    B, C, Np = x_cn.shape
    K = e_kn.shape[1]
    Cout = w2.shape[0]
    TN = row_tile
    return pl.pallas_call(
        _graph_atten_kernel,
        out_shape=jax.ShapeDtypeStruct((B, Cout, Np), out_dtype),
        grid=(B, Np // TN),
        in_specs=[
            pl.BlockSpec((1, C, TN), lambda b, r: (b, 0, r)),      # x row tile
            pl.BlockSpec((1, C, Np), lambda b, r: (b, 0, 0)),      # resident src
            pl.BlockSpec((1, K, TN), lambda b, r: (b, 0, r)),      # logits
            pl.BlockSpec((1, K, TN), lambda b, r: (b, 0, r)),      # neighbor idx
            pl.BlockSpec((Cout, 2 * C), lambda b, r: (0, 0)),      # merged conv W
            pl.BlockSpec((Cout, 1), lambda b, r: (0, 0)),          # bias
        ],
        out_specs=pl.BlockSpec((1, Cout, TN), lambda b, r: (b, 0, r)),
        compiler_params=pltpu.CompilerParams(
            dimension_semantics=("parallel", "parallel"),
            vmem_limit_bytes=32 * 1024 * 1024,   # safe on v5e/v6e and v7x (64 MiB phys)
        ),
    )(x_cn, src_cn, e_kn, idx_kn, w2, bias_col)


# ----------------------------------------------------------------------------
# GraphAtten.forward
# ----------------------------------------------------------------------------
def graph_atten_forward(x, edge_index, a_w, a_b, nn_w, nn_b, y=None, *,
                        row_tile_cap=512, compute_dtype=jnp.bfloat16,
                        out_dtype=jnp.float32):
    """x: (B, C, N, 1) dense ViG layout.  edge_index: (2, B, N, K) int.
    a_w: (2C,), a_b: scalar   -- weights of self.a = Conv2d(2C, 1, 1)
                                 (input order = cat([x_i, x_j], channel)).
    nn_w: (Cout, 2C), nn_b: (Cout,) -- weights of self.nn = BasicConv([2C, Cout])
                                 (input channels interleaved [x_0, xj_0, x_1, ...]).
    Returns (B, Cout, N, 1)."""
    B, C, N, w1 = x.shape
    assert w1 == 1, "dense ViG layout expected: x is (B, C, N, 1)"
    K = edge_index.shape[-1]
    Cout = nn_w.shape[0]

    x_cn = x[..., 0].astype(jnp.float32)                              # (B, C, N)
    src_cn = x_cn if y is None else y[..., 0].astype(jnp.float32)

    idx_j = edge_index[0].astype(jnp.int32)                           # (B, N, K)
    idx_i = edge_index[1].astype(jnp.int32)

    # --- attention logits via linearity of the 1x1 'a' conv (no x_i/x_j gather
    #     of features; only (B,N)-sized score vectors are gathered in XLA glue).
    a_w = a_w.astype(jnp.float32)
    s_i = jnp.einsum("bcn,c->bn", x_cn, a_w[:C])                      # (B, N)
    s_j = jnp.einsum("bcn,c->bn", src_cn, a_w[C:])                    # (B, N)
    idx_i_kn = jnp.transpose(idx_i, (0, 2, 1))                        # (B, K, N) ints only
    idx_j_kn = jnp.transpose(idx_j, (0, 2, 1))
    g_i = jax.vmap(lambda s, i: s[i])(s_i, idx_i_kn)                  # (B, K, N)
    g_j = jax.vmap(lambda s, i: s[i])(s_j, idx_j_kn)                  # (B, K, N)
    e_kn = (g_i + g_j + a_b).astype(jnp.float32)                      # (B, K, N)

    # --- merged conv weight: interleaved [x0,xj0,x1,xj1,...] -> [W_x | W_agg].
    w2 = jnp.concatenate([nn_w[:, 0::2], nn_w[:, 1::2]],
                         axis=1).astype(compute_dtype)                # (Cout, 2C)
    bias_col = nn_b.reshape(Cout, 1).astype(jnp.float32)

    # --- pad nodes to a lane multiple so stores stay unmasked / lane-dense.
    Np = ((N + 127) // 128) * 128
    if Np != N:
        pad = Np - N
        x_cn = jnp.pad(x_cn, ((0, 0), (0, 0), (0, pad)))
        src_cn = jnp.pad(src_cn, ((0, 0), (0, 0), (0, pad)))
        e_kn = jnp.pad(e_kn, ((0, 0), (0, 0), (0, pad)))
        idx_j_kn = jnp.pad(idx_j_kn, ((0, 0), (0, 0), (0, pad)))

    TN = _pick_row_tile(Np, cap=row_tile_cap)
    out_cn = _graph_atten_pallas(x_cn.astype(compute_dtype),
                                 src_cn.astype(compute_dtype),
                                 e_kn, idx_j_kn, w2, bias_col,
                                 row_tile=TN, out_dtype=out_dtype)    # (B, Cout, Np)
    return out_cn[:, :, :N, None]                                     # (B, Cout, N, 1)


# ----------------------------------------------------------------------------
# Pure-JAX reference: literal transcription of the PyTorch forward (f32).
# ----------------------------------------------------------------------------
def _reference_graph_atten(x, edge_index, a_w, a_b, nn_w, nn_b, y=None):
    B, C, N, _ = x.shape
    xn = jnp.transpose(x[..., 0], (0, 2, 1))                          # (B, N, C)
    src = xn if y is None else jnp.transpose(y[..., 0], (0, 2, 1))
    idx_j, idx_i = edge_index[0], edge_index[1]
    x_i = jax.vmap(lambda s, i: s[i])(xn, idx_i)                      # (B, N, K, C)
    x_j = jax.vmap(lambda s, i: s[i])(src, idx_j)                     # (B, N, K, C)
    feat_a = jnp.concatenate([x_i, x_j], axis=-1)                     # (B, N, K, 2C)
    e = jnp.einsum("bnkc,c->bnk", feat_a, a_w) + a_b
    atten = jax.nn.softmax(e, axis=-1)
    agg = jnp.sum(atten[..., None] * x_j, axis=2)                     # (B, N, C)
    inter = jnp.stack([xn, agg], axis=-1).reshape(B, N, 2 * C)        # interleaved
    out = jnp.einsum("bnc,oc->bno", inter, nn_w) + nn_b
    out = jnp.maximum(out, 0.0)
    return jnp.transpose(out, (0, 2, 1))[..., None]                   # (B, Cout, N, 1)


if __name__ == "__main__":
    key = jax.random.PRNGKey(0)
    kx, ki, ka, kab, kw, kb = jax.random.split(key, 6)

    B, C, Cout, K = 2, 16, 32, 9
    H = W = 16
    N = H * W                                                         # 256 nodes

    x = jax.random.normal(kx, (B, C, N, 1), dtype=jnp.float32)
    idx_j = jax.random.randint(ki, (B, N, K), 0, N, dtype=jnp.int32)  # neighbors
    idx_i = jnp.broadcast_to(jnp.arange(N, dtype=jnp.int32)[None, :, None], (B, N, K))
    edge_index = jnp.stack([idx_j, idx_i], axis=0)                    # (2, B, N, K)

    a_w = jax.random.normal(ka, (2 * C,), dtype=jnp.float32) * 0.2
    a_b = jax.random.normal(kab, (), dtype=jnp.float32) * 0.1
    nn_w = jax.random.normal(kw, (Cout, 2 * C), dtype=jnp.float32) * 0.1
    nn_b = jax.random.normal(kb, (Cout,), dtype=jnp.float32) * 0.1

    ref = jax.block_until_ready(
        _reference_graph_atten(x, edge_index, a_w, a_b, nn_w, nn_b))

    # f32 MXU path: tight check of the fused kernel math.
    out_f32 = graph_atten_forward(x, edge_index, a_w, a_b, nn_w, nn_b,
                                  compute_dtype=jnp.float32)
    out_f32 = jax.block_until_ready(out_f32)
    assert out_f32.shape == (B, Cout, N, 1)
    assert jnp.allclose(out_f32, ref, atol=1e-3, rtol=1e-3)

    # bf16 MXU path (default): looser tolerance vs f32 reference.
    out_bf16 = graph_atten_forward(x, edge_index, a_w, a_b, nn_w, nn_b)
    out_bf16 = jax.block_until_ready(out_bf16)
    assert out_bf16.shape == (B, Cout, N, 1)
    assert jnp.allclose(out_bf16, ref, atol=5e-2, rtol=5e-2)

    print("KERNEL_OK")
</pallas_src>

<mosaic_0001>
module attributes {stable_mosaic.version = 11 : i64} {
  func.func @_graph_atten_kernel(%arg0: i32, %arg1: i32, %arg2: memref<1x16x256xf32, #tpu.memory_space<vmem>>, %arg3: memref<1x16x256xf32, #tpu.memory_space<vmem>>, %arg4: memref<1x9x256xf32, #tpu.memory_space<vmem>>, %arg5: memref<1x9x256xi32, #tpu.memory_space<vmem>>, %arg6: memref<32x32xf32, #tpu.memory_space<vmem>>, %arg7: memref<32x1xf32, #tpu.memory_space<vmem>>, %arg8: memref<1x32x256xf32, #tpu.memory_space<vmem>>) attributes {dimension_semantics = [#tpu.dimension_semantics<parallel>, #tpu.dimension_semantics<parallel>], iteration_bounds = array<i64: 2, 1>, scalar_prefetch = 0 : i64, scratch_operands = 0 : i64, tpu.core_type = #tpu.core_type<tc>, window_params = [{transform_indices = @transform_0, window_bounds = array<i64: 1, 16, 256>}, {transform_indices = @transform_1, window_bounds = array<i64: 1, 16, 256>}, {transform_indices = @transform_2, window_bounds = array<i64: 1, 9, 256>}, {transform_indices = @transform_3, window_bounds = array<i64: 1, 9, 256>}, {pipeline_mode = #tpu.pipeline_mode<synchronous>, transform_indices = @transform_4, window_bounds = array<i64: 32, 32>}, {pipeline_mode = #tpu.pipeline_mode<synchronous>, transform_indices = @transform_5, window_bounds = array<i64: 32, 1>}, {transform_indices = @transform_6, window_bounds = array<i64: 1, 32, 256>}]} {
    %c0 = arith.constant 0 : index
    %c0_0 = arith.constant 0 : index
    %c0_1 = arith.constant 0 : index
    %0 = vector.load %arg4[%c0, %c0_0, %c0_1] : memref<1x9x256xf32, #tpu.memory_space<vmem>>, vector<1x9x256xf32>
    %1 = vector.shape_cast %0 : vector<1x9x256xf32> to vector<9x256xf32>
    %cst = arith.constant dense<0xFF800000> : vector<256xf32>
    %2 = vector.multi_reduction <maximumf>, %1, %cst [0] : vector<9x256xf32> to vector<256xf32>
    %3 = vector.shape_cast %2 : vector<256xf32> to vector<1x256xf32>
    %4 = vector.broadcast %3 : vector<1x256xf32> to vector<9x256xf32>
    %5 = arith.subf %1, %4 : vector<9x256xf32>
    %6 = math.exp %5 : vector<9x256xf32>
    %cst_2 = arith.constant dense<0.000000e+00> : vector<256xf32>
    %7 = vector.multi_reduction <add>, %6, %cst_2 [0] : vector<9x256xf32> to vector<256xf32>
    %8 = vector.shape_cast %7 : vector<256xf32> to vector<1x256xf32>
    %9 = tpu.reciprocal %8 : vector<1x256xf32> -> vector<1x256xf32>
    %c0_3 = arith.constant 0 : index
    %c0_4 = arith.constant 0 : index
    %c0_5 = arith.constant 0 : index
    %10 = vector.load %arg5[%c0_3, %c0_4, %c0_5] : memref<1x9x256xi32, #tpu.memory_space<vmem>>, vector<1x9x256xi32>
    %11 = vector.shape_cast %10 : vector<1x9x256xi32> to vector<9x256xi32>
    %12 = tpu.iota {dimensions = array<i32: 0>} : vector<256x256xi32>
    %cst_6 = arith.constant 0.000000e+00 : f32
    %13 = vector.broadcast %cst_6 : f32 to vector<256x256xf32>
    %14 = vector.extract_strided_slice %11 {offsets = [0, 0], sizes = [1, 256], strides = [1, 1]} : vector<9x256xi32> to vector<1x256xi32>
    %15 = vector.broadcast %14 : vector<1x256xi32> to vector<256x256xi32>
    %16 = arith.cmpi eq, %15, %12 : vector<256x256xi32>
    %17 = vector.extract_strided_slice %6 {offsets = [0, 0], sizes = [1, 256], strides = [1, 1]} : vector<9x256xf32> to vector<1x256xf32>
    %cst_7 = arith.constant 0.000000e+00 : f32
    %18 = vector.shape_cast %17 : vector<1x256xf32> to vector<1x256xf32>
    %19 = vector.broadcast %18 : vector<1x256xf32> to vector<256x256xf32>
    %20 = vector.broadcast %cst_7 : f32 to vector<256x256xf32>
    %21 = arith.select %16, %19, %20 : vector<256x256xi1>, vector<256x256xf32>
    %22 = arith.addf %13, %21 : vector<256x256xf32>
    %23 = vector.extract_strided_slice %11 {offsets = [1, 0], sizes = [1, 256], strides = [1, 1]} : vector<9x256xi32> to vector<1x256xi32>
    %24 = vector.broadcast %23 : vector<1x256xi32> to vector<256x256xi32>
    %25 = arith.cmpi eq, %24, %12 : vector<256x256xi32>
    %26 = vector.extract_strided_slice %6 {offsets = [1, 0], sizes = [1, 256], strides = [1, 1]} : vector<9x256xf32> to vector<1x256xf32>
    %cst_8 = arith.constant 0.000000e+00 : f32
    %27 = vector.shape_cast %26 : vector<1x256xf32> to vector<1x256xf32>
    %28 = vector.broadcast %27 : vector<1x256xf32> to vector<256x256xf32>
    %29 = vector.broadcast %cst_8 : f32 to vector<256x256xf32>
    %30 = arith.select %25, %28, %29 : vector<256x256xi1>, vector<256x256xf32>
    %31 = arith.addf %22, %30 : vector<256x256xf32>
    %32 = vector.extract_strided_slice %11 {offsets = [2, 0], sizes = [1, 256], strides = [1, 1]} : vector<9x256xi32> to vector<1x256xi32>
    %33 = vector.broadcast %32 : vector<1x256xi32> to vector<256x256xi32>
    %34 = arith.cmpi eq, %33, %12 : vector<256x256xi32>
    %35 = vector.extract_strided_slice %6 {offsets = [2, 0], sizes = [1, 256], strides = [1, 1]} : vector<9x256xf32> to vector<1x256xf32>
    %cst_9 = arith.constant 0.000000e+00 : f32
    %36 = vector.shape_cast %35 : vector<1x256xf32> to vector<1x256xf32>
    %37 = vector.broadcast %36 : vector<1x256xf32> to vector<256x256xf32>
    %38 = vector.broadcast %cst_9 : f32 to vector<256x256xf32>
    %39 = arith.select %34, %37, %38 : vector<256x256xi1>, vector<256x256xf32>
    %40 = arith.addf %31, %39 : vector<256x256xf32>
    %41 = vector.extract_strided_slice %11 {offsets = [3, 0], sizes = [1, 256], strides = [1, 1]} : vector<9x256xi32> to vector<1x256xi32>
    %42 = vector.broadcast %41 : vector<1x256xi32> to vector<256x256xi32>
    %43 = arith.cmpi eq, %42, %12 : vector<256x256xi32>
    %44 = vector.extract_strided_slice %6 {offsets = [3, 0], sizes = [1, 256], strides = [1, 1]} : vector<9x256xf32> to vector<1x256xf32>
    %cst_10 = arith.constant 0.000000e+00 : f32
    %45 = vector.shape_cast %44 : vector<1x256xf32> to vector<1x256xf32>
    %46 = vector.broadcast %45 : vector<1x256xf32> to vector<256x256xf32>
    %47 = vector.broadcast %cst_10 : f32 to vector<256x256xf32>
    %48 = arith.select %43, %46, %47 : vector<256x256xi1>, vector<256x256xf32>
    %49 = arith.addf %40, %48 : vector<256x256xf32>
    %50 = vector.extract_strided_slice %11 {offsets = [4, 0], sizes = [1, 256], strides = [1, 1]} : vector<9x256xi32> to vector<1x256xi32>
    %51 = vector.broadcast %50 : vector<1x256xi32> to vector<256x256xi32>
    %52 = arith.cmpi eq, %51, %12 : vector<256x256xi32>
    %53 = vector.extract_strided_slice %6 {offsets = [4, 0], sizes = [1, 256], strides = [1, 1]} : vector<9x256xf32> to vector<1x256xf32>
    %cst_11 = arith.constant 0.000000e+00 : f32
    %54 = vector.shape_cast %53 : vector<1x256xf32> to vector<1x256xf32>
    %55 = vector.broadcast %54 : vector<1x256xf32> to vector<256x256xf32>
    %56 = vector.broadcast %cst_11 : f32 to vector<256x256xf32>
    %57 = arith.select %52, %55, %56 : vector<256x256xi1>, vector<256x256xf32>
    %58 = arith.addf %49, %57 : vector<256x256xf32>
    %59 = vector.extract_strided_slice %11 {offsets = [5, 0], sizes = [1, 256], strides = [1, 1]} : vector<9x256xi32> to vector<1x256xi32>
    %60 = vector.broadcast %59 : vector<1x256xi32> to vector<256x256xi32>
    %61 = arith.cmpi eq, %60, %12 : vector<256x256xi32>
    %62 = vector.extract_strided_slice %6 {offsets = [5, 0], sizes = [1, 256], strides = [1, 1]} : vector<9x256xf32> to vector<1x256xf32>
    %cst_12 = arith.constant 0.000000e+00 : f32
    %63 = vector.shape_cast %62 : vector<1x256xf32> to vector<1x256xf32>
    %64 = vector.broadcast %63 : vector<1x256xf32> to vector<256x256xf32>
    %65 = vector.broadcast %cst_12 : f32 to vector<256x256xf32>
    %66 = arith.select %61, %64, %65 : vector<256x256xi1>, vector<256x256xf32>
    %67 = arith.addf %58, %66 : vector<256x256xf32>
    %68 = vector.extract_strided_slice %11 {offsets = [6, 0], sizes = [1, 256], strides = [1, 1]} : vector<9x256xi32> to vector<1x256xi32>
    %69 = vector.broadcast %68 : vector<1x256xi32> to vector<256x256xi32>
    %70 = arith.cmpi eq, %69, %12 : vector<256x256xi32>
    %71 = vector.extract_strided_slice %6 {offsets = [6, 0], sizes = [1, 256], strides = [1, 1]} : vector<9x256xf32> to vector<1x256xf32>
    %cst_13 = arith.constant 0.000000e+00 : f32
    %72 = vector.shape_cast %71 : vector<1x256xf32> to vector<1x256xf32>
    %73 = vector.broadcast %72 : vector<1x256xf32> to vector<256x256xf32>
    %74 = vector.broadcast %cst_13 : f32 to vector<256x256xf32>
    %75 = arith.select %70, %73, %74 : vector<256x256xi1>, vector<256x256xf32>
    %76 = arith.addf %67, %75 : vector<256x256xf32>
    %77 = vector.extract_strided_slice %11 {offsets = [7, 0], sizes = [1, 256], strides = [1, 1]} : vector<9x256xi32> to vector<1x256xi32>
    %78 = vector.broadcast %77 : vector<1x256xi32> to vector<256x256xi32>
    %79 = arith.cmpi eq, %78, %12 : vector<256x256xi32>
    %80 = vector.extract_strided_slice %6 {offsets = [7, 0], sizes = [1, 256], strides = [1, 1]} : vector<9x256xf32> to vector<1x256xf32>
    %cst_14 = arith.constant 0.000000e+00 : f32
    %81 = vector.shape_cast %80 : vector<1x256xf32> to vector<1x256xf32>
    %82 = vector.broadcast %81 : vector<1x256xf32> to vector<256x256xf32>
    %83 = vector.broadcast %cst_14 : f32 to vector<256x256xf32>
    %84 = arith.select %79, %82, %83 : vector<256x256xi1>, vector<256x256xf32>
    %85 = arith.addf %76, %84 : vector<256x256xf32>
    %86 = vector.extract_strided_slice %11 {offsets = [8, 0], sizes = [1, 256], strides = [1, 1]} : vector<9x256xi32> to vector<1x256xi32>
    %87 = vector.broadcast %86 : vector<1x256xi32> to vector<256x256xi32>
    %88 = arith.cmpi eq, %87, %12 : vector<256x256xi32>
    %89 = vector.extract_strided_slice %6 {offsets = [8, 0], sizes = [1, 256], strides = [1, 1]} : vector<9x256xf32> to vector<1x256xf32>
    %cst_15 = arith.constant 0.000000e+00 : f32
    %90 = vector.shape_cast %89 : vector<1x256xf32> to vector<1x256xf32>
    %91 = vector.broadcast %90 : vector<1x256xf32> to vector<256x256xf32>
    %92 = vector.broadcast %cst_15 : f32 to vector<256x256xf32>
    %93 = arith.select %88, %91, %92 : vector<256x256xi1>, vector<256x256xf32>
    %94 = arith.addf %85, %93 : vector<256x256xf32>
    %c0_16 = arith.constant 0 : index
    %c0_17 = arith.constant 0 : index
    %c0_18 = arith.constant 0 : index
    %95 = vector.load %arg3[%c0_16, %c0_17, %c0_18] : memref<1x16x256xf32, #tpu.memory_space<vmem>>, vector<1x16x256xf32>
    %96 = vector.shape_cast %95 : vector<1x16x256xf32> to vector<16x256xf32>
    %cst_19 = arith.constant dense<0.000000e+00> : vector<16x256xf32>
    %97 = tpu.matmul %96, %94, %cst_19 {dimension_numbers = #tpu.dot_dimension_numbers<[1], [0], [0], [1], [0, 0, 1, 1], [], []>} : vector<16x256xf32>, vector<256x256xf32>, vector<16x256xf32> -> vector<16x256xf32>
    %98 = vector.broadcast %9 : vector<1x256xf32> to vector<16x256xf32>
    %99 = arith.mulf %97, %98 : vector<16x256xf32>
    %c0_20 = arith.constant 0 : index
    %c0_21 = arith.constant 0 : index
    %c0_22 = arith.constant 0 : index
    %100 = vector.load %arg2[%c0_20, %c0_21, %c0_22] : memref<1x16x256xf32, #tpu.memory_space<vmem>>, vector<1x16x256xf32>
    %101 = vector.shape_cast %100 : vector<1x16x256xf32> to vector<16x256xf32>
    %102 = tpu.concatenate %101, %99 in 0 : vector<16x256xf32>, vector<16x256xf32> -> vector<32x256xf32>
    %c0_23 = arith.constant 0 : index
    %c0_24 = arith.constant 0 : index
    %103 = vector.load %arg6[%c0_23, %c0_24] : memref<32x32xf32, #tpu.memory_space<vmem>>, vector<32x32xf32>
    %cst_25 = arith.constant dense<0.000000e+00> : vector<32x256xf32>
    %104 = tpu.matmul %103, %102, %cst_25 {dimension_numbers = #tpu.dot_dimension_numbers<[1], [0], [0], [1], [0, 0, 1, 1], [], []>} : vector<32x32xf32>, vector<32x256xf32>, vector<32x256xf32> -> vector<32x256xf32>
    %c0_26 = arith.constant 0 : index
    %c0_27 = arith.constant 0 : index
    %105 = vector.load %arg7[%c0_26, %c0_27] : memref<32x1xf32, #tpu.memory_space<vmem>>, vector<32x1xf32>
    %106 = vector.broadcast %105 : vector<32x1xf32> to vector<32x256xf32>
    %107 = arith.addf %104, %106 : vector<32x256xf32>
    %cst_28 = arith.constant 0.000000e+00 : f32
    %108 = vector.broadcast %cst_28 : f32 to vector<32x256xf32>
    %109 = arith.maximumf %107, %108 : vector<32x256xf32>
    %c0_29 = arith.constant 0 : index
    %c0_30 = arith.constant 0 : index
    %c0_31 = arith.constant 0 : index
    %110 = vector.load %arg8[%c0_29, %c0_30, %c0_31] : memref<1x32x256xf32, #tpu.memory_space<vmem>>, vector<1x32x256xf32>
    %111 = vector.shape_cast %110 : vector<1x32x256xf32> to vector<32x256xf32>
    %112 = vector.shape_cast %109 : vector<32x256xf32> to vector<1x32x256xf32>
    tpu.vector_store %arg8[%c0_29, %c0_30, %c0_31], %112 {strides = array<i32>} : memref<1x32x256xf32, #tpu.memory_space<vmem>>, vector<1x32x256xf32>,
    return
  }
  func.func @transform_0(%arg0: i32, %arg1: i32) -> (i32, i32, i32) {
    %c0_i32 = arith.constant 0 : i32
    %c0_i32_0 = arith.constant 0 : i32
    return %arg0, %c0_i32, %arg1 : i32, i32, i32
  }
  func.func @transform_1(%arg0: i32, %arg1: i32) -> (i32, i32, i32) {
    %c0_i32 = arith.constant 0 : i32
    %c0_i32_0 = arith.constant 0 : i32
    %c0_i32_1 = arith.constant 0 : i32
    return %arg0, %c0_i32, %c0_i32_0 : i32, i32, i32
  }
  func.func @transform_2(%arg0: i32, %arg1: i32) -> (i32, i32, i32) {
    %c0_i32 = arith.constant 0 : i32
    %c0_i32_0 = arith.constant 0 : i32
    return %arg0, %c0_i32, %arg1 : i32, i32, i32
  }
  func.func @transform_3(%arg0: i32, %arg1: i32) -> (i32, i32, i32) {
    %c0_i32 = arith.constant 0 : i32
    %c0_i32_0 = arith.constant 0 : i32
    return %arg0, %c0_i32, %arg1 : i32, i32, i32
  }
  func.func @transform_4(%arg0: i32, %arg1: i32) -> (i32, i32) {
    %c0_i32 = arith.constant 0 : i32
    %c0_i32_0 = arith.constant 0 : i32
    %c0_i32_1 = arith.constant 0 : i32
    return %c0_i32, %c0_i32_0 : i32, i32
  }
  func.func @transform_5(%arg0: i32, %arg1: i32) -> (i32, i32) {
    %c0_i32 = arith.constant 0 : i32
    %c0_i32_0 = arith.constant 0 : i32
    %c0_i32_1 = arith.constant 0 : i32
    return %c0_i32, %c0_i32_0 : i32, i32
  }
  func.func @transform_6(%arg0: i32, %arg1: i32) -> (i32, i32, i32) {
    %c0_i32 = arith.constant 0 : i32
    %c0_i32_0 = arith.constant 0 : i32
    return %arg0, %c0_i32, %arg1 : i32, i32, i32
  }
}

</mosaic_0001>

<bundles_post_ra>
// kernel: tpu_custom_call.1
= control target key start
LH: loop header
LB: loop body
LE: loop exit
PB: predicated region body
PF: predicated region fallthrough
CT: control target
= control target key end

     0   :  { %11 = vsyncpa [#allocation3], 0  ;;  %s5310_s0 = inlined_call_operand.vmem [shape: f32[2,16,256], index: 0, kind: input, shape index: {}]   ;;  %s5311_s1 = inlined_call_operand.vmem [shape: f32[2,16,256], index: 1, kind: input, shape index: {}]   ;;  %s5312_s2 = inlined_call_operand.vmem [shape: f32[2,9,256], index: 2, kind: input, shape index: {}]   ;;  %s5313_s3 = inlined_call_operand.vmem [shape: s32[2,9,256], index: 3, kind: input, shape index: {}]   ;;  %s5314_s4 = inlined_call_operand.vmem [shape: f32[32,32], index: 4, kind: input, shape index: {}]   ;;  %s5315_s5 = inlined_call_operand.vmem [shape: f32[32,1], index: 5, kind: input, shape index: {}]   ;;  %s5316_s6 = inlined_call_operand.hbm [shape: f32[2,32,256], index: 6, kind: output, shape index: {}]  }
   0x1   :  { %13 = vsyncpa [#allocation3 + $0x1], 0  ;;  %s2853_s21 = smov 0   ;;  %s2855_s22 = smov 0  }
   0x2   :  { %s2857_s23 = smov 0   ;;  %s2859_s24 = smov 0  }
   0x3   :  { %s2861_s25 = smov 0   ;;  %s2863_s26 = smov 0  }
   0x4 LB: > { %s2615_s27 = sadd.s32 4294967295, %s2813_s26   ;;  %s2616_s28 = sadd.s32 4294967294, %s2813_s26   ;;  %s2813_s26 = sphi %s2863_s26, %s19_s26   ;;  %s2809_s25 = sphi %s2861_s25, %s5346_s25   ;;  %s2805_s24 = sphi %s2859_s24, %s5345_s24   ;;  %s2801_s23 = sphi %s2857_s23, %s5344_s23   ;;  %s2797_s22 = sphi %s2855_s22, %s5343_s22   ;;  %s2793_s21 = sphi %s2853_s21, %s5342_s21  }
   0x5   : > { %s31_s29 = sadd.s32 1, %s2809_s25  ;;  %s192_s30 = sadd.s32 1, %s2801_s23 }
   0x6   : > { %p33_p0 = scmp.ge.s32.totalorder %s31_s29, 2  ;;  %p202_p1 = scmp.ne.s32.totalorder %s2801_s23, %s2797_s22 }
   0x7   : > { %p203_p2 = scmp.eq.s32.totalorder %s2615_s27, 1  ;;  %p208_p3 = scmp.ne.s32.totalorder %s2797_s22, %s2793_s21 }
   0x8   : > { %s5348_s29 = smov (%p33_p0, %s31_s29), 0  ;;  %p209_p5 = scmp.eq.s32.totalorder %s2616_s28, 1 }
   0x9   : > { %p2893_p4 = por %p203_p2, %p202_p1  ;;  %s187_s8 = ssub.s32 %s2809_s25, %s5348_s29 }
   0xa   : > { %p2619_p6 = scmp.ge.s32.totalorder %s2813_s26, 1  ;;  %p190_p7 = scmp.eq.s32.totalorder %s187_s8, 0 }
   0xb   : > { %p2900_p8 = por %p209_p5, %p208_p3  ;;  %p280_p9 = scmp.lt.s32.totalorder %s2813_s26, 3 }
   0xc   : > { %s2906_s10 = scalar_select %p190_p7, %s2801_s23, %s192_s30  }
   0xd   : > { %p281_p10 = pnand %p2619_p6, %p280_p9 }
   0xf   : > { %284 = sbr.rel (%p281_p10) target bundleno = 785 (0x311), region = 44 }
  0x14   : > { %p338_p11 = scmp.lt.s32.totalorder %s2805_s24, 1  ;;  %vm5317_vm0 = vcmask 1040384   ;;  %v454_v8 = vlaneseq  ;;  %s2646_s16 = sshll.u32 %s2805_s24, 6 }
  0x15   : > { %s2484_s19 = scalar_lea.hbm %s5316_s6, %s2646_s16  ;;  %s2755_s14 = scalar_lea.hbm %s5316_s6, 128 }
  0x16   : > { %s339_s11 = scalar_select %p338_p11, %s2805_s24, 1  ;;  %v2927_v13 = vshrl.u32 %v454_v8, 7 }
  0x18   : > { %s2910_s12 = sshll.u32 %s339_s11, 5  ;;  %v2931_v19 = vadd.s32 120, %v2927_v13  ;;  %v2942_v25 = vadd.s32 248, %v2927_v13  ;;  %v3014_v51 = vadd.s32 112, %v2927_v13  ;;  %v3046_v60 = vadd.s32 240, %v2927_v13 }
  0x19   : > { %s360_s15 = scalar_lea.vmem %s5312_s2, %s2910_s12  ;;  %s2920_s18 = scalar_lea.vmem %s5313_s3, %s2910_s12 }
  0x1a   : > { %v373_v0 = vld [vmem:[%s360_s15] sm:$0xff]  ;;  %v375_v1 = vld [vmem:[%s360_s15 + $0x10] sm:$0x1]  ;;  %v2923_v5 = vld [vmem:[%s360_s15 + $0x18] sm:$0x1]  ;;  %s5146_s27 = scalar_lea.vmem %s5311_s1, %s2910_s12  ;;  %s5220_s8 = scalar_lea.vmem %s5310_s0, %s2910_s12 }
  0x1b   : > { %v378_v2 = vsel %vm5317_vm0, %v375_v1, -inf  ;;  %v374_v6 = vld [vmem:[%s360_s15 + $0x8] sm:$0xff]  ;;  %v386_v9 = vsel %vm5317_vm0, %v2923_v5, -inf  ;;  %v450_v15 = vld [vmem:[%s2920_s18] sm:$0xff]  ;;  %v2968_v38 = vld [vmem:[%s2920_s18 + $0x10] ss:$0 sm:$0xff] }
  0x1c   : > { %v379_v3 = vmax.f32 %v373_v0, %v378_v2  ;;  %v387_v11 = vmax.f32 %v374_v6, %v386_v9  ;;  %v2933_v20 = vperm.slane %v450_v15, 0  ;;  %v2935_v22 = vperm.slane %v450_v15, 1  ;;  %v451_v33 = vld [vmem:[%s2920_s18 + $0x8] sm:$0xff]  ;;  %s334_s15 = sand.u32 1, %s2797_s22  }
  0x1d   : > { %v2937_v23 = vperm.slane %v450_v15, 2  ;;  %v2939_v24 = vperm.slane %v450_v15, 3  ;;  %v2944_v28 = vperm.slane %v450_v15, 4  ;;  %v2946_v30 = vperm.slane %v450_v15, 5  ;;  %s2620_s12 = sshll.u32 %s334_s15, 6  ;;  %s2471_s24 = scalar_lea.sflag [#allocation3], %s334_s15 }
  0x1e   : > { %v380_v4 = vrot.slane %v379_v3, 4  ;;  %v388_v14 = vrot.slane %v387_v11, 4  ;;  %vm519_vm1 = vcmp.eq.s32.totalorder %v2933_v20, %v2931_v19  ;;  %vm715_vm2 = vcmp.eq.s32.totalorder %v2935_v22, %v2931_v19 }
  0x1f   : > { %vm911_vm3 = vcmp.eq.s32.totalorder %v2937_v23, %v2931_v19  ;;  %vm1107_vm4 = vcmp.eq.s32.totalorder %v2939_v24, %v2931_v19  ;;  %v2957_v35 = vperm.slane %v450_v15, 6  ;;  %vm1303_vm5 = vcmp.eq.s32.totalorder %v2944_v28, %v2931_v19 }
  0x20   : > { %v381_v7 = vmax.f32 %v379_v3, %v380_v4  ;;  %v389_v17 = vmax.f32 %v387_v11, %v388_v14  ;;  %v2961_v36 = vperm.slane %v450_v15, 7  ;;  %vm551_vm6 = vcmp.eq.s32.totalorder %v2933_v20, %v2942_v25 }
  0x21   : > { %vm1499_vm7 = vcmp.eq.s32.totalorder %v2946_v30, %v2931_v19  ;;  %vm747_vm8 = vcmp.eq.s32.totalorder %v2935_v22, %v2942_v25  ;;  %vm943_vm9 = vcmp.eq.s32.totalorder %v2937_v23, %v2942_v25  ;;  %v2974_v39 = vperm.slane %v451_v33, 0 }
  0x22   : > { %v382_v10 = vrot.slane %v381_v7, 2  ;;  %v390_v21 = vrot.slane %v389_v17, 2  ;;  %v2976_v41 = vperm.slane %v451_v33, 1  ;;  %v2978_v42 = vperm.slane %v451_v33, 2 }
  0x23   : > { %vm1695_vm10 = vcmp.eq.s32.totalorder %v2957_v35, %v2931_v19  ;;  %vm1139_vm11 = vcmp.eq.s32.totalorder %v2939_v24, %v2942_v25  ;;  %vm1891_vm14 = vcmp.eq.s32.totalorder %v2961_v36, %v2931_v19  ;;  %v2992_v44 = vperm.slane %v451_v33, 3 }
  0x24   : > { %v383_v12 = vmax.f32 %v381_v7, %v382_v10  ;;  %v391_v29 = vmax.f32 %v389_v17, %v390_v21  ;;  %vm2087_vm0 = vcmp.eq.s32.totalorder %v2968_v38, %v2931_v19  ;;  %v2996_v45 = vperm.slane %v451_v33, 4 }
  0x25   : > { %v2998_v46 = vperm.slane %v451_v33, 5  ;;  %v3000_v47 = vperm.slane %v451_v33, 6  ;;  %v3011_v50 = vperm.slane %v451_v33, 7  ;;  %vm1923_vm12 = vcmp.eq.s32.totalorder %v2961_v36, %v2942_v25 }
  0x26   : > { %v384_v16 = vrot.slane %v383_v12, 1  ;;  %v392_v34 = vrot.slane %v391_v29, 1  ;;  %vm2119_vm13 = vcmp.eq.s32.totalorder %v2968_v38, %v2942_v25  ;;  %vm552_vm15 = vcmp.eq.s32.totalorder %v2974_v39, %v2942_v25 }
  0x28   : > { %v385_v18 = vmax.f32 %v383_v12, %v384_v16  ;;  %v393_v37 = vmax.f32 %v391_v29, %v392_v34 }
  0x2a   : > { %v394_v26 = vsub.f32 %v373_v0, %v385_v18  ;;  %v396_v27 = vsub.f32 %v375_v1, %v385_v18  ;;  %v395_v40 = vsub.f32 %v374_v6, %v393_v37  ;;  %v397_v49 = vsub.f32 %v2923_v5, %v393_v37  ;;  %v3078_v5 = vld [vmem:[%s2920_s18 + $0x18] ss:$0 sm:$0xff] }
  0x2c   : > { %v398_v31 = vmul.f32 1.442695, %v394_v26  ;;  %v402_v32 = vmul.f32 1.442695, %v396_v27  ;;  %v400_v43 = vmul.f32 1.442695, %v395_v40 }
  0x2d   : > { %v404_v4 = vmul.f32 1.442695, %v397_v49 }
  0x2e   : > { %2717 = vpow2.f32 %v398_v31 }
  0x2f   : > { %2719 = vpow2.f32 %v402_v32 }
  0x30   : > { %2721 = vpow2.f32 %v400_v43 }
  0x31   : > { %2723 = vpow2.f32 %v404_v4 }
  0x34   : > { %v3002_v48 = vpop.eup %2717 }
  0x35   : > { %v3017_v52 = vperm.slane %v3002_v48, 0  ;;  %v3020_v53 = vperm.slane %v3002_v48, 1  ;;  %v3023_v54 = vperm.slane %v3002_v48, 2  ;;  %v3026_v55 = vperm.slane %v3002_v48, 3  ;;  %v3030_v56 = vpop.eup %2719 }
  0x36   : > { %v3033_v57 = vperm.slane %v3002_v48, 4  ;;  %v3036_v58 = vperm.slane %v3002_v48, 5  ;;  %v3039_v59 = vperm.slane %v3002_v48, 6  ;;  %v3061_v0 = vperm.slane %v3002_v48, 7  ;;  %v3099_v10 = vpop.eup %2721 }
  0x37   : > { %v585_v61 = vsel %vm519_vm1, %v3017_v52, 0.0  ;;  %v781_v62 = vsel %vm715_vm2, %v3020_v53, 0.0  ;;  %v977_v63 = vsel %vm911_vm3, %v3023_v54, 0.0  ;;  %v1173_v2 = vsel %vm1107_vm4, %v3026_v55, 0.0  ;;  %5321 = vst [vmem:[#allocation5_spill] sm:$0xff] %v3099_v10 }
  0x38   : > { %v845_v1 = vadd.f32 %v781_v62, %v585_v61  ;;  %v1369_v3 = vsel %vm1303_vm5, %v3033_v57, 0.0  ;;  %vm1304_vm1 = vcmp.eq.s32.totalorder %v2996_v45, %v2931_v19  ;;  %vm1500_vm2 = vcmp.eq.s32.totalorder %v2998_v46, %v2931_v19 }
  0x39   : > { %vm748_vm3 = vcmp.eq.s32.totalorder %v2976_v41, %v2942_v25  ;;  %vm944_vm4 = vcmp.eq.s32.totalorder %v2978_v42, %v2942_v25  ;;  %v1565_v6 = vsel %vm1499_vm7, %v3036_v58, 0.0  ;;  %v3089_v7 = vperm.slane %v3030_v56, 0 }
  0x3a   : > { %v617_v8 = vsel %vm551_vm6, %v3017_v52, 0.0  ;;  %v813_v9 = vsel %vm747_vm8, %v3020_v53, 0.0  ;;  %v1041_v11 = vadd.f32 %v977_v63, %v845_v1  ;;  %v1761_v12 = vsel %vm1695_vm10, %v3039_v59, 0.0 }
  0x3b   : > { %v877_v14 = vadd.f32 %v813_v9, %v617_v8  ;;  %v1009_v15 = vsel %vm943_vm9, %v3023_v54, 0.0  ;;  %vm1696_vm5 = vcmp.eq.s32.totalorder %v3000_v47, %v2931_v19  ;;  %vm1892_vm6 = vcmp.eq.s32.totalorder %v3011_v50, %v2931_v19 }
  0x3c   : > { %vm1140_vm7 = vcmp.eq.s32.totalorder %v2992_v44, %v2942_v25  ;;  %v1957_v16 = vsel %vm1891_vm14, %v3061_v0, 0.0  ;;  %v3123_v17 = vsel %vm2087_vm0, %v3089_v7, 0.0  ;;  %v1205_v18 = vsel %vm1139_vm11, %v3026_v55, 0.0 }
  0x3d   : > { %vm5322_vm8 = vcmp.eq.s32.totalorder %v2944_v28, %v2942_v25  ;;  %vm1336_vm9 = vcmp.eq.s32.totalorder %v2996_v45, %v2942_v25  ;;  %v1237_v26 = vadd.f32 %v1173_v2, %v1041_v11  ;;  %v1073_v27 = vadd.f32 %v1009_v15, %v877_v14 }
  0x3e   : > { %v1401_v21 = vsel %vm5322_vm8, %v3033_v57, 0.0  ;;  %vm5323_vm0 = vcmp.eq.s32.totalorder %v2946_v30, %v2942_v25  ;;  %vm5324_vm10 = vcmp.eq.s32.totalorder %v2957_v35, %v2942_v25  ;;  %v3150_v32 = vperm.slane %v3099_v10, 0 }
  0x3f   : > { %v1597_v29 = vsel %vm5323_vm0, %v3036_v58, 0.0  ;;  %v1793_v31 = vsel %vm5324_vm10, %v3039_v59, 0.0  ;;  %v3153_v33 = vperm.slane %v3099_v10, 1  ;;  %v3156_v34 = vperm.slane %v3099_v10, 2 }
  0x40   : > { %v1433_v37 = vadd.f32 %v1369_v3, %v1237_v26  ;;  %v1269_v40 = vadd.f32 %v1205_v18, %v1073_v27  ;;  %v3163_v43 = vperm.slane %v3099_v10, 3  ;;  %v3166_v49 = vperm.slane %v3099_v10, 4  ;;  %v3225_v27 = vpop.eup %2723 }
  0x41   : > { %vm5325_vm0 = vcmp.eq.s32.totalorder %v2974_v39, %v2931_v19  ;;  %vm5326_vm10 = vcmp.eq.s32.totalorder %v2976_v41, %v2931_v19  ;;  %vm5327_vm11 = vcmp.eq.s32.totalorder %v2978_v42, %v2931_v19  ;;  %v3185_v1 = vperm.slane %v3099_v10, 5 }
  0x42   : > { %v586_v61 = vsel %vm5325_vm0, %v3150_v32, 0.0  ;;  %v782_v62 = vsel %vm5326_vm10, %v3153_v33, 0.0  ;;  %v978_v63 = vsel %vm5327_vm11, %v3156_v34, 0.0  ;;  %vm2120_vm14 = vcmp.eq.s32.totalorder %v3078_v5, %v2942_v25 }
  0x43   : > { %vm1105_vm8 = vcmp.eq.s32.totalorder %v2939_v24, %v3014_v51  ;;  %vm1301_vm0 = vcmp.eq.s32.totalorder %v2944_v28, %v3014_v51  ;;  %v1629_v2 = vadd.f32 %v1565_v6, %v1433_v37  ;;  %v1465_v3 = vadd.f32 %v1401_v21, %v1269_v40 }
  0x44   : > { %v1989_v4 = vsel %vm1923_vm12, %v3061_v0, 0.0  ;;  %v846_v8 = vadd.f32 %v782_v62, %v586_v61  ;;  %v2185_v9 = vsel %vm2119_vm13, %v3089_v7, 0.0  ;;  %vm5328_vm10 = vcmp.eq.s32.totalorder %v2992_v44, %v2931_v19 }
  0x45   : > { %v1174_v6 = vsel %vm5328_vm10, %v3163_v43, 0.0  ;;  %v3208_v11 = vperm.slane %v3099_v10, 6  ;;  %v3211_v14 = vperm.slane %v3099_v10, 7  ;;  %vm1693_vm12 = vcmp.eq.s32.totalorder %v2957_v35, %v3014_v51 }
  0x46   : > { %vm549_vm11 = vcmp.eq.s32.totalorder %v2933_v20, %v3046_v60  ;;  %vm745_vm13 = vcmp.eq.s32.totalorder %v2935_v22, %v3046_v60  ;;  %v1825_v15 = vadd.f32 %v1761_v12, %v1629_v2  ;;  %v1661_v18 = vadd.f32 %v1597_v29, %v1465_v3 }
  0x47   : > { %v1042_v21 = vadd.f32 %v978_v63, %v846_v8  ;;  %v618_v26 = vsel %vm552_vm15, %v3150_v32, 0.0  ;;  %vm941_vm10 = vcmp.eq.s32.totalorder %v2937_v23, %v3046_v60  ;;  %v1370_v37 = vsel %vm1304_vm1, %v3166_v49, 0.0 }
  0x48   : > { %v1566_v12 = vsel %vm1500_vm2, %v3185_v1, 0.0  ;;  %v814_v29 = vsel %vm748_vm3, %v3153_v33, 0.0  ;;  %v1010_v40 = vsel %vm944_vm4, %v3156_v34, 0.0  ;;  %vm1889_vm15 = vcmp.eq.s32.totalorder %v2961_v36, %v3014_v51 }
  0x49   : > { %vm1137_vm1 = vcmp.eq.s32.totalorder %v2939_v24, %v3046_v60  ;;  %v2021_v61 = vadd.f32 %v1957_v16, %v1825_v15  ;;  %v1857_v62 = vadd.f32 %v1793_v31, %v1661_v18  ;;  %v1238_v63 = vadd.f32 %v1174_v6, %v1042_v21 }
  0x4a   : > { %v3248_v2 = vperm.slane %v3225_v27, 0  ;;  %v1762_v3 = vsel %vm1696_vm5, %v3208_v11, 0.0  ;;  %v1958_v8 = vsel %vm1892_vm6, %v3211_v14, 0.0  ;;  %v878_v10 = vadd.f32 %v814_v29, %v618_v26 }
  0x4b   : > { %v1206_v16 = vsel %vm1140_vm7, %v3163_v43, 0.0  ;;  %vm1333_vm2 = vcmp.eq.s32.totalorder %v2944_v28, %v3046_v60  ;;  %vm1529_vm3 = vcmp.eq.s32.totalorder %v2946_v30, %v3046_v60  ;;  %v2217_v31 = vadd.f32 %v3123_v17, %v2021_v61 }
  0x4c   : > { %v2053_v6 = vadd.f32 %v1989_v4, %v1857_v62  ;;  %v1434_v15 = vadd.f32 %v1370_v37, %v1238_v63  ;;  %v1402_v18 = vsel %vm1336_vm9, %v3166_v49, 0.0  ;;  %vm5329_vm5 = vcmp.eq.s32.totalorder %v3078_v5, %v2931_v19 }
  0x4d   : > { %v2154_v21 = vsel %vm5329_vm5, %v3248_v2, 0.0  ;;  %v1074_v26 = vadd.f32 %v1010_v40, %v878_v10  ;;  %vm5330_vm6 = vcmp.eq.s32.totalorder %v2998_v46, %v2942_v25  ;;  %vm5331_vm7 = vcmp.eq.s32.totalorder %v3000_v47, %v2942_v25  ;;  %2255 = vmatpush.msra.mxu0 %v2217_v31 }
  0x4e   : > { %v1598_v29 = vsel %vm5330_vm6, %v3185_v1, 0.0  ;;  %v1794_v17 = vsel %vm5331_vm7, %v3208_v11, 0.0  ;;  %vm714_vm4 = vcmp.eq.s32.totalorder %v2976_v41, %v3014_v51  ;;  %v2249_v19 = vadd.f32 %v2185_v9, %v2053_v6 }
  0x4f   : > { %v1630_v4 = vadd.f32 %v1566_v12, %v1434_v15  ;;  %vm5332_vm5 = vcmp.eq.s32.totalorder %v2933_v20, %v3014_v51  ;;  %vm5333_vm6 = vcmp.eq.s32.totalorder %v2935_v22, %v3014_v51  ;;  %v1270_v40 = vadd.f32 %v1206_v16, %v1074_v26 }
  0x50   : > { %v583_v10 = vsel %vm5332_vm5, %v3017_v52, 0.0  ;;  %v779_v37 = vsel %vm5333_vm6, %v3020_v53, 0.0  ;;  %vm5334_vm7 = vcmp.eq.s32.totalorder %v3011_v50, %v2942_v25  ;;  %vm5335_vm9 = vcmp.eq.s32.totalorder %v2937_v23, %v3014_v51  ;;  %2278 = vmatpush.msra.mxu1 %v2249_v19 }
  0x51   : > { %v1990_v61 = vsel %vm5334_vm7, %v3211_v14, 0.0  ;;  %v843_v62 = vadd.f32 %v779_v37, %v583_v10  ;;  %v975_v9 = vsel %vm5335_vm9, %v3023_v54, 0.0  ;;  %v1826_v12 = vadd.f32 %v1762_v3, %v1630_v4 }
  0x52   : > { %v2186_v63 = vsel %vm2120_vm14, %v3248_v2, 0.0  ;;  %v1171_v16 = vsel %vm1105_vm8, %v3026_v55, 0.0  ;;  %v1367_v31 = vsel %vm1301_vm0, %v3033_v57, 0.0  ;;  %v1466_v6 = vadd.f32 %v1402_v18, %v1270_v40 }
  0x53   : > { %v1039_v15 = vadd.f32 %v975_v9, %v843_v62  ;;  %vm5336_vm9 = vcmp.eq.s32.totalorder %v2946_v30, %v3014_v51  ;;  %vm2085_vm14 = vcmp.eq.s32.totalorder %v2968_v38, %v3014_v51  ;;  %v2022_v25 = vadd.f32 %v1958_v8, %v1826_v12 }
  0x54   : > { %v1563_v3 = vsel %vm5336_vm9, %v3036_v58, 0.0  ;;  %v1759_v26 = vsel %vm1693_vm12, %v3039_v59, 0.0  ;;  %v615_v18 = vsel %vm549_vm11, %v3017_v52, 0.0  ;;  %v811_v19 = vsel %vm745_vm13, %v3020_v53, 0.0 }
  0x55   : > { %v1662_v4 = vadd.f32 %v1598_v29, %v1466_v6  ;;  %v1235_v10 = vadd.f32 %v1171_v16, %v1039_v15  ;;  %v875_v37 = vadd.f32 %v811_v19, %v615_v18  ;;  %v1007_v8 = vsel %vm941_vm10, %v3023_v54, 0.0 }
  0x56   : > { %v2218_v40 = vadd.f32 %v2154_v21, %v2022_v25  ;;  %v1955_v62 = vsel %vm1889_vm15, %v3061_v0, 0.0  ;;  %v2151_v9 = vsel %vm2085_vm14, %v3089_v7, 0.0  ;;  %v1203_v29 = vsel %vm1137_vm1, %v3026_v55, 0.0 }
  0x57   : > { %v1858_v12 = vadd.f32 %v1794_v17, %v1662_v4  ;;  %v1431_v16 = vadd.f32 %v1367_v31, %v1235_v10  ;;  %v1071_v6 = vadd.f32 %v1007_v8, %v875_v37  ;;  %vm1725_vm8 = vcmp.eq.s32.totalorder %v2957_v35, %v3046_v60 }
  0x58   : > { %2301 = vmatpush.msra.mxu2 %v2218_v40  ;;  %v1399_v21 = vsel %vm1333_vm2, %v3033_v57, 0.0  ;;  %v1595_v15 = vsel %vm1529_vm3, %v3036_v58, 0.0  ;;  %v1791_v25 = vsel %vm1725_vm8, %v3039_v59, 0.0  ;;  %vm5337_vm0 = vcmp.eq.s32.totalorder %v2974_v39, %v3014_v51 }
  0x59   : > { %v584_v17 = vsel %vm5337_vm0, %v3150_v32, 0.0  ;;  %v2054_v31 = vadd.f32 %v1990_v61, %v1858_v12  ;;  %v1627_v18 = vadd.f32 %v1563_v3, %v1431_v16  ;;  %v1267_v19 = vadd.f32 %v1203_v29, %v1071_v6 }
  0x5a   : > { %vm1921_vm11 = vcmp.eq.s32.totalorder %v2961_v36, %v3046_v60  ;;  %vm2117_vm12 = vcmp.eq.s32.totalorder %v2968_v38, %v3046_v60  ;;  %v780_v4 = vsel %vm714_vm4, %v3153_v33, 0.0  ;;  %vm5338_vm13 = vcmp.eq.s32.totalorder %v2978_v42, %v3014_v51 }
  0x5b   : > { %v976_v10 = vsel %vm5338_vm13, %v3156_v34, 0.0  ;;  %vm1106_vm10 = vcmp.eq.s32.totalorder %v2992_v44, %v3014_v51  ;;  %v2250_v61 = vadd.f32 %v2186_v63, %v2054_v31  ;;  %v1823_v3 = vadd.f32 %v1759_v26, %v1627_v18 }
  0x5c   : > { %v1463_v37 = vadd.f32 %v1399_v21, %v1267_v19  ;;  %v844_v8 = vadd.f32 %v780_v4, %v584_v17  ;;  %v1172_v40 = vsel %vm1106_vm10, %v3163_v43, 0.0  ;;  %vm1302_vm15 = vcmp.eq.s32.totalorder %v2996_v45, %v3014_v51 }
  0x5d   : > { %vm1498_vm1 = vcmp.eq.s32.totalorder %v2998_v46, %v3014_v51  ;;  %vm1694_vm2 = vcmp.eq.s32.totalorder %v3000_v47, %v3014_v51  ;;  %2324 = vmatpush.msra.mxu3 %v2250_v61  ;;  %v2019_v29 = vadd.f32 %v1955_v62, %v1823_v3  ;;  %vm550_vm3 = vcmp.eq.s32.totalorder %v2974_v39, %v3046_v60 }
  0x5e   : > { %v1659_v12 = vadd.f32 %v1595_v15, %v1463_v37  ;;  %v1040_v16 = vadd.f32 %v976_v10, %v844_v8  ;;  %v1987_v63 = vsel %vm1921_vm11, %v3061_v0, 0.0  ;;  %v2183_v26 = vsel %vm2117_vm12, %v3089_v7, 0.0 }
  0x5f   : > { %v1368_v6 = vsel %vm1302_vm15, %v3166_v49, 0.0  ;;  %v1564_v21 = vsel %vm1498_vm1, %v3185_v1, 0.0  ;;  %v2215_v62 = vadd.f32 %v2151_v9, %v2019_v29  ;;  %v1760_v31 = vsel %vm1694_vm2, %v3208_v11, 0.0 }
  0x60   : > { %v1855_v15 = vadd.f32 %v1791_v25, %v1659_v12  ;;  %v1236_v17 = vadd.f32 %v1172_v40, %v1040_v16  ;;  %vm1890_vm4 = vcmp.eq.s32.totalorder %v3011_v50, %v3014_v51  ;;  %v616_v18 = vsel %vm550_vm3, %v3150_v32, 0.0 }
  0x61   : > { %vm746_vm5 = vcmp.eq.s32.totalorder %v2976_v41, %v3046_v60  ;;  %vm942_vm6 = vcmp.eq.s32.totalorder %v2978_v42, %v3046_v60  ;;  %2256 = vmatpush.msra.mxu0 %v2215_v62  ;;  %vm2086_vm7 = vcmp.eq.s32.totalorder %v3078_v5, %v3014_v51  ;;  %vm1138_vm9 = vcmp.eq.s32.totalorder %v2992_v44, %v3046_v60 }
  0x62   : > { %v2051_v19 = vadd.f32 %v1987_v63, %v1855_v15  ;;  %v1432_v4 = vadd.f32 %v1368_v6, %v1236_v17  ;;  %v812_v9 = vsel %vm746_vm5, %v3153_v33, 0.0  ;;  %v1008_v25 = vsel %vm942_vm6, %v3156_v34, 0.0 }
  0x63   : > { %v876_v10 = vadd.f32 %v812_v9, %v616_v18  ;;  %vm1334_vm14 = vcmp.eq.s32.totalorder %v2996_v45, %v3046_v60  ;;  %v1204_v37 = vsel %vm1138_vm9, %v3163_v43, 0.0  ;;  %vm1530_vm8 = vcmp.eq.s32.totalorder %v2998_v46, %v3046_v60 }
  0x64   : > { %v2247_v61 = vadd.f32 %v2183_v26, %v2051_v19  ;;  %v1628_v3 = vadd.f32 %v1564_v21, %v1432_v4  ;;  %v1956_v8 = vsel %vm1890_vm4, %v3211_v14, 0.0  ;;  %vm1726_vm0 = vcmp.eq.s32.totalorder %v3000_v47, %v3046_v60 }
  0x65   : > { %v1072_v40 = vadd.f32 %v1008_v25, %v876_v10  ;;  %vm1922_vm11 = vcmp.eq.s32.totalorder %v3011_v50, %v3046_v60  ;;  %v2152_v12 = vsel %vm2086_vm7, %v3248_v2, 0.0  ;;  %v1400_v16 = vsel %vm1334_vm14, %v3166_v49, 0.0 }
  0x66   : > { %2279 = vmatpush.msra.mxu1 %v2247_v61  ;;  %v1824_v29 = vadd.f32 %v1760_v31, %v1628_v3  ;;  %vm2118_vm12 = vcmp.eq.s32.totalorder %v3078_v5, %v3046_v60  ;;  %v1596_v51 = vsel %vm1530_vm8, %v3185_v1, 0.0  ;;  %v1792_v26 = vsel %vm1726_vm0, %v3208_v11, 0.0 }
  0x67   : > { %v1268_v63 = vadd.f32 %v1204_v37, %v1072_v40  ;;  %v3430_v6 = vadd.s32 104, %v2927_v13  ;;  %v1988_v62 = vsel %vm1922_vm11, %v3211_v14, 0.0  ;;  %v2184_v15 = vsel %vm2118_vm12, %v3248_v2, 0.0 }
  0x68   : > { %v2020_v21 = vadd.f32 %v1956_v8, %v1824_v29  ;;  %v3435_v17 = vadd.s32 232, %v2927_v13  ;;  %v3456_v61 = vadd.s32 96, %v2927_v13  ;;  %v3460_v40 = vadd.s32 224, %v2927_v13 }
  0x69   : > { %v1464_v31 = vadd.f32 %v1400_v16, %v1268_v63  ;;  %vm515_vm13 = vcmp.eq.s32.totalorder %v2933_v20, %v3430_v6  ;;  %vm711_vm10 = vcmp.eq.s32.totalorder %v2935_v22, %v3430_v6  ;;  %vm907_vm15 = vcmp.eq.s32.totalorder %v2937_v23, %v3430_v6 }
  0x6a   : > { %v2216_v60 = vadd.f32 %v2152_v12, %v2020_v21  ;;  %v581_v18 = vsel %vm515_vm13, %v3017_v52, 0.0  ;;  %v777_v19 = vsel %vm711_vm10, %v3020_v53, 0.0  ;;  %v973_v4 = vsel %vm907_vm15, %v3023_v54, 0.0 }
  0x6b   : > { %v1660_v9 = vadd.f32 %v1596_v51, %v1464_v31  ;;  %v841_v25 = vadd.f32 %v777_v19, %v581_v18  ;;  %vm1103_vm1 = vcmp.eq.s32.totalorder %v2939_v24, %v3430_v6  ;;  %vm1299_vm2 = vcmp.eq.s32.totalorder %v2944_v28, %v3430_v6 }
  0x6c   : > { %2302 = vmatpush.msra.mxu2 %v2216_v60  ;;  %v1169_v10 = vsel %vm1103_vm1, %v3026_v55, 0.0  ;;  %vm1495_vm3 = vcmp.eq.s32.totalorder %v2946_v30, %v3430_v6  ;;  %vm1691_vm4 = vcmp.eq.s32.totalorder %v2957_v35, %v3430_v6  ;;  %v1365_v8 = vsel %vm1299_vm2, %v3033_v57, 0.0 }
  0x6d   : > { %v1856_v3 = vadd.f32 %v1792_v26, %v1660_v9  ;;  %v1037_v37 = vadd.f32 %v973_v4, %v841_v25  ;;  %v1561_v29 = vsel %vm1495_vm3, %v3036_v58, 0.0  ;;  %v1757_v12 = vsel %vm1691_vm4, %v3039_v59, 0.0 }
  0x6e   : > { %vm547_vm5 = vcmp.eq.s32.totalorder %v2933_v20, %v3435_v17  ;;  %vm743_vm6 = vcmp.eq.s32.totalorder %v2935_v22, %v3435_v17  ;;  %vm1887_vm7 = vcmp.eq.s32.totalorder %v2961_v36, %v3430_v6  ;;  %vm2083_vm9 = vcmp.eq.s32.totalorder %v2968_v38, %v3430_v6 }
  0x6f   : > { %v2052_v16 = vadd.f32 %v1988_v62, %v1856_v3  ;;  %v1233_v63 = vadd.f32 %v1169_v10, %v1037_v37  ;;  %v613_v51 = vsel %vm547_vm5, %v3017_v52, 0.0  ;;  %v809_v26 = vsel %vm743_vm6, %v3020_v53, 0.0 }
  0x70   : > { %vm939_vm14 = vcmp.eq.s32.totalorder %v2937_v23, %v3435_v17  ;;  %vm1135_vm8 = vcmp.eq.s32.totalorder %v2939_v24, %v3435_v17  ;;  %v873_v62 = vadd.f32 %v809_v26, %v613_v51  ;;  %vm1331_vm0 = vcmp.eq.s32.totalorder %v2944_v28, %v3435_v17 }
  0x71   : > { %v2248_v21 = vadd.f32 %v2184_v15, %v2052_v16  ;;  %v1429_v31 = vadd.f32 %v1365_v8, %v1233_v63  ;;  %v1005_v60 = vsel %vm939_vm14, %v3023_v54, 0.0  ;;  %v1201_v18 = vsel %vm1135_vm8, %v3026_v55, 0.0 }
  0x72   : > { %vm1527_vm11 = vcmp.eq.s32.totalorder %v2946_v30, %v3435_v17  ;;  %vm1723_vm12 = vcmp.eq.s32.totalorder %v2957_v35, %v3435_v17  ;;  %v1953_v15 = vsel %vm1887_vm7, %v3061_v0, 0.0  ;;  %v2149_v4 = vsel %vm2083_vm9, %v3089_v7, 0.0 }
  0x73   : > { %2325 = vmatpush.msra.mxu3 %v2248_v21  ;;  %v1625_v19 = vadd.f32 %v1561_v29, %v1429_v31  ;;  %v1069_v9 = vadd.f32 %v1005_v60, %v873_v62  ;;  %v1397_v25 = vsel %vm1331_vm0, %v3033_v57, 0.0  ;;  %v1593_v10 = vsel %vm1527_vm11, %v3036_v58, 0.0 }
  0x74   : > { %v1789_v3 = vsel %vm1723_vm12, %v3039_v59, 0.0  ;;  %vm516_vm13 = vcmp.eq.s32.totalorder %v2974_v39, %v3430_v6  ;;  %vm1919_vm10 = vcmp.eq.s32.totalorder %v2961_v36, %v3435_v17  ;;  %vm2115_vm15 = vcmp.eq.s32.totalorder %v2968_v38, %v3435_v17 }
  0x75   : > { %v1821_v37 = vadd.f32 %v1757_v12, %v1625_v19  ;;  %v1265_v8 = vadd.f32 %v1201_v18, %v1069_v9  ;;  %v582_v29 = vsel %vm516_vm13, %v3150_v32, 0.0  ;;  %vm712_vm1 = vcmp.eq.s32.totalorder %v2976_v41, %v3430_v6 }
  0x76   : > { %vm908_vm2 = vcmp.eq.s32.totalorder %v2978_v42, %v3430_v6  ;;  %vm1104_vm3 = vcmp.eq.s32.totalorder %v2992_v44, %v3430_v6  ;;  %v778_v63 = vsel %vm712_vm1, %v3153_v33, 0.0  ;;  %v1985_v26 = vsel %vm1919_vm10, %v3061_v0, 0.0 }
  0x77   : > { %v2017_v16 = vadd.f32 %v1953_v15, %v1821_v37  ;;  %v1461_v12 = vadd.f32 %v1397_v25, %v1265_v8  ;;  %v974_v51 = vsel %vm908_vm2, %v3156_v34, 0.0  ;;  %v842_v21 = vadd.f32 %v778_v63, %v582_v29 }
  0x78   : > { %vm1300_vm4 = vcmp.eq.s32.totalorder %v2996_v45, %v3430_v6  ;;  %vm1496_vm5 = vcmp.eq.s32.totalorder %v2998_v46, %v3430_v6  ;;  %v2181_v60 = vsel %vm2115_vm15, %v3089_v7, 0.0  ;;  %v1170_v18 = vsel %vm1104_vm3, %v3163_v43, 0.0 }
  0x79   : > { %v2213_v31 = vadd.f32 %v2149_v4, %v2017_v16  ;;  %v1657_v62 = vadd.f32 %v1593_v10, %v1461_v12  ;;  %v1038_v19 = vadd.f32 %v974_v51, %v842_v21  ;;  %v1366_v15 = vsel %vm1300_vm4, %v3166_v49, 0.0 }
  0x7a   : > { %v1562_v9 = vsel %vm1496_vm5, %v3185_v1, 0.0  ;;  %vm1692_vm6 = vcmp.eq.s32.totalorder %v3000_v47, %v3430_v6  ;;  %vm1888_vm7 = vcmp.eq.s32.totalorder %v3011_v50, %v3430_v6  ;;  %vm2084_vm9 = vcmp.eq.s32.totalorder %v3078_v5, %v3430_v6 }
  0x7b   : > { %2257 = vmatpush.msra.mxu0 %v2213_v31  ;;  %v1853_v25 = vadd.f32 %v1789_v3, %v1657_v62  ;;  %v1758_v37 = vsel %vm1692_vm6, %v3208_v11, 0.0  ;;  %v1234_v4 = vadd.f32 %v1170_v18, %v1038_v19  ;;  %vm548_vm14 = vcmp.eq.s32.totalorder %v2974_v39, %v3435_v17 }
  0x7c   : > { %vm744_vm8 = vcmp.eq.s32.totalorder %v2976_v41, %v3435_v17  ;;  %vm940_vm0 = vcmp.eq.s32.totalorder %v2978_v42, %v3435_v17  ;;  %v614_v3 = vsel %vm548_vm14, %v3150_v32, 0.0  ;;  %vm1136_vm11 = vcmp.eq.s32.totalorder %v2992_v44, %v3435_v17 }
  0x7d   : > { %v2049_v10 = vadd.f32 %v1985_v26, %v1853_v25  ;;  %v810_v8 = vsel %vm744_vm8, %v3153_v33, 0.0  ;;  %v1006_v29 = vsel %vm940_vm0, %v3156_v34, 0.0  ;;  %v1430_v16 = vadd.f32 %v1366_v15, %v1234_v4 }
  0x7e   : > { %v874_v12 = vadd.f32 %v810_v8, %v614_v3  ;;  %vm1332_vm12 = vcmp.eq.s32.totalorder %v2996_v45, %v3435_v17  ;;  %v1954_v51 = vsel %vm1888_vm7, %v3211_v14, 0.0  ;;  %v1202_v21 = vsel %vm1136_vm11, %v3163_v43, 0.0 }
  0x7f   : > { %v2245_v63 = vadd.f32 %v2181_v60, %v2049_v10  ;;  %vm1528_vm13 = vcmp.eq.s32.totalorder %v2998_v46, %v3435_v17  ;;  %v1626_v26 = vadd.f32 %v1562_v9, %v1430_v16  ;;  %v2150_v31 = vsel %vm2084_vm9, %v3248_v2, 0.0 }
  0x80   : > { %v1070_v62 = vadd.f32 %v1006_v29, %v874_v12  ;;  %vm1724_vm10 = vcmp.eq.s32.totalorder %v3000_v47, %v3435_v17  ;;  %v1398_v60 = vsel %vm1332_vm12, %v3166_v49, 0.0  ;;  %v1594_v18 = vsel %vm1528_vm13, %v3185_v1, 0.0 }
  0x81   : > { %2280 = vmatpush.msra.mxu1 %v2245_v63  ;;  %v1790_v19 = vsel %vm1724_vm10, %v3208_v11, 0.0  ;;  %vm513_vm15 = vcmp.eq.s32.totalorder %v2933_v20, %v3456_v61  ;;  %v1822_v15 = vadd.f32 %v1758_v37, %v1626_v26  ;;  %vm1920_vm1 = vcmp.eq.s32.totalorder %v3011_v50, %v3435_v17 }
  0x82   : > { %v1266_v9 = vadd.f32 %v1202_v21, %v1070_v62  ;;  %vm2116_vm2 = vcmp.eq.s32.totalorder %v3078_v5, %v3435_v17  ;;  %v579_v6 = vsel %vm513_vm15, %v3017_v52, 0.0  ;;  %vm709_vm3 = vcmp.eq.s32.totalorder %v2935_v22, %v3456_v61 }
  0x83   : > { %vm905_vm4 = vcmp.eq.s32.totalorder %v2937_v23, %v3456_v61  ;;  %vm1101_vm5 = vcmp.eq.s32.totalorder %v2939_v24, %v3456_v61  ;;  %v2018_v25 = vadd.f32 %v1954_v51, %v1822_v15  ;;  %v775_v4 = vsel %vm709_vm3, %v3020_v53, 0.0 }
  0x84   : > { %v1462_v37 = vadd.f32 %v1398_v60, %v1266_v9  ;;  %v971_v10 = vsel %vm905_vm4, %v3023_v54, 0.0  ;;  %v1986_v3 = vsel %vm1920_vm1, %v3211_v14, 0.0  ;;  %v839_v17 = vadd.f32 %v775_v4, %v579_v6 }
  0x85   : > { %vm1297_vm6 = vcmp.eq.s32.totalorder %v2944_v28, %v3456_v61  ;;  %vm1493_vm7 = vcmp.eq.s32.totalorder %v2946_v30, %v3456_v61  ;;  %v2214_v8 = vadd.f32 %v2150_v31, %v2018_v25  ;;  %v2182_v16 = vsel %vm2116_vm2, %v3248_v2, 0.0 }
  0x86   : > { %v1658_v29 = vadd.f32 %v1594_v18, %v1462_v37  ;;  %v1167_v12 = vsel %vm1101_vm5, %v3026_v55, 0.0  ;;  %v1035_v63 = vadd.f32 %v971_v10, %v839_v17  ;;  %v1363_v51 = vsel %vm1297_vm6, %v3033_v57, 0.0 }
  0x87   : > { %v1559_v21 = vsel %vm1493_vm7, %v3036_v58, 0.0  ;;  %vm1689_vm9 = vcmp.eq.s32.totalorder %v2957_v35, %v3456_v61  ;;  %2303 = vmatpush.msra.mxu2 %v2214_v8  ;;  %vm1885_vm14 = vcmp.eq.s32.totalorder %v2961_v36, %v3456_v61  ;;  %vm2081_vm8 = vcmp.eq.s32.totalorder %v2968_v38, %v3456_v61 }
  0x88   : > { %v1854_v26 = vadd.f32 %v1790_v19, %v1658_v29  ;;  %v1755_v62 = vsel %vm1689_vm9, %v3039_v59, 0.0  ;;  %v1231_v31 = vadd.f32 %v1167_v12, %v1035_v63  ;;  %vm545_vm0 = vcmp.eq.s32.totalorder %v2933_v20, %v3460_v40 }
  0x89   : > { %vm741_vm11 = vcmp.eq.s32.totalorder %v2935_v22, %v3460_v40  ;;  %vm937_vm12 = vcmp.eq.s32.totalorder %v2937_v23, %v3460_v40  ;;  %v611_v18 = vsel %vm545_vm0, %v3017_v52, 0.0  ;;  %vm1133_vm13 = vcmp.eq.s32.totalorder %v2939_v24, %v3460_v40 }
  0x8a   : > { %v2050_v60 = vadd.f32 %v1986_v3, %v1854_v26  ;;  %v807_v19 = vsel %vm741_vm11, %v3020_v53, 0.0  ;;  %v1003_v15 = vsel %vm937_vm12, %v3023_v54, 0.0  ;;  %v1427_v9 = vadd.f32 %v1363_v51, %v1231_v31 }
  0x8b   : > { %v871_v6 = vadd.f32 %v807_v19, %v611_v18  ;;  %vm1329_vm10 = vcmp.eq.s32.totalorder %v2944_v28, %v3460_v40  ;;  %v1951_v37 = vsel %vm1885_vm14, %v3061_v0, 0.0  ;;  %v1199_v4 = vsel %vm1133_vm13, %v3026_v55, 0.0 }
  0x8c   : > { %v2246_v25 = vadd.f32 %v2182_v16, %v2050_v60  ;;  %vm1525_vm15 = vcmp.eq.s32.totalorder %v2946_v30, %v3460_v40  ;;  %v1623_v10 = vadd.f32 %v1559_v21, %v1427_v9  ;;  %v2147_v3 = vsel %vm2081_vm8, %v3089_v7, 0.0 }
  0x8d   : > { %v1067_v17 = vadd.f32 %v1003_v15, %v871_v6  ;;  %vm1721_vm1 = vcmp.eq.s32.totalorder %v2957_v35, %v3460_v40  ;;  %v1395_v8 = vsel %vm1329_vm10, %v3033_v57, 0.0  ;;  %v1591_v29 = vsel %vm1525_vm15, %v3036_v58, 0.0 }
  0x8e   : > { %2326 = vmatpush.msra.mxu3 %v2246_v25  ;;  %v1787_v16 = vsel %vm1721_vm1, %v3039_v59, 0.0  ;;  %vm514_vm2 = vcmp.eq.s32.totalorder %v2974_v39, %v3456_v61  ;;  %v1819_v12 = vadd.f32 %v1755_v62, %v1623_v10  ;;  %vm1917_vm3 = vcmp.eq.s32.totalorder %v2961_v36, %v3460_v40 }
  0x8f   : > { %v1263_v63 = vadd.f32 %v1199_v4, %v1067_v17  ;;  %vm2113_vm4 = vcmp.eq.s32.totalorder %v2968_v38, %v3460_v40  ;;  %v580_v51 = vsel %vm514_vm2, %v3150_v32, 0.0  ;;  %vm710_vm5 = vcmp.eq.s32.totalorder %v2976_v41, %v3456_v61 }
  0x90   : > { %vm906_vm6 = vcmp.eq.s32.totalorder %v2978_v42, %v3456_v61  ;;  %vm1102_vm7 = vcmp.eq.s32.totalorder %v2992_v44, %v3456_v61  ;;  %v2015_v21 = vadd.f32 %v1951_v37, %v1819_v12  ;;  %v776_v62 = vsel %vm710_vm5, %v3153_v33, 0.0 }
  0x91   : > { %v1459_v26 = vadd.f32 %v1395_v8, %v1263_v63  ;;  %v972_v31 = vsel %vm906_vm6, %v3156_v34, 0.0  ;;  %v1983_v60 = vsel %vm1917_vm3, %v3061_v0, 0.0  ;;  %v840_v18 = vadd.f32 %v776_v62, %v580_v51 }
  0x92   : > { %vm1298_vm9 = vcmp.eq.s32.totalorder %v2996_v45, %v3456_v61  ;;  %vm1494_vm14 = vcmp.eq.s32.totalorder %v2998_v46, %v3456_v61  ;;  %v2211_v19 = vadd.f32 %v2147_v3, %v2015_v21  ;;  %v2179_v9 = vsel %vm2113_vm4, %v3089_v7, 0.0 }
  0x93   : > { %v1655_v15 = vadd.f32 %v1591_v29, %v1459_v26  ;;  %v1168_v6 = vsel %vm1102_vm7, %v3163_v43, 0.0  ;;  %v1036_v25 = vadd.f32 %v972_v31, %v840_v18  ;;  %v1364_v37 = vsel %vm1298_vm9, %v3166_v49, 0.0 }
  0x94   : > { %v1560_v4 = vsel %vm1494_vm14, %v3185_v1, 0.0  ;;  %vm1690_vm8 = vcmp.eq.s32.totalorder %v3000_v47, %v3456_v61  ;;  %2258 = vmatpush.msra.mxu0 %v2211_v19  ;;  %vm1886_vm0 = vcmp.eq.s32.totalorder %v3011_v50, %v3456_v61  ;;  %vm2082_vm11 = vcmp.eq.s32.totalorder %v3078_v5, %v3456_v61 }
  0x95   : > { %v1851_v10 = vadd.f32 %v1787_v16, %v1655_v15  ;;  %v1756_v17 = vsel %vm1690_vm8, %v3208_v11, 0.0  ;;  %v1232_v3 = vadd.f32 %v1168_v6, %v1036_v25  ;;  %vm546_vm12 = vcmp.eq.s32.totalorder %v2974_v39, %v3460_v40 }
  0x96   : > { %vm742_vm13 = vcmp.eq.s32.totalorder %v2976_v41, %v3460_v40  ;;  %vm938_vm10 = vcmp.eq.s32.totalorder %v2978_v42, %v3460_v40  ;;  %v612_v29 = vsel %vm546_vm12, %v3150_v32, 0.0  ;;  %vm1134_vm15 = vcmp.eq.s32.totalorder %v2992_v44, %v3460_v40 }
  0x97   : > { %v2047_v8 = vadd.f32 %v1983_v60, %v1851_v10  ;;  %v808_v16 = vsel %vm742_vm13, %v3153_v33, 0.0  ;;  %v1004_v12 = vsel %vm938_vm10, %v3156_v34, 0.0  ;;  %v1428_v63 = vadd.f32 %v1364_v37, %v1232_v3 }
  0x98   : > { %v872_v51 = vadd.f32 %v808_v16, %v612_v29  ;;  %vm1330_vm1 = vcmp.eq.s32.totalorder %v2996_v45, %v3460_v40  ;;  %v1952_v26 = vsel %vm1886_vm0, %v3211_v14, 0.0  ;;  %v1200_v62 = vsel %vm1134_vm15, %v3163_v43, 0.0 }
  0x99   : > { %v2243_v21 = vadd.f32 %v2179_v9, %v2047_v8  ;;  %vm1526_vm2 = vcmp.eq.s32.totalorder %v2998_v46, %v3460_v40  ;;  %v1624_v31 = vadd.f32 %v1560_v4, %v1428_v63  ;;  %v2148_v60 = vsel %vm2082_vm11, %v3248_v2, 0.0 }
  0x9a   : > { %v1068_v18 = vadd.f32 %v1004_v12, %v872_v51  ;;  %vm1722_vm3 = vcmp.eq.s32.totalorder %v3000_v47, %v3460_v40  ;;  %v1396_v19 = vsel %vm1330_vm1, %v3166_v49, 0.0  ;;  %v1592_v15 = vsel %vm1526_vm2, %v3185_v1, 0.0 }
  0x9b   : > { %2281 = vmatpush.msra.mxu1 %v2243_v21  ;;  %v1788_v9 = vsel %vm1722_vm3, %v3208_v11, 0.0  ;;  %v3669_v6 = vadd.s32 88, %v2927_v13  ;;  %v1820_v25 = vadd.f32 %v1756_v17, %v1624_v31  ;;  %vm1918_vm4 = vcmp.eq.s32.totalorder %v3011_v50, %v3460_v40 }
  0x9c   : > { %v1264_v37 = vadd.f32 %v1200_v62, %v1068_v18  ;;  %vm2114_vm5 = vcmp.eq.s32.totalorder %v3078_v5, %v3460_v40  ;;  %v1984_v3 = vsel %vm1918_vm4, %v3211_v14, 0.0 }
  0x9d   : > { %vm511_vm6 = vcmp.eq.s32.totalorder %v2933_v20, %v3669_v6  ;;  %vm707_vm7 = vcmp.eq.s32.totalorder %v2935_v22, %v3669_v6  ;;  %vm903_vm9 = vcmp.eq.s32.totalorder %v2937_v23, %v3669_v6  ;;  %vm1099_vm14 = vcmp.eq.s32.totalorder %v2939_v24, %v3669_v6 }
  0x9e   : > { %v2016_v61 = vadd.f32 %v1952_v26, %v1820_v25  ;;  %v1460_v4 = vadd.f32 %v1396_v19, %v1264_v37  ;;  %v577_v10 = vsel %vm511_vm6, %v3017_v52, 0.0  ;;  %v773_v17 = vsel %vm707_vm7, %v3020_v53, 0.0 }
  0x9f   : > { %v837_v8 = vadd.f32 %v773_v17, %v577_v10  ;;  %v969_v29 = vsel %vm903_vm9, %v3023_v54, 0.0  ;;  %vm1295_vm8 = vcmp.eq.s32.totalorder %v2944_v28, %v3669_v6  ;;  %v1165_v63 = vsel %vm1099_vm14, %v3026_v55, 0.0 }
  0xa0   : > { %v2212_v16 = vadd.f32 %v2148_v60, %v2016_v61  ;;  %v1656_v12 = vadd.f32 %v1592_v15, %v1460_v4  ;;  %vm1491_vm0 = vcmp.eq.s32.totalorder %v2946_v30, %v3669_v6  ;;  %v2180_v51 = vsel %vm2114_vm5, %v3248_v2, 0.0 }
  0xa1   : > { %v1033_v21 = vadd.f32 %v969_v29, %v837_v8  ;;  %vm1687_vm11 = vcmp.eq.s32.totalorder %v2957_v35, %v3669_v6  ;;  %vm1883_vm12 = vcmp.eq.s32.totalorder %v2961_v36, %v3669_v6  ;;  %v1361_v62 = vsel %vm1295_vm8, %v3033_v57, 0.0 }
  0xa2   : > { %2304 = vmatpush.msra.mxu2 %v2212_v16  ;;  %v1852_v26 = vadd.f32 %v1788_v9, %v1656_v12  ;;  %v1557_v31 = vsel %vm1491_vm0, %v3036_v58, 0.0  ;;  %vm2079_vm13 = vcmp.eq.s32.totalorder %v2968_v38, %v3669_v6  ;;  %v1753_v40 = vsel %vm1687_vm11, %v3039_v59, 0.0 }
  0xa3   : > { %v1229_v60 = vadd.f32 %v1165_v63, %v1033_v21  ;;  %v1949_v18 = vsel %vm1883_vm12, %v3061_v0, 0.0  ;;  %v3707_v19 = vadd.s32 216, %v2927_v13  ;;  %v2145_v25 = vsel %vm2079_vm13, %v3089_v7, 0.0 }
  0xa4   : > { %v2048_v15 = vadd.f32 %v1984_v3, %v1852_v26  ;;  %vm512_vm10 = vcmp.eq.s32.totalorder %v2974_v39, %v3669_v6  ;;  %vm708_vm15 = vcmp.eq.s32.totalorder %v2976_v41, %v3669_v6  ;;  %vm904_vm9 = vcmp.eq.s32.totalorder %v2978_v42, %v3669_v6 }
  0xa5   : > { %v1425_v9 = vadd.f32 %v1361_v62, %v1229_v60  ;;  %vm543_vm1 = vcmp.eq.s32.totalorder %v2933_v20, %v3707_v19  ;;  %vm739_vm2 = vcmp.eq.s32.totalorder %v2935_v22, %v3707_v19  ;;  %vm935_vm3 = vcmp.eq.s32.totalorder %v2937_v23, %v3707_v19 }
  0xa6   : > { %v2244_v38 = vadd.f32 %v2180_v51, %v2048_v15  ;;  %v609_v37 = vsel %vm543_vm1, %v3017_v52, 0.0  ;;  %v805_v61 = vsel %vm739_vm2, %v3020_v53, 0.0  ;;  %v1001_v4 = vsel %vm935_vm3, %v3023_v54, 0.0 }
  0xa7   : > { %v1621_v10 = vadd.f32 %v1557_v31, %v1425_v9  ;;  %v869_v17 = vadd.f32 %v805_v61, %v609_v37  ;;  %vm1131_vm4 = vcmp.eq.s32.totalorder %v2939_v24, %v3707_v19  ;;  %vm1327_vm5 = vcmp.eq.s32.totalorder %v2944_v28, %v3707_v19  ;;  %v3748_v31 = vld [vmem:[%s2920_s18 + $0x10] ss:$0 sm:$0xff] }
  0xa8   : > { %2327 = vmatpush.msra.mxu3 %v2244_v38  ;;  %v1197_v3 = vsel %vm1131_vm4, %v3026_v55, 0.0  ;;  %vm1523_vm6 = vcmp.eq.s32.totalorder %v2946_v30, %v3707_v19  ;;  %vm1719_vm7 = vcmp.eq.s32.totalorder %v2957_v35, %v3707_v19  ;;  %v1393_v16 = vsel %vm1327_vm5, %v3033_v57, 0.0 }
  0xa9   : > { %v1817_v8 = vadd.f32 %v1753_v40, %v1621_v10  ;;  %v1065_v29 = vadd.f32 %v1001_v4, %v869_v17  ;;  %v578_v12 = vsel %vm512_vm10, %v3150_v32, 0.0  ;;  %v1589_v63 = vsel %vm1523_vm6, %v3036_v58, 0.0 }
  0xaa   : > { %v1785_v51 = vsel %vm1719_vm7, %v3039_v59, 0.0  ;;  %vm1915_vm14 = vcmp.eq.s32.totalorder %v2961_v36, %v3707_v19  ;;  %v774_v21 = vsel %vm708_vm15, %v3153_v33, 0.0  ;;  %vm2111_vm8 = vcmp.eq.s32.totalorder %v3748_v31, %v3707_v19 }
  0xab   : > { %v2013_v26 = vadd.f32 %v1949_v18, %v1817_v8  ;;  %v1261_v62 = vadd.f32 %v1197_v3, %v1065_v29  ;;  %v970_v60 = vsel %vm904_vm9, %v3156_v34, 0.0  ;;  %v838_v40 = vadd.f32 %v774_v21, %v578_v12 }
  0xac   : > { %vm1100_vm0 = vcmp.eq.s32.totalorder %v2992_v44, %v3669_v6  ;;  %vm1296_vm11 = vcmp.eq.s32.totalorder %v2996_v45, %v3669_v6  ;;  %vm1492_vm12 = vcmp.eq.s32.totalorder %v2998_v46, %v3669_v6  ;;  %v1981_v9 = vsel %vm1915_vm14, %v3061_v0, 0.0 }
  0xad   : > { %v2209_v15 = vadd.f32 %v2145_v25, %v2013_v26  ;;  %v1457_v18 = vadd.f32 %v1393_v16, %v1261_v62  ;;  %v1166_v38 = vsel %vm1100_vm0, %v3163_v43, 0.0  ;;  %v2177_v37 = vsel %vm2111_vm8, %v3089_v7, 0.0 }
  0xae   : > { %v1034_v61 = vadd.f32 %v970_v60, %v838_v40  ;;  %vm1688_vm13 = vcmp.eq.s32.totalorder %v3000_v47, %v3669_v6  ;;  %vm1884_vm10 = vcmp.eq.s32.totalorder %v3011_v50, %v3669_v6  ;;  %v1362_v10 = vsel %vm1296_vm11, %v3166_v49, 0.0 }
  0xaf   : > { %2259 = vmatpush.msra.mxu0 %v2209_v15  ;;  %v1653_v4 = vadd.f32 %v1589_v63, %v1457_v18  ;;  %v1558_v25 = vsel %vm1492_vm12, %v3185_v1, 0.0  ;;  %v1754_v17 = vsel %vm1688_vm13, %v3208_v11, 0.0  ;;  %v1950_v8 = vsel %vm1884_vm10, %v3211_v14, 0.0 }
  0xb0   : > { %v1230_v3 = vadd.f32 %v1166_v38, %v1034_v61  ;;  %vm544_vm15 = vcmp.eq.s32.totalorder %v2974_v39, %v3707_v19  ;;  %vm740_vm1 = vcmp.eq.s32.totalorder %v2976_v41, %v3707_v19  ;;  %vm936_vm2 = vcmp.eq.s32.totalorder %v2978_v42, %v3707_v19 }
  0xb1   : > { %v1849_v29 = vadd.f32 %v1785_v51, %v1653_v4  ;;  %v610_v16 = vsel %vm544_vm15, %v3150_v32, 0.0  ;;  %v806_v12 = vsel %vm740_vm1, %v3153_v33, 0.0  ;;  %v1002_v26 = vsel %vm936_vm2, %v3156_v34, 0.0 }
  0xb2   : > { %v1426_v63 = vadd.f32 %v1362_v10, %v1230_v3  ;;  %v870_v21 = vadd.f32 %v806_v12, %v610_v16  ;;  %vm1132_vm3 = vcmp.eq.s32.totalorder %v2992_v44, %v3707_v19  ;;  %vm2080_vm4 = vcmp.eq.s32.totalorder %v3078_v5, %v3669_v6 }
  0xb3   : > { %v2045_v62 = vadd.f32 %v1981_v9, %v1849_v29  ;;  %v1198_v51 = vsel %vm1132_vm3, %v3163_v43, 0.0  ;;  %vm1328_vm5 = vcmp.eq.s32.totalorder %v2996_v45, %v3707_v19  ;;  %vm1524_vm6 = vcmp.eq.s32.totalorder %v2998_v46, %v3707_v19 }
  0xb4   : > { %v1622_v60 = vadd.f32 %v1558_v25, %v1426_v63  ;;  %v1066_v40 = vadd.f32 %v1002_v26, %v870_v21  ;;  %v1394_v15 = vsel %vm1328_vm5, %v3166_v49, 0.0  ;;  %vm1720_vm7 = vcmp.eq.s32.totalorder %v3000_v47, %v3707_v19 }
  0xb5   : > { %v2241_v18 = vadd.f32 %v2177_v37, %v2045_v62  ;;  %vm1916_vm9 = vcmp.eq.s32.totalorder %v3011_v50, %v3707_v19  ;;  %vm2112_vm14 = vcmp.eq.s32.totalorder %v3078_v5, %v3707_v19  ;;  %v2146_v9 = vsel %vm2080_vm4, %v3248_v2, 0.0 }
  0xb6   : > { %v1818_v6 = vadd.f32 %v1754_v17, %v1622_v60  ;;  %v1262_v38 = vadd.f32 %v1198_v51, %v1066_v40  ;;  %v1590_v61 = vsel %vm1524_vm6, %v3185_v1, 0.0  ;;  %v1786_v4 = vsel %vm1720_vm7, %v3208_v11, 0.0 }
  0xb7   : > { %2282 = vmatpush.msra.mxu1 %v2241_v18  ;;  %v1982_v37 = vsel %vm1916_vm9, %v3211_v14, 0.0  ;;  %v3800_v10 = vadd.s32 80, %v2927_v13  ;;  %v2178_v29 = vsel %vm2112_vm14, %v3248_v2, 0.0  ;;  %v3804_v5 = vadd.s32 208, %v2927_v13 }
  0xb8   : > { %v2014_v25 = vadd.f32 %v1950_v8, %v1818_v6  ;;  %v1458_v3 = vadd.f32 %v1394_v15, %v1262_v38  ;;  %v3820_v21 = vadd.s32 72, %v2927_v13  ;;  %v3830_v15 = vadd.s32 200, %v2927_v13 }
  0xb9   : > { %vm509_vm8 = vcmp.eq.s32.totalorder %v2933_v20, %v3800_v10  ;;  %vm705_vm0 = vcmp.eq.s32.totalorder %v2935_v22, %v3800_v10  ;;  %vm901_vm11 = vcmp.eq.s32.totalorder %v2937_v23, %v3800_v10  ;;  %vm1097_vm12 = vcmp.eq.s32.totalorder %v2939_v24, %v3800_v10 }
  0xba   : > { %v2210_v19 = vadd.f32 %v2146_v9, %v2014_v25  ;;  %v1654_v17 = vadd.f32 %v1590_v61, %v1458_v3  ;;  %v575_v8 = vsel %vm509_vm8, %v3017_v52, 0.0  ;;  %v771_v16 = vsel %vm705_vm0, %v3020_v53, 0.0 }
  0xbb   : > { %v835_v12 = vadd.f32 %v771_v16, %v575_v8  ;;  %v967_v63 = vsel %vm901_vm11, %v3023_v54, 0.0  ;;  %vm1293_vm13 = vcmp.eq.s32.totalorder %v2944_v28, %v3800_v10  ;;  %v1163_v62 = vsel %vm1097_vm12, %v3026_v55, 0.0 }
  0xbc   : > { %2305 = vmatpush.msra.mxu2 %v2210_v19  ;;  %v1850_v26 = vadd.f32 %v1786_v4, %v1654_v17  ;;  %vm1489_vm10 = vcmp.eq.s32.totalorder %v2946_v30, %v3800_v10  ;;  %vm1685_vm15 = vcmp.eq.s32.totalorder %v2957_v35, %v3800_v10  ;;  %v1359_v60 = vsel %vm1293_vm13, %v3033_v57, 0.0 }
  0xbd   : > { %v1031_v51 = vadd.f32 %v967_v63, %v835_v12  ;;  %v1555_v40 = vsel %vm1489_vm10, %v3036_v58, 0.0  ;;  %v1751_v6 = vsel %vm1685_vm15, %v3039_v59, 0.0  ;;  %vm1881_vm1 = vcmp.eq.s32.totalorder %v2961_v36, %v3800_v10 }
  0xbe   : > { %v2046_v18 = vadd.f32 %v1982_v37, %v1850_v26  ;;  %vm541_vm2 = vcmp.eq.s32.totalorder %v2933_v20, %v3804_v5  ;;  %vm2077_vm3 = vcmp.eq.s32.totalorder %v3748_v31, %v3800_v10  ;;  %vm737_vm4 = vcmp.eq.s32.totalorder %v2935_v22, %v3804_v5 }
  0xbf   : > { %v1227_v9 = vadd.f32 %v1163_v62, %v1031_v51  ;;  %v607_v38 = vsel %vm541_vm2, %v3017_v52, 0.0  ;;  %v803_v4 = vsel %vm737_vm4, %v3020_v53, 0.0  ;;  %vm933_vm5 = vcmp.eq.s32.totalorder %v2937_v23, %v3804_v5 }
  0xc0   : > { %v2242_v61 = vadd.f32 %v2178_v29, %v2046_v18  ;;  %vm1129_vm6 = vcmp.eq.s32.totalorder %v2939_v24, %v3804_v5  ;;  %v1947_v25 = vsel %vm1881_vm1, %v3061_v0, 0.0  ;;  %v867_v3 = vadd.f32 %v803_v4, %v607_v38 }
  0xc1   : > { %v1423_v37 = vadd.f32 %v1359_v60, %v1227_v9  ;;  %v999_v19 = vsel %vm933_vm5, %v3023_v54, 0.0  ;;  %v1195_v17 = vsel %vm1129_vm6, %v3026_v55, 0.0  ;;  %vm1325_vm7 = vcmp.eq.s32.totalorder %v2944_v28, %v3804_v5 }
  0xc2   : > { %2328 = vmatpush.msra.mxu3 %v2242_v61  ;;  %vm1521_vm9 = vcmp.eq.s32.totalorder %v2946_v30, %v3804_v5  ;;  %vm1717_vm14 = vcmp.eq.s32.totalorder %v2957_v35, %v3804_v5  ;;  %v2143_v8 = vsel %vm2077_vm3, %v3089_v7, 0.0  ;;  %v1063_v16 = vadd.f32 %v999_v19, %v867_v3 }
  0xc3   : > { %v1619_v29 = vadd.f32 %v1555_v40, %v1423_v37  ;;  %vm1913_vm8 = vcmp.eq.s32.totalorder %v2961_v36, %v3804_v5  ;;  %v1391_v12 = vsel %vm1325_vm7, %v3033_v57, 0.0  ;;  %v1587_v63 = vsel %vm1521_vm9, %v3036_v58, 0.0 }
  0xc4   : > { %v1783_v26 = vsel %vm1717_vm14, %v3039_v59, 0.0  ;;  %vm510_vm0 = vcmp.eq.s32.totalorder %v2974_v39, %v3800_v10  ;;  %v1259_v51 = vadd.f32 %v1195_v17, %v1063_v16  ;;  %vm2109_vm11 = vcmp.eq.s32.totalorder %v3748_v31, %v3804_v5 }
  0xc5   : > { %v1815_v62 = vadd.f32 %v1751_v6, %v1619_v29  ;;  %v576_v60 = vsel %vm510_vm0, %v3150_v32, 0.0  ;;  %vm706_vm12 = vcmp.eq.s32.totalorder %v2976_v41, %v3800_v10  ;;  %vm902_vm13 = vcmp.eq.s32.totalorder %v2978_v42, %v3800_v10 }
  0xc6   : > { %vm1098_vm10 = vcmp.eq.s32.totalorder %v2992_v44, %v3800_v10  ;;  %vm1294_vm15 = vcmp.eq.s32.totalorder %v2996_v45, %v3800_v10  ;;  %v1455_v18 = vadd.f32 %v1391_v12, %v1259_v51  ;;  %v772_v6 = vsel %vm706_vm12, %v3153_v33, 0.0 }
  0xc7   : > { %v2011_v40 = vadd.f32 %v1947_v25, %v1815_v62  ;;  %v968_v9 = vsel %vm902_vm13, %v3156_v34, 0.0  ;;  %v1979_v38 = vsel %vm1913_vm8, %v3061_v0, 0.0  ;;  %v2175_v61 = vsel %vm2109_vm11, %v3089_v7, 0.0  ;;  %v3896_v62 = vld [vmem:[%s2920_s18 + $0x18] ss:$0 sm:$0xff] }
  0xc8   : > { %v836_v4 = vadd.f32 %v772_v6, %v576_v60  ;;  %vm1490_vm1 = vcmp.eq.s32.totalorder %v2998_v46, %v3800_v10  ;;  %v1651_v3 = vadd.f32 %v1587_v63, %v1455_v18  ;;  %v1164_v25 = vsel %vm1098_vm10, %v3163_v43, 0.0 }
  0xc9   : > { %v2207_v37 = vadd.f32 %v2143_v8, %v2011_v40  ;;  %vm1686_vm2 = vcmp.eq.s32.totalorder %v3000_v47, %v3800_v10  ;;  %v1360_v17 = vsel %vm1294_vm15, %v3166_v49, 0.0  ;;  %v1556_v29 = vsel %vm1490_vm1, %v3185_v1, 0.0 }
  0xca   : > { %v1032_v19 = vadd.f32 %v968_v9, %v836_v4  ;;  %v1752_v16 = vsel %vm1686_vm2, %v3208_v11, 0.0  ;;  %v1847_v12 = vadd.f32 %v1783_v26, %v1651_v3  ;;  %vm1882_vm3 = vcmp.eq.s32.totalorder %v3011_v50, %v3800_v10 }
  0xcb   : > { %2260 = vmatpush.msra.mxu0 %v2207_v37  ;;  %vm2078_vm4 = vcmp.eq.s32.totalorder %v3896_v62, %v3800_v10  ;;  %vm542_vm5 = vcmp.eq.s32.totalorder %v2974_v39, %v3804_v5  ;;  %vm738_vm6 = vcmp.eq.s32.totalorder %v2976_v41, %v3804_v5  ;;  %vm934_vm7 = vcmp.eq.s32.totalorder %v2978_v42, %v3804_v5 }
  0xcc   : > { %v1228_v8 = vadd.f32 %v1164_v25, %v1032_v19  ;;  %v608_v63 = vsel %vm542_vm5, %v3150_v32, 0.0  ;;  %v2043_v26 = vadd.f32 %v1979_v38, %v1847_v12  ;;  %v804_v51 = vsel %vm738_vm6, %v3153_v33, 0.0 }
  0xcd   : > { %v1000_v60 = vsel %vm934_vm7, %v3156_v34, 0.0  ;;  %vm1130_vm9 = vcmp.eq.s32.totalorder %v2992_v44, %v3804_v5  ;;  %v1948_v18 = vsel %vm1882_vm3, %v3211_v14, 0.0  ;;  %v868_v6 = vadd.f32 %v804_v51, %v608_v63 }
  0xce   : > { %v1424_v40 = vadd.f32 %v1360_v17, %v1228_v8  ;;  %vm1326_vm14 = vcmp.eq.s32.totalorder %v2996_v45, %v3804_v5  ;;  %v2239_v9 = vadd.f32 %v2175_v61, %v2043_v26  ;;  %v1196_v4 = vsel %vm1130_vm9, %v3163_v43, 0.0 }
  0xcf   : > { %vm1522_vm8 = vcmp.eq.s32.totalorder %v2998_v46, %v3804_v5  ;;  %vm1718_vm0 = vcmp.eq.s32.totalorder %v3000_v47, %v3804_v5  ;;  %v2144_v37 = vsel %vm2078_vm4, %v3248_v2, 0.0  ;;  %v1064_v3 = vadd.f32 %v1000_v60, %v868_v6 }
  0xd0   : > { %v1620_v38 = vadd.f32 %v1556_v29, %v1424_v40  ;;  %v1392_v25 = vsel %vm1326_vm14, %v3166_v49, 0.0  ;;  %2283 = vmatpush.msra.mxu1 %v2239_v9  ;;  %v1588_v61 = vsel %vm1522_vm8, %v3185_v1, 0.0  ;;  %v1784_v19 = vsel %vm1718_vm0, %v3208_v11, 0.0 }
  0xd1   : > { %vm507_vm11 = vcmp.eq.s32.totalorder %v2933_v20, %v3820_v21  ;;  %vm703_vm12 = vcmp.eq.s32.totalorder %v2935_v22, %v3820_v21  ;;  %v1260_v29 = vadd.f32 %v1196_v4, %v1064_v3  ;;  %vm1914_vm13 = vcmp.eq.s32.totalorder %v3011_v50, %v3804_v5 }
  0xd2   : > { %v1816_v17 = vadd.f32 %v1752_v16, %v1620_v38  ;;  %vm2110_vm10 = vcmp.eq.s32.totalorder %v3896_v62, %v3804_v5  ;;  %v573_v10 = vsel %vm507_vm11, %v3017_v52, 0.0  ;;  %v769_v12 = vsel %vm703_vm12, %v3020_v53, 0.0 }
  0xd3   : > { %vm899_vm15 = vcmp.eq.s32.totalorder %v2937_v23, %v3820_v21  ;;  %vm1095_vm1 = vcmp.eq.s32.totalorder %v2939_v24, %v3820_v21  ;;  %v1456_v63 = vadd.f32 %v1392_v25, %v1260_v29  ;;  %v833_v16 = vadd.f32 %v769_v12, %v573_v10 }
  0xd4   : > { %v2012_v8 = vadd.f32 %v1948_v18, %v1816_v17  ;;  %v965_v26 = vsel %vm899_vm15, %v3023_v54, 0.0  ;;  %v1161_v51 = vsel %vm1095_vm1, %v3026_v55, 0.0  ;;  %vm1291_vm2 = vcmp.eq.s32.totalorder %v2944_v28, %v3820_v21 }
  0xd5   : > { %vm1487_vm3 = vcmp.eq.s32.totalorder %v2946_v30, %v3820_v21  ;;  %vm1683_vm4 = vcmp.eq.s32.totalorder %v2957_v35, %v3820_v21  ;;  %v1652_v40 = vadd.f32 %v1588_v61, %v1456_v63  ;;  %v1980_v18 = vsel %vm1914_vm13, %v3211_v14, 0.0 }
  0xd6   : > { %v2208_v60 = vadd.f32 %v2144_v37, %v2012_v8  ;;  %v1029_v6 = vadd.f32 %v965_v26, %v833_v16  ;;  %v2176_v9 = vsel %vm2110_vm10, %v3248_v2, 0.0  ;;  %v1357_v4 = vsel %vm1291_vm2, %v3033_v57, 0.0 }
  0xd7   : > { %v1553_v38 = vsel %vm1487_vm3, %v3036_v58, 0.0  ;;  %v1749_v3 = vsel %vm1683_vm4, %v3039_v59, 0.0  ;;  %v1848_v37 = vadd.f32 %v1784_v19, %v1652_v40  ;;  %vm1879_vm5 = vcmp.eq.s32.totalorder %v2961_v36, %v3820_v21 }
  0xd8   : > { %2306 = vmatpush.msra.mxu2 %v2208_v60  ;;  %v1225_v25 = vadd.f32 %v1161_v51, %v1029_v6  ;;  %vm2075_vm6 = vcmp.eq.s32.totalorder %v3748_v31, %v3820_v21  ;;  %vm539_vm7 = vcmp.eq.s32.totalorder %v2933_v20, %v3830_v15  ;;  %vm735_vm9 = vcmp.eq.s32.totalorder %v2935_v22, %v3830_v15 }
  0xd9   : > { %vm931_vm14 = vcmp.eq.s32.totalorder %v2937_v23, %v3830_v15  ;;  %vm1127_vm8 = vcmp.eq.s32.totalorder %v2939_v24, %v3830_v15  ;;  %v2044_v5 = vadd.f32 %v1980_v18, %v1848_v37  ;;  %v605_v19 = vsel %vm539_vm7, %v3017_v52, 0.0 }
  0xda   : > { %v1421_v61 = vadd.f32 %v1357_v4, %v1225_v25  ;;  %v801_v17 = vsel %vm735_vm9, %v3020_v53, 0.0  ;;  %v1945_v29 = vsel %vm1879_vm5, %v3061_v0, 0.0  ;;  %v997_v12 = vsel %vm931_vm14, %v3023_v54, 0.0 }
  0xdb   : > { %v865_v10 = vadd.f32 %v801_v17, %v605_v19  ;;  %vm1323_vm0 = vcmp.eq.s32.totalorder %v2944_v28, %v3830_v15  ;;  %v2240_v8 = vadd.f32 %v2176_v9, %v2044_v5  ;;  %v1193_v16 = vsel %vm1127_vm8, %v3026_v55, 0.0 }
  0xdc   : > { %v1617_v63 = vadd.f32 %v1553_v38, %v1421_v61  ;;  %vm1519_vm11 = vcmp.eq.s32.totalorder %v2946_v30, %v3830_v15  ;;  %v2141_v26 = vsel %vm2075_vm6, %v3089_v7, 0.0  ;;  %v1389_v60 = vsel %vm1323_vm0, %v3033_v57, 0.0 }
  0xdd   : > { %v1061_v51 = vadd.f32 %v997_v12, %v865_v10  ;;  %vm1715_vm12 = vcmp.eq.s32.totalorder %v2957_v35, %v3830_v15  ;;  %2329 = vmatpush.msra.mxu3 %v2240_v8  ;;  %v1585_v18 = vsel %vm1519_vm11, %v3036_v58, 0.0  ;;  %vm1911_vm13 = vcmp.eq.s32.totalorder %v2961_v36, %v3830_v15 }
  0xde   : > { %v1813_v40 = vadd.f32 %v1749_v3, %v1617_v63  ;;  %v1781_v6 = vsel %vm1715_vm12, %v3039_v59, 0.0  ;;  %vm2107_vm10 = vcmp.eq.s32.totalorder %v3748_v31, %v3830_v15  ;;  %vm508_vm15 = vcmp.eq.s32.totalorder %v2974_v39, %v3820_v21 }
  0xdf   : > { %v1257_v9 = vadd.f32 %v1193_v16, %v1061_v51  ;;  %vm704_vm1 = vcmp.eq.s32.totalorder %v2976_v41, %v3820_v21  ;;  %v574_v38 = vsel %vm508_vm15, %v3150_v32, 0.0  ;;  %vm900_vm2 = vcmp.eq.s32.totalorder %v2978_v42, %v3820_v21 }
  0xe0   : > { %v2009_v4 = vadd.f32 %v1945_v29, %v1813_v40  ;;  %v770_v3 = vsel %vm704_vm1, %v3153_v33, 0.0  ;;  %v966_v5 = vsel %vm900_vm2, %v3156_v34, 0.0  ;;  %vm1096_vm3 = vcmp.eq.s32.totalorder %v2992_v44, %v3820_v21 }
  0xe1   : > { %v1453_v37 = vadd.f32 %v1389_v60, %v1257_v9  ;;  %v834_v25 = vadd.f32 %v770_v3, %v574_v38  ;;  %v1162_v19 = vsel %vm1096_vm3, %v3163_v43, 0.0  ;;  %vm1292_vm4 = vcmp.eq.s32.totalorder %v2996_v45, %v3820_v21 }
  0xe2   : > { %v2205_v61 = vadd.f32 %v2141_v26, %v2009_v4  ;;  %vm1488_vm5 = vcmp.eq.s32.totalorder %v2998_v46, %v3820_v21  ;;  %v1977_v29 = vsel %vm1911_vm13, %v3061_v0, 0.0  ;;  %v2173_v12 = vsel %vm2107_vm10, %v3089_v7, 0.0 }
  0xe3   : > { %v1649_v17 = vadd.f32 %v1585_v18, %v1453_v37  ;;  %v1030_v10 = vadd.f32 %v966_v5, %v834_v25  ;;  %v1358_v8 = vsel %vm1292_vm4, %v3166_v49, 0.0  ;;  %v1554_v63 = vsel %vm1488_vm5, %v3185_v1, 0.0 }
  0xe4   : > { %2261 = vmatpush.msra.mxu0 %v2205_v61  ;;  %vm540_vm6 = vcmp.eq.s32.totalorder %v2974_v39, %v3830_v15  ;;  %vm1684_vm7 = vcmp.eq.s32.totalorder %v3000_v47, %v3820_v21  ;;  %vm1880_vm9 = vcmp.eq.s32.totalorder %v3011_v50, %v3820_v21  ;;  %vm2076_vm14 = vcmp.eq.s32.totalorder %v3896_v62, %v3820_v21 }
  0xe5   : > { %v1845_v16 = vadd.f32 %v1781_v6, %v1649_v17  ;;  %v1226_v26 = vadd.f32 %v1162_v19, %v1030_v10  ;;  %v606_v51 = vsel %vm540_vm6, %v3150_v32, 0.0  ;;  %vm736_vm8 = vcmp.eq.s32.totalorder %v2976_v41, %v3830_v15 }
  0xe6   : > { %vm932_vm0 = vcmp.eq.s32.totalorder %v2978_v42, %v3830_v15  ;;  %v802_v18 = vsel %vm736_vm8, %v3153_v33, 0.0  ;;  %v1750_v9 = vsel %vm1684_vm7, %v3208_v11, 0.0  ;;  %vm1128_vm11 = vcmp.eq.s32.totalorder %v2992_v44, %v3830_v15 }
  0xe7   : > { %v2041_v60 = vadd.f32 %v1977_v29, %v1845_v16  ;;  %v1422_v40 = vadd.f32 %v1358_v8, %v1226_v26  ;;  %v998_v6 = vsel %vm932_vm0, %v3156_v34, 0.0  ;;  %v866_v4 = vadd.f32 %v802_v18, %v606_v51 }
  0xe8   : > { %vm1324_vm12 = vcmp.eq.s32.totalorder %v2996_v45, %v3830_v15  ;;  %v1194_v37 = vsel %vm1128_vm11, %v3163_v43, 0.0  ;;  %vm1520_vm13 = vcmp.eq.s32.totalorder %v2998_v46, %v3830_v15  ;;  %v1946_v25 = vsel %vm1880_vm9, %v3211_v14, 0.0 }
  0xe9   : > { %v2237_v38 = vadd.f32 %v2173_v12, %v2041_v60  ;;  %v1618_v3 = vadd.f32 %v1554_v63, %v1422_v40  ;;  %v1062_v5 = vadd.f32 %v998_v6, %v866_v4  ;;  %vm1716_vm10 = vcmp.eq.s32.totalorder %v3000_v47, %v3830_v15 }
  0xea   : > { %vm1912_vm15 = vcmp.eq.s32.totalorder %v3011_v50, %v3830_v15  ;;  %v2142_v19 = vsel %vm2076_vm14, %v3248_v2, 0.0  ;;  %v1390_v17 = vsel %vm1324_vm12, %v3166_v49, 0.0  ;;  %vm2108_vm1 = vcmp.eq.s32.totalorder %v3896_v62, %v3830_v15 }
  0xeb   : > { %2284 = vmatpush.msra.mxu1 %v2237_v38  ;;  %v1814_v61 = vadd.f32 %v1750_v9, %v1618_v3  ;;  %v1258_v29 = vadd.f32 %v1194_v37, %v1062_v5  ;;  %v1586_v10 = vsel %vm1520_vm13, %v3185_v1, 0.0  ;;  %v1782_v12 = vsel %vm1716_vm10, %v3208_v11, 0.0 }
  0xec   : > { %v4060_v8 = vadd.s32 64, %v2927_v13  ;;  %v1978_v16 = vsel %vm1912_vm15, %v3211_v14, 0.0  ;;  %v2174_v26 = vsel %vm2108_vm1, %v3248_v2, 0.0  ;;  %v4065_v21 = vadd.s32 192, %v2927_v13 }
  0xed   : > { %v2010_v63 = vadd.f32 %v1946_v25, %v1814_v61  ;;  %v1454_v51 = vadd.f32 %v1390_v17, %v1258_v29  ;;  %v4086_v38 = vadd.s32 56, %v2927_v13  ;;  %v4090_v5 = vadd.s32 184, %v2927_v13 }
  0xee   : > { %vm505_vm2 = vcmp.eq.s32.totalorder %v2933_v20, %v4060_v8  ;;  %vm701_vm3 = vcmp.eq.s32.totalorder %v2935_v22, %v4060_v8  ;;  %vm897_vm4 = vcmp.eq.s32.totalorder %v2937_v23, %v4060_v8  ;;  %vm1093_vm5 = vcmp.eq.s32.totalorder %v2939_v24, %v4060_v8 }
  0xef   : > { %v2206_v15 = vadd.f32 %v2142_v19, %v2010_v63  ;;  %v571_v60 = vsel %vm505_vm2, %v3017_v52, 0.0  ;;  %v767_v40 = vsel %vm701_vm3, %v3020_v53, 0.0  ;;  %v963_v18 = vsel %vm897_vm4, %v3023_v54, 0.0 }
  0xf0   : > { %v1650_v6 = vadd.f32 %v1586_v10, %v1454_v51  ;;  %v831_v9 = vadd.f32 %v767_v40, %v571_v60  ;;  %vm1289_vm6 = vcmp.eq.s32.totalorder %v2944_v28, %v4060_v8  ;;  %v1159_v4 = vsel %vm1093_vm5, %v3026_v55, 0.0 }
  0xf1   : > { %2307 = vmatpush.msra.mxu2 %v2206_v15  ;;  %vm1485_vm7 = vcmp.eq.s32.totalorder %v2946_v30, %v4060_v8  ;;  %vm1681_vm9 = vcmp.eq.s32.totalorder %v2957_v35, %v4060_v8  ;;  %v1355_v25 = vsel %vm1289_vm6, %v3033_v57, 0.0  ;;  %vm537_vm14 = vcmp.eq.s32.totalorder %v2933_v20, %v4065_v21 }
  0xf2   : > { %v1846_v3 = vadd.f32 %v1782_v12, %v1650_v6  ;;  %v1027_v37 = vadd.f32 %v963_v18, %v831_v9  ;;  %v1551_v61 = vsel %vm1485_vm7, %v3036_v58, 0.0  ;;  %v1747_v19 = vsel %vm1681_vm9, %v3039_v59, 0.0 }
  0xf3   : > { %vm733_vm8 = vcmp.eq.s32.totalorder %v2935_v22, %v4065_v21  ;;  %vm1877_vm0 = vcmp.eq.s32.totalorder %v2961_v36, %v4060_v8  ;;  %vm2073_vm11 = vcmp.eq.s32.totalorder %v3748_v31, %v4060_v8  ;;  %v603_v10 = vsel %vm537_vm14, %v3017_v52, 0.0 }
  0xf4   : > { %v2042_v17 = vadd.f32 %v1978_v16, %v1846_v3  ;;  %v1223_v29 = vadd.f32 %v1159_v4, %v1027_v37  ;;  %v799_v12 = vsel %vm733_vm8, %v3020_v53, 0.0  ;;  %vm929_vm12 = vcmp.eq.s32.totalorder %v2937_v23, %v4065_v21 }
  0xf5   : > { %vm1125_vm13 = vcmp.eq.s32.totalorder %v2939_v24, %v4065_v21  ;;  %v863_v16 = vadd.f32 %v799_v12, %v603_v10  ;;  %v995_v15 = vsel %vm929_vm12, %v3023_v54, 0.0  ;;  %vm1321_vm10 = vcmp.eq.s32.totalorder %v2944_v28, %v4065_v21 }
  0xf6   : > { %v2238_v63 = vadd.f32 %v2174_v26, %v2042_v17  ;;  %v1419_v51 = vadd.f32 %v1355_v25, %v1223_v29  ;;  %v1191_v60 = vsel %vm1125_vm13, %v3026_v55, 0.0  ;;  %vm1517_vm15 = vcmp.eq.s32.totalorder %v2946_v30, %v4065_v21 }
  0xf7   : > { %vm1713_vm1 = vcmp.eq.s32.totalorder %v2957_v35, %v4065_v21  ;;  %v1943_v26 = vsel %vm1877_vm0, %v3061_v0, 0.0  ;;  %v2139_v18 = vsel %vm2073_vm11, %v3089_v7, 0.0  ;;  %v1059_v6 = vadd.f32 %v995_v15, %v863_v16 }
  0xf8   : > { %2330 = vmatpush.msra.mxu3 %v2238_v63  ;;  %v1615_v40 = vadd.f32 %v1551_v61, %v1419_v51  ;;  %v1387_v9 = vsel %vm1321_vm10, %v3033_v57, 0.0  ;;  %v1583_v4 = vsel %vm1517_vm15, %v3036_v58, 0.0  ;;  %v1779_v3 = vsel %vm1713_vm1, %v3039_v59, 0.0 }
  0xf9   : > { %vm506_vm2 = vcmp.eq.s32.totalorder %v2974_v39, %v4060_v8  ;;  %v1255_v25 = vadd.f32 %v1191_v60, %v1059_v6  ;;  %vm1909_vm3 = vcmp.eq.s32.totalorder %v2961_v36, %v4065_v21  ;;  %vm2105_vm4 = vcmp.eq.s32.totalorder %v3748_v31, %v4065_v21 }
  0xfa   : > { %v1811_v37 = vadd.f32 %v1747_v19, %v1615_v40  ;;  %v572_v61 = vsel %vm506_vm2, %v3150_v32, 0.0  ;;  %vm702_vm5 = vcmp.eq.s32.totalorder %v2976_v41, %v4060_v8  ;;  %vm898_vm6 = vcmp.eq.s32.totalorder %v2978_v42, %v4060_v8 }
  0xfb   : > { %vm1094_vm7 = vcmp.eq.s32.totalorder %v2992_v44, %v4060_v8  ;;  %v1451_v19 = vadd.f32 %v1387_v9, %v1255_v25  ;;  %v768_v29 = vsel %vm702_vm5, %v3153_v33, 0.0  ;;  %v964_v10 = vsel %vm898_vm6, %v3156_v34, 0.0 }
  0xfc   : > { %v2007_v17 = vadd.f32 %v1943_v26, %v1811_v37  ;;  %v1975_v12 = vsel %vm1909_vm3, %v3061_v0, 0.0  ;;  %v832_v63 = vadd.f32 %v768_v29, %v572_v61  ;;  %vm1290_vm9 = vcmp.eq.s32.totalorder %v2996_v45, %v4060_v8 }
  0xfd   : > { %vm1486_vm14 = vcmp.eq.s32.totalorder %v2998_v46, %v4060_v8  ;;  %v1647_v16 = vadd.f32 %v1583_v4, %v1451_v19  ;;  %v2171_v15 = vsel %vm2105_vm4, %v3089_v7, 0.0  ;;  %v1160_v60 = vsel %vm1094_vm7, %v3163_v43, 0.0 }
  0xfe   : > { %v2203_v51 = vadd.f32 %v2139_v18, %v2007_v17  ;;  %v1028_v40 = vadd.f32 %v964_v10, %v832_v63  ;;  %v1356_v26 = vsel %vm1290_vm9, %v3166_v49, 0.0  ;;  %v1552_v6 = vsel %vm1486_vm14, %v3185_v1, 0.0 }
  0xff   : > { %vm1682_vm8 = vcmp.eq.s32.totalorder %v3000_v47, %v4060_v8  ;;  %v1843_v9 = vadd.f32 %v1779_v3, %v1647_v16  ;;  %vm1878_vm0 = vcmp.eq.s32.totalorder %v3011_v50, %v4060_v8  ;;  %vm2074_vm11 = vcmp.eq.s32.totalorder %v3896_v62, %v4060_v8 }
 0x100   : > { %2262 = vmatpush.msra.mxu0 %v2203_v51  ;;  %v1748_v37 = vsel %vm1682_vm8, %v3208_v11, 0.0  ;;  %v1224_v18 = vadd.f32 %v1160_v60, %v1028_v40  ;;  %vm538_vm12 = vcmp.eq.s32.totalorder %v2974_v39, %v4065_v21  ;;  %vm734_vm13 = vcmp.eq.s32.totalorder %v2976_v41, %v4065_v21 }
 0x101   : > { %vm930_vm10 = vcmp.eq.s32.totalorder %v2978_v42, %v4065_v21  ;;  %v2039_v4 = vadd.f32 %v1975_v12, %v1843_v9  ;;  %v604_v3 = vsel %vm538_vm12, %v3150_v32, 0.0  ;;  %v800_v25 = vsel %vm734_vm13, %v3153_v33, 0.0 }
 0x102   : > { %v996_v61 = vsel %vm930_vm10, %v3156_v34, 0.0  ;;  %v1420_v17 = vadd.f32 %v1356_v26, %v1224_v18  ;;  %v864_v19 = vadd.f32 %v800_v25, %v604_v3  ;;  %vm1126_vm15 = vcmp.eq.s32.totalorder %v2992_v44, %v4065_v21 }
 0x103   : > { %vm1322_vm1 = vcmp.eq.s32.totalorder %v2996_v45, %v4065_v21  ;;  %v2235_v29 = vadd.f32 %v2171_v15, %v2039_v4  ;;  %v1944_v10 = vsel %vm1878_vm0, %v3211_v14, 0.0  ;;  %v1192_v63 = vsel %vm1126_vm15, %v3163_v43, 0.0 }
 0x104   : > { %vm1518_vm2 = vcmp.eq.s32.totalorder %v2998_v46, %v4065_v21  ;;  %v1616_v12 = vadd.f32 %v1552_v6, %v1420_v17  ;;  %v2140_v51 = vsel %vm2074_vm11, %v3248_v2, 0.0  ;;  %v1060_v16 = vadd.f32 %v996_v61, %v864_v19 }
 0x105   : > { %vm1714_vm3 = vcmp.eq.s32.totalorder %v3000_v47, %v4065_v21  ;;  %2285 = vmatpush.msra.mxu1 %v2235_v29  ;;  %v1388_v15 = vsel %vm1322_vm1, %v3166_v49, 0.0  ;;  %v1584_v60 = vsel %vm1518_vm2, %v3185_v1, 0.0  ;;  %vm503_vm4 = vcmp.eq.s32.totalorder %v2933_v20, %v4086_v38 }
 0x106   : > { %v1780_v40 = vsel %vm1714_vm3, %v3208_v11, 0.0  ;;  %v1812_v26 = vadd.f32 %v1748_v37, %v1616_v12  ;;  %v1256_v6 = vadd.f32 %v1192_v63, %v1060_v16  ;;  %vm1910_vm5 = vcmp.eq.s32.totalorder %v3011_v50, %v4065_v21 }
 0x107   : > { %vm2106_vm6 = vcmp.eq.s32.totalorder %v3896_v62, %v4065_v21  ;;  %v569_v8 = vsel %vm503_vm4, %v3017_v52, 0.0  ;;  %vm699_vm7 = vcmp.eq.s32.totalorder %v2935_v22, %v4086_v38  ;;  %vm895_vm9 = vcmp.eq.s32.totalorder %v2937_v23, %v4086_v38 }
 0x108   : > { %vm1091_vm14 = vcmp.eq.s32.totalorder %v2939_v24, %v4086_v38  ;;  %v2008_v9 = vadd.f32 %v1944_v10, %v1812_v26  ;;  %v1452_v37 = vadd.f32 %v1388_v15, %v1256_v6  ;;  %v765_v18 = vsel %vm699_vm7, %v3020_v53, 0.0 }
 0x109   : > { %v961_v4 = vsel %vm895_vm9, %v3023_v54, 0.0  ;;  %v1976_v3 = vsel %vm1910_vm5, %v3211_v14, 0.0  ;;  %v829_v21 = vadd.f32 %v765_v18, %v569_v8  ;;  %vm1287_vm8 = vcmp.eq.s32.totalorder %v2944_v28, %v4086_v38 }
 0x10a   : > { %vm1483_vm0 = vcmp.eq.s32.totalorder %v2946_v30, %v4086_v38  ;;  %v2204_v25 = vadd.f32 %v2140_v51, %v2008_v9  ;;  %v1648_v61 = vadd.f32 %v1584_v60, %v1452_v37  ;;  %v2172_v17 = vsel %vm2106_vm6, %v3248_v2, 0.0 }
 0x10b   : > { %v1157_v19 = vsel %vm1091_vm14, %v3026_v55, 0.0  ;;  %v1025_v29 = vadd.f32 %v961_v4, %v829_v21  ;;  %v1353_v10 = vsel %vm1287_vm8, %v3033_v57, 0.0  ;;  %v1549_v63 = vsel %vm1483_vm0, %v3036_v58, 0.0 }
 0x10c   : > { %vm1679_vm11 = vcmp.eq.s32.totalorder %v2957_v35, %v4086_v38  ;;  %2308 = vmatpush.msra.mxu2 %v2204_v25  ;;  %v1844_v12 = vadd.f32 %v1780_v40, %v1648_v61  ;;  %vm1875_vm12 = vcmp.eq.s32.totalorder %v2961_v36, %v4086_v38  ;;  %vm2071_vm13 = vcmp.eq.s32.totalorder %v3748_v31, %v4086_v38 }
 0x10d   : > { %v1745_v16 = vsel %vm1679_vm11, %v3039_v59, 0.0  ;;  %v1221_v51 = vadd.f32 %v1157_v19, %v1025_v29  ;;  %vm535_vm10 = vcmp.eq.s32.totalorder %v2933_v20, %v4090_v5  ;;  %vm731_vm15 = vcmp.eq.s32.totalorder %v2935_v22, %v4090_v5 }
 0x10e   : > { %vm927_vm1 = vcmp.eq.s32.totalorder %v2937_v23, %v4090_v5  ;;  %v2040_v15 = vadd.f32 %v1976_v3, %v1844_v12  ;;  %v601_v60 = vsel %vm535_vm10, %v3017_v52, 0.0  ;;  %v797_v40 = vsel %vm731_vm15, %v3020_v53, 0.0 }
 0x10f   : > { %v993_v26 = vsel %vm927_vm1, %v3023_v54, 0.0  ;;  %v1417_v6 = vadd.f32 %v1353_v10, %v1221_v51  ;;  %v861_v8 = vadd.f32 %v797_v40, %v601_v60  ;;  %vm1123_vm2 = vcmp.eq.s32.totalorder %v2939_v24, %v4090_v5 }
 0x110   : > { %vm1319_vm3 = vcmp.eq.s32.totalorder %v2944_v28, %v4090_v5  ;;  %v2236_v9 = vadd.f32 %v2172_v17, %v2040_v15  ;;  %v1941_v37 = vsel %vm1875_vm12, %v3061_v0, 0.0  ;;  %v1189_v18 = vsel %vm1123_vm2, %v3026_v55, 0.0 }
 0x111   : > { %vm1515_vm4 = vcmp.eq.s32.totalorder %v2946_v30, %v4090_v5  ;;  %v1613_v4 = vadd.f32 %v1549_v63, %v1417_v6  ;;  %v2137_v3 = vsel %vm2071_vm13, %v3089_v7, 0.0  ;;  %v1057_v21 = vadd.f32 %v993_v26, %v861_v8 }
 0x112   : > { %vm1711_vm5 = vcmp.eq.s32.totalorder %v2957_v35, %v4090_v5  ;;  %2331 = vmatpush.msra.mxu3 %v2236_v9  ;;  %v1385_v25 = vsel %vm1319_vm3, %v3033_v57, 0.0  ;;  %v1581_v61 = vsel %vm1515_vm4, %v3036_v58, 0.0  ;;  %vm504_vm6 = vcmp.eq.s32.totalorder %v2974_v39, %v4086_v38 }
 0x113   : > { %v1777_v17 = vsel %vm1711_vm5, %v3039_v59, 0.0  ;;  %v1809_v19 = vadd.f32 %v1745_v16, %v1613_v4  ;;  %v1253_v29 = vadd.f32 %v1189_v18, %v1057_v21  ;;  %vm1907_vm7 = vcmp.eq.s32.totalorder %v2961_v36, %v4090_v5 }
 0x114   : > { %vm2103_vm9 = vcmp.eq.s32.totalorder %v3748_v31, %v4090_v5  ;;  %v570_v10 = vsel %vm504_vm6, %v3150_v32, 0.0  ;;  %vm700_vm14 = vcmp.eq.s32.totalorder %v2976_v41, %v4086_v38  ;;  %vm896_vm8 = vcmp.eq.s32.totalorder %v2978_v42, %v4086_v38 }
 0x115   : > { %vm1092_vm0 = vcmp.eq.s32.totalorder %v2992_v44, %v4086_v38  ;;  %v2005_v63 = vadd.f32 %v1941_v37, %v1809_v19  ;;  %v1449_v12 = vadd.f32 %v1385_v25, %v1253_v29  ;;  %v766_v16 = vsel %vm700_vm14, %v3153_v33, 0.0 }
 0x116   : > { %v962_v51 = vsel %vm896_vm8, %v3156_v34, 0.0  ;;  %v1973_v15 = vsel %vm1907_vm7, %v3061_v0, 0.0  ;;  %v830_v31 = vadd.f32 %v766_v16, %v570_v10  ;;  %vm1288_vm11 = vcmp.eq.s32.totalorder %v2996_v45, %v4086_v38 }
 0x117   : > { %vm1484_vm12 = vcmp.eq.s32.totalorder %v2998_v46, %v4086_v38  ;;  %v2201_v60 = vadd.f32 %v2137_v3, %v2005_v63  ;;  %v1645_v40 = vadd.f32 %v1581_v61, %v1449_v12  ;;  %v2169_v26 = vsel %vm2103_vm9, %v3089_v7, 0.0 }
 0x118   : > { %v1158_v6 = vsel %vm1092_vm0, %v3163_v43, 0.0  ;;  %v1026_v8 = vadd.f32 %v962_v51, %v830_v31  ;;  %v1354_v9 = vsel %vm1288_vm11, %v3166_v49, 0.0  ;;  %v1550_v37 = vsel %vm1484_vm12, %v3185_v1, 0.0 }
 0x119   : > { %vm1680_vm13 = vcmp.eq.s32.totalorder %v3000_v47, %v4086_v38  ;;  %2263 = vmatpush.msra.mxu0 %v2201_v60  ;;  %v1841_v18 = vadd.f32 %v1777_v17, %v1645_v40  ;;  %vm1876_vm10 = vcmp.eq.s32.totalorder %v3011_v50, %v4086_v38  ;;  %vm2072_vm15 = vcmp.eq.s32.totalorder %v3896_v62, %v4086_v38 }
 0x11a   : > { %v1746_v4 = vsel %vm1680_vm13, %v3208_v11, 0.0  ;;  %v1222_v3 = vadd.f32 %v1158_v6, %v1026_v8  ;;  %vm536_vm1 = vcmp.eq.s32.totalorder %v2974_v39, %v4090_v5  ;;  %vm732_vm2 = vcmp.eq.s32.totalorder %v2976_v41, %v4090_v5 }
 0x11b   : > { %vm928_vm3 = vcmp.eq.s32.totalorder %v2978_v42, %v4090_v5  ;;  %v2037_v21 = vadd.f32 %v1973_v15, %v1841_v18  ;;  %v602_v25 = vsel %vm536_vm1, %v3150_v32, 0.0  ;;  %v798_v61 = vsel %vm732_vm2, %v3153_v33, 0.0 }
 0x11c   : > { %v994_v17 = vsel %vm928_vm3, %v3156_v34, 0.0  ;;  %v1418_v19 = vadd.f32 %v1354_v9, %v1222_v3  ;;  %v862_v29 = vadd.f32 %v798_v61, %v602_v25  ;;  %vm1124_vm4 = vcmp.eq.s32.totalorder %v2992_v44, %v4090_v5 }
 0x11d   : > { %vm1320_vm5 = vcmp.eq.s32.totalorder %v2996_v45, %v4090_v5  ;;  %v2233_v10 = vadd.f32 %v2169_v26, %v2037_v21  ;;  %v1942_v63 = vsel %vm1876_vm10, %v3211_v14, 0.0  ;;  %v1190_v12 = vsel %vm1124_vm4, %v3163_v43, 0.0 }
 0x11e   : > { %vm1516_vm6 = vcmp.eq.s32.totalorder %v2998_v46, %v4090_v5  ;;  %v1614_v16 = vadd.f32 %v1550_v37, %v1418_v19  ;;  %v2138_v51 = vsel %vm2072_vm15, %v3248_v2, 0.0  ;;  %v1058_v15 = vadd.f32 %v994_v17, %v862_v29 }
 0x11f   : > { %vm1712_vm7 = vcmp.eq.s32.totalorder %v3000_v47, %v4090_v5  ;;  %2286 = vmatpush.msra.mxu1 %v2233_v10  ;;  %v1386_v31 = vsel %vm1320_vm5, %v3166_v49, 0.0  ;;  %v1582_v60 = vsel %vm1516_vm6, %v3185_v1, 0.0  ;;  %v4299_v26 = vadd.s32 48, %v2927_v13 }
 0x120   : > { %v1778_v40 = vsel %vm1712_vm7, %v3208_v11, 0.0  ;;  %v1810_v6 = vadd.f32 %v1746_v4, %v1614_v16  ;;  %v1254_v8 = vadd.f32 %v1190_v12, %v1058_v15  ;;  %vm1908_vm9 = vcmp.eq.s32.totalorder %v3011_v50, %v4090_v5  ;;  %v4333_v16 = vld [vmem:[%s2920_s18 + $0x10] ss:$0 sm:$0xff] }
 0x121   : > { %vm2104_vm14 = vcmp.eq.s32.totalorder %v3896_v62, %v4090_v5  ;;  %vm501_vm8 = vcmp.eq.s32.totalorder %v2933_v20, %v4299_v26  ;;  %vm697_vm0 = vcmp.eq.s32.totalorder %v2935_v22, %v4299_v26  ;;  %vm893_vm11 = vcmp.eq.s32.totalorder %v2937_v23, %v4299_v26 }
 0x122   : > { %vm1089_vm12 = vcmp.eq.s32.totalorder %v2939_v24, %v4299_v26  ;;  %v2006_v38 = vadd.f32 %v1942_v63, %v1810_v6  ;;  %v1450_v9 = vadd.f32 %v1386_v31, %v1254_v8  ;;  %v567_v37 = vsel %vm501_vm8, %v3017_v52, 0.0 }
 0x123   : > { %v763_v18 = vsel %vm697_vm0, %v3020_v53, 0.0  ;;  %v1974_v4 = vsel %vm1908_vm9, %v3211_v14, 0.0  ;;  %v959_v21 = vsel %vm893_vm11, %v3023_v54, 0.0  ;;  %vm1285_vm13 = vcmp.eq.s32.totalorder %v2944_v28, %v4299_v26 }
 0x124   : > { %v827_v3 = vadd.f32 %v763_v18, %v567_v37  ;;  %v2202_v25 = vadd.f32 %v2138_v51, %v2006_v38  ;;  %v1646_v61 = vadd.f32 %v1582_v60, %v1450_v9  ;;  %v1155_v17 = vsel %vm1089_vm12, %v3026_v55, 0.0 }
 0x125   : > { %vm1481_vm10 = vcmp.eq.s32.totalorder %v2946_v30, %v4299_v26  ;;  %v2170_v19 = vsel %vm2104_vm14, %v3248_v2, 0.0  ;;  %vm1677_vm15 = vcmp.eq.s32.totalorder %v2957_v35, %v4299_v26  ;;  %vm1873_vm1 = vcmp.eq.s32.totalorder %v2961_v36, %v4299_v26 }
 0x126   : > { %v1023_v29 = vadd.f32 %v959_v21, %v827_v3  ;;  %2309 = vmatpush.msra.mxu2 %v2202_v25  ;;  %v1842_v10 = vadd.f32 %v1778_v40, %v1646_v61  ;;  %v1351_v63 = vsel %vm1285_vm13, %v3033_v57, 0.0  ;;  %v1547_v12 = vsel %vm1481_vm10, %v3036_v58, 0.0 }
 0x127   : > { %vm2069_vm2 = vcmp.eq.s32.totalorder %v4333_v16, %v4299_v26  ;;  %v1743_v51 = vsel %vm1677_vm15, %v3039_v59, 0.0  ;;  %v1939_v15 = vsel %vm1873_vm1, %v3061_v0, 0.0  ;;  %v4340_v31 = vadd.s32 176, %v2927_v13 }
 0x128   : > { %v1219_v5 = vadd.f32 %v1155_v17, %v1023_v29  ;;  %v2038_v60 = vadd.f32 %v1974_v4, %v1842_v10  ;;  %v2135_v40 = vsel %vm2069_vm2, %v3089_v7, 0.0  ;;  %vm502_vm3 = vcmp.eq.s32.totalorder %v2974_v39, %v4299_v26 }
 0x129   : > { %vm698_vm4 = vcmp.eq.s32.totalorder %v2976_v41, %v4299_v26  ;;  %vm533_vm5 = vcmp.eq.s32.totalorder %v2933_v20, %v4340_v31  ;;  %vm729_vm6 = vcmp.eq.s32.totalorder %v2935_v22, %v4340_v31  ;;  %vm925_vm7 = vcmp.eq.s32.totalorder %v2937_v23, %v4340_v31 }
 0x12a   : > { %v1415_v6 = vadd.f32 %v1351_v63, %v1219_v5  ;;  %v2234_v8 = vadd.f32 %v2170_v19, %v2038_v60  ;;  %v599_v38 = vsel %vm533_vm5, %v3017_v52, 0.0  ;;  %v795_v9 = vsel %vm729_vm6, %v3020_v53, 0.0 }
 0x12b   : > { %v991_v37 = vsel %vm925_vm7, %v3023_v54, 0.0  ;;  %v859_v4 = vadd.f32 %v795_v9, %v599_v38  ;;  %vm1121_vm9 = vcmp.eq.s32.totalorder %v2939_v24, %v4340_v31  ;;  %vm1317_vm14 = vcmp.eq.s32.totalorder %v2944_v28, %v4340_v31 }
 0x12c   : > { %v1611_v18 = vadd.f32 %v1547_v12, %v1415_v6  ;;  %2332 = vmatpush.msra.mxu3 %v2234_v8  ;;  %v1187_v3 = vsel %vm1121_vm9, %v3026_v55, 0.0  ;;  %vm1513_vm8 = vcmp.eq.s32.totalorder %v2946_v30, %v4340_v31  ;;  %vm1709_vm0 = vcmp.eq.s32.totalorder %v2957_v35, %v4340_v31 }
 0x12d   : > { %vm894_vm11 = vcmp.eq.s32.totalorder %v2978_v42, %v4299_v26  ;;  %v1055_v25 = vadd.f32 %v991_v37, %v859_v4  ;;  %v1383_v61 = vsel %vm1317_vm14, %v3033_v57, 0.0  ;;  %v568_v17 = vsel %vm502_vm3, %v3150_v32, 0.0 }
 0x12e   : > { %v1807_v21 = vadd.f32 %v1743_v51, %v1611_v18  ;;  %v1579_v19 = vsel %vm1513_vm8, %v3036_v58, 0.0  ;;  %v1775_v29 = vsel %vm1709_vm0, %v3039_v59, 0.0  ;;  %vm1905_vm12 = vcmp.eq.s32.totalorder %v2961_v36, %v4340_v31 }
 0x12f   : > { %v764_v10 = vsel %vm698_vm4, %v3153_v33, 0.0  ;;  %v1251_v12 = vadd.f32 %v1187_v3, %v1055_v25  ;;  %vm2101_vm13 = vcmp.eq.s32.totalorder %v4333_v16, %v4340_v31  ;;  %v960_v5 = vsel %vm894_vm11, %v3156_v34, 0.0 }
 0x130   : > { %v2003_v63 = vadd.f32 %v1939_v15, %v1807_v21  ;;  %v828_v51 = vadd.f32 %v764_v10, %v568_v17  ;;  %vm1090_vm10 = vcmp.eq.s32.totalorder %v2992_v44, %v4299_v26  ;;  %vm1286_vm15 = vcmp.eq.s32.totalorder %v2996_v45, %v4299_v26 }
 0x131   : > { %vm1482_vm1 = vcmp.eq.s32.totalorder %v2998_v46, %v4299_v26  ;;  %v1447_v6 = vadd.f32 %v1383_v61, %v1251_v12  ;;  %v1971_v15 = vsel %vm1905_vm12, %v3061_v0, 0.0  ;;  %v1156_v8 = vsel %vm1090_vm10, %v3163_v43, 0.0 }
 0x132   : > { %v2199_v60 = vadd.f32 %v2135_v40, %v2003_v63  ;;  %v2167_v38 = vsel %vm2101_vm13, %v3089_v7, 0.0  ;;  %v1024_v9 = vadd.f32 %v960_v5, %v828_v51  ;;  %vm1678_vm2 = vcmp.eq.s32.totalorder %v3000_v47, %v4299_v26 }
 0x133   : > { %vm1874_vm3 = vcmp.eq.s32.totalorder %v3011_v50, %v4299_v26  ;;  %v1643_v37 = vadd.f32 %v1579_v19, %v1447_v6  ;;  %v1352_v18 = vsel %vm1286_vm15, %v3166_v49, 0.0  ;;  %v1548_v40 = vsel %vm1482_vm1, %v3185_v1, 0.0 }
 0x134   : > { %2264 = vmatpush.msra.mxu0 %v2199_v60  ;;  %v1744_v4 = vsel %vm1678_vm2, %v3208_v11, 0.0  ;;  %v1220_v3 = vadd.f32 %v1156_v8, %v1024_v9  ;;  %v1940_v21 = vsel %vm1874_vm3, %v3211_v14, 0.0  ;;  %vm534_vm4 = vcmp.eq.s32.totalorder %v2974_v39, %v4340_v31 }
 0x135   : > { %vm730_vm5 = vcmp.eq.s32.totalorder %v2976_v41, %v4340_v31  ;;  %v1839_v25 = vadd.f32 %v1775_v29, %v1643_v37  ;;  %v600_v61 = vsel %vm534_vm4, %v3150_v32, 0.0  ;;  %vm926_vm6 = vcmp.eq.s32.totalorder %v2978_v42, %v4340_v31 }
 0x136   : > { %v796_v17 = vsel %vm730_vm5, %v3153_v33, 0.0  ;;  %v1416_v19 = vadd.f32 %v1352_v18, %v1220_v3  ;;  %v992_v63 = vsel %vm926_vm6, %v3156_v34, 0.0  ;;  %vm1122_vm7 = vcmp.eq.s32.totalorder %v2992_v44, %v4340_v31 }
 0x137   : > { %v860_v10 = vadd.f32 %v796_v17, %v600_v61  ;;  %v2035_v12 = vadd.f32 %v1971_v15, %v1839_v25  ;;  %vm2070_vm9 = vcmp.eq.s32.totalorder %v3896_v62, %v4299_v26  ;;  %v1188_v29 = vsel %vm1122_vm7, %v3163_v43, 0.0 }
 0x138   : > { %vm1318_vm14 = vcmp.eq.s32.totalorder %v2996_v45, %v4340_v31  ;;  %v1612_v5 = vadd.f32 %v1548_v40, %v1416_v19  ;;  %vm1514_vm8 = vcmp.eq.s32.totalorder %v2998_v46, %v4340_v31  ;;  %vm1710_vm0 = vcmp.eq.s32.totalorder %v3000_v47, %v4340_v31 }
 0x139   : > { %v1056_v51 = vadd.f32 %v992_v63, %v860_v10  ;;  %v1384_v60 = vsel %vm1318_vm14, %v3166_v49, 0.0  ;;  %v2231_v6 = vadd.f32 %v2167_v38, %v2035_v12  ;;  %vm1906_vm11 = vcmp.eq.s32.totalorder %v3011_v50, %v4340_v31 }
 0x13a   : > { %vm2102_vm12 = vcmp.eq.s32.totalorder %v3896_v62, %v4340_v31  ;;  %v1808_v26 = vadd.f32 %v1744_v4, %v1612_v5  ;;  %v2136_v15 = vsel %vm2070_vm9, %v3248_v2, 0.0  ;;  %v1580_v9 = vsel %vm1514_vm8, %v3185_v1, 0.0 }
 0x13b   : > { %v1252_v8 = vadd.f32 %v1188_v29, %v1056_v51  ;;  %2287 = vmatpush.msra.mxu1 %v2231_v6  ;;  %v1776_v37 = vsel %vm1710_vm0, %v3208_v11, 0.0  ;;  %v1972_v38 = vsel %vm1906_vm11, %v3211_v14, 0.0  ;;  %v4430_v18 = vadd.s32 40, %v2927_v13 }
 0x13c   : > { %v2004_v40 = vadd.f32 %v1940_v21, %v1808_v26  ;;  %v2168_v25 = vsel %vm2102_vm12, %v3248_v2, 0.0  ;;  %v4434_v62 = vadd.s32 168, %v2927_v13  ;;  %v4450_v10 = vadd.s32 32, %v2927_v13 }
 0x13d   : > { %v1448_v3 = vadd.f32 %v1384_v60, %v1252_v8  ;;  %vm499_vm13 = vcmp.eq.s32.totalorder %v2933_v20, %v4430_v18  ;;  %vm695_vm10 = vcmp.eq.s32.totalorder %v2935_v22, %v4430_v18  ;;  %vm891_vm15 = vcmp.eq.s32.totalorder %v2937_v23, %v4430_v18 }
 0x13e   : > { %vm1087_vm1 = vcmp.eq.s32.totalorder %v2939_v24, %v4430_v18  ;;  %v2200_v31 = vadd.f32 %v2136_v15, %v2004_v40  ;;  %v565_v21 = vsel %vm499_vm13, %v3017_v52, 0.0  ;;  %v761_v61 = vsel %vm695_vm10, %v3020_v53, 0.0 }
 0x13f   : > { %v1644_v4 = vadd.f32 %v1580_v9, %v1448_v3  ;;  %v825_v17 = vadd.f32 %v761_v61, %v565_v21  ;;  %v957_v19 = vsel %vm891_vm15, %v3023_v54, 0.0  ;;  %vm1283_vm2 = vcmp.eq.s32.totalorder %v2944_v28, %v4430_v18 }
 0x140   : > { %2310 = vmatpush.msra.mxu2 %v2200_v31  ;;  %v1153_v12 = vsel %vm1087_vm1, %v3026_v55, 0.0  ;;  %vm1479_vm3 = vcmp.eq.s32.totalorder %v2946_v30, %v4430_v18  ;;  %vm1675_vm4 = vcmp.eq.s32.totalorder %v2957_v35, %v4430_v18  ;;  %v1349_v5 = vsel %vm1283_vm2, %v3033_v57, 0.0 }
 0x141   : > { %v1840_v63 = vadd.f32 %v1776_v37, %v1644_v4  ;;  %v1021_v29 = vadd.f32 %v957_v19, %v825_v17  ;;  %v1545_v51 = vsel %vm1479_vm3, %v3036_v58, 0.0  ;;  %v4460_v60 = vadd.s32 160, %v2927_v13 }
 0x142   : > { %v1741_v26 = vsel %vm1675_vm4, %v3039_v59, 0.0  ;;  %vm1871_vm5 = vcmp.eq.s32.totalorder %v2961_v36, %v4430_v18  ;;  %vm531_vm6 = vcmp.eq.s32.totalorder %v2933_v20, %v4434_v62  ;;  %vm2067_vm7 = vcmp.eq.s32.totalorder %v4333_v16, %v4430_v18 }
 0x143   : > { %v2036_v6 = vadd.f32 %v1972_v38, %v1840_v63  ;;  %v1217_v15 = vadd.f32 %v1153_v12, %v1021_v29  ;;  %v597_v8 = vsel %vm531_vm6, %v3017_v52, 0.0  ;;  %vm727_vm9 = vcmp.eq.s32.totalorder %v2935_v22, %v4434_v62 }
 0x144   : > { %v793_v37 = vsel %vm727_vm9, %v3020_v53, 0.0  ;;  %vm923_vm14 = vcmp.eq.s32.totalorder %v2937_v23, %v4434_v62  ;;  %vm1119_vm8 = vcmp.eq.s32.totalorder %v2939_v24, %v4434_v62  ;;  %v1937_v40 = vsel %vm1871_vm5, %v3061_v0, 0.0 }
 0x145   : > { %v2232_v9 = vadd.f32 %v2168_v25, %v2036_v6  ;;  %v1413_v38 = vadd.f32 %v1349_v5, %v1217_v15  ;;  %v857_v3 = vadd.f32 %v793_v37, %v597_v8  ;;  %v989_v31 = vsel %vm923_vm14, %v3023_v54, 0.0 }
 0x146   : > { %v1185_v4 = vsel %vm1119_vm8, %v3026_v55, 0.0  ;;  %vm1315_vm0 = vcmp.eq.s32.totalorder %v2944_v28, %v4434_v62  ;;  %vm1511_vm11 = vcmp.eq.s32.totalorder %v2946_v30, %v4434_v62  ;;  %vm1707_vm12 = vcmp.eq.s32.totalorder %v2957_v35, %v4434_v62 }
 0x147   : > { %2333 = vmatpush.msra.mxu3 %v2232_v9  ;;  %v1609_v25 = vadd.f32 %v1545_v51, %v1413_v38  ;;  %v2133_v21 = vsel %vm2067_vm7, %v3089_v7, 0.0  ;;  %v1053_v61 = vadd.f32 %v989_v31, %v857_v3  ;;  %vm1903_vm13 = vcmp.eq.s32.totalorder %v2961_v36, %v4434_v62 }
 0x148   : > { %v1381_v17 = vsel %vm1315_vm0, %v3033_v57, 0.0  ;;  %v1577_v19 = vsel %vm1511_vm11, %v3036_v58, 0.0  ;;  %v1773_v63 = vsel %vm1707_vm12, %v3039_v59, 0.0  ;;  %vm500_vm10 = vcmp.eq.s32.totalorder %v2974_v39, %v4430_v18 }
 0x149   : > { %v1805_v12 = vadd.f32 %v1741_v26, %v1609_v25  ;;  %v1249_v29 = vadd.f32 %v1185_v4, %v1053_v61  ;;  %vm2099_vm15 = vcmp.eq.s32.totalorder %v4333_v16, %v4434_v62  ;;  %v566_v5 = vsel %vm500_vm10, %v3150_v32, 0.0 }
 0x14a   : > { %vm696_vm1 = vcmp.eq.s32.totalorder %v2976_v41, %v4430_v18  ;;  %vm892_vm2 = vcmp.eq.s32.totalorder %v2978_v42, %v4430_v18  ;;  %vm1088_vm3 = vcmp.eq.s32.totalorder %v2992_v44, %v4430_v18  ;;  %vm1284_vm4 = vcmp.eq.s32.totalorder %v2996_v45, %v4430_v18 }
 0x14b   : > { %v2001_v51 = vadd.f32 %v1937_v40, %v1805_v12  ;;  %v1445_v6 = vadd.f32 %v1381_v17, %v1249_v29  ;;  %v762_v26 = vsel %vm696_vm1, %v3153_v33, 0.0  ;;  %v958_v15 = vsel %vm892_vm2, %v3156_v34, 0.0  ;;  %v4526_v12 = vld [vmem:[%s2920_s18 + $0x18] ss:$0 sm:$0xff] }
 0x14c   : > { %v1969_v8 = vsel %vm1903_vm13, %v3061_v0, 0.0  ;;  %v2165_v9 = vsel %vm2099_vm15, %v3089_v7, 0.0  ;;  %v826_v37 = vadd.f32 %v762_v26, %v566_v5  ;;  %vm1480_vm5 = vcmp.eq.s32.totalorder %v2998_v46, %v4430_v18 }
 0x14d   : > { %v2197_v38 = vadd.f32 %v2133_v21, %v2001_v51  ;;  %v1641_v3 = vadd.f32 %v1577_v19, %v1445_v6  ;;  %v1154_v40 = vsel %vm1088_vm3, %v3163_v43, 0.0  ;;  %vm1676_vm6 = vcmp.eq.s32.totalorder %v3000_v47, %v4430_v18 }
 0x14e   : > { %v1022_v31 = vadd.f32 %v958_v15, %v826_v37  ;;  %v1350_v4 = vsel %vm1284_vm4, %v3166_v49, 0.0  ;;  %v1546_v25 = vsel %vm1480_vm5, %v3185_v1, 0.0  ;;  %v1742_v61 = vsel %vm1676_vm6, %v3208_v11, 0.0 }
 0x14f   : > { %2265 = vmatpush.msra.mxu0 %v2197_v38  ;;  %v1837_v17 = vadd.f32 %v1773_v63, %v1641_v3  ;;  %vm1872_vm7 = vcmp.eq.s32.totalorder %v3011_v50, %v4430_v18  ;;  %vm2068_vm9 = vcmp.eq.s32.totalorder %v4526_v12, %v4430_v18  ;;  %vm532_vm14 = vcmp.eq.s32.totalorder %v2974_v39, %v4434_v62 }
 0x150   : > { %v1218_v21 = vadd.f32 %v1154_v40, %v1022_v31  ;;  %v598_v19 = vsel %vm532_vm14, %v3150_v32, 0.0  ;;  %vm728_vm8 = vcmp.eq.s32.totalorder %v2976_v41, %v4434_v62  ;;  %vm924_vm0 = vcmp.eq.s32.totalorder %v2978_v42, %v4434_v62 }
 0x151   : > { %v2033_v63 = vadd.f32 %v1969_v8, %v1837_v17  ;;  %v794_v29 = vsel %vm728_vm8, %v3153_v33, 0.0  ;;  %v990_v5 = vsel %vm924_vm0, %v3156_v34, 0.0  ;;  %vm1120_vm11 = vcmp.eq.s32.totalorder %v2992_v44, %v4434_v62 }
 0x152   : > { %v1414_v51 = vadd.f32 %v1350_v4, %v1218_v21  ;;  %v1938_v6 = vsel %vm1872_vm7, %v3211_v14, 0.0  ;;  %v858_v26 = vadd.f32 %v794_v29, %v598_v19  ;;  %vm1316_vm12 = vcmp.eq.s32.totalorder %v2996_v45, %v4434_v62 }
 0x153   : > { %v2229_v15 = vadd.f32 %v2165_v9, %v2033_v63  ;;  %v1186_v37 = vsel %vm1120_vm11, %v3163_v43, 0.0  ;;  %vm1512_vm13 = vcmp.eq.s32.totalorder %v2998_v46, %v4434_v62  ;;  %vm1708_vm10 = vcmp.eq.s32.totalorder %v3000_v47, %v4434_v62 }
 0x154   : > { %v1610_v8 = vadd.f32 %v1546_v25, %v1414_v51  ;;  %v2134_v38 = vsel %vm2068_vm9, %v3248_v2, 0.0  ;;  %v1054_v3 = vadd.f32 %v990_v5, %v858_v26  ;;  %v1382_v40 = vsel %vm1316_vm12, %v3166_v49, 0.0 }
 0x155   : > { %2288 = vmatpush.msra.mxu1 %v2229_v15  ;;  %v1578_v9 = vsel %vm1512_vm13, %v3185_v1, 0.0  ;;  %v1774_v31 = vsel %vm1708_vm10, %v3208_v11, 0.0  ;;  %vm497_vm15 = vcmp.eq.s32.totalorder %v2933_v20, %v4450_v10  ;;  %vm693_vm1 = vcmp.eq.s32.totalorder %v2935_v22, %v4450_v10 }
 0x156   : > { %v1806_v4 = vadd.f32 %v1742_v61, %v1610_v8  ;;  %v1250_v25 = vadd.f32 %v1186_v37, %v1054_v3  ;;  %vm1904_vm2 = vcmp.eq.s32.totalorder %v3011_v50, %v4434_v62  ;;  %vm2100_vm3 = vcmp.eq.s32.totalorder %v4526_v12, %v4434_v62 }
 0x157   : > { %v563_v18 = vsel %vm497_vm15, %v3017_v52, 0.0  ;;  %v759_v17 = vsel %vm693_vm1, %v3020_v53, 0.0  ;;  %vm889_vm4 = vcmp.eq.s32.totalorder %v2937_v23, %v4450_v10  ;;  %vm1085_vm5 = vcmp.eq.s32.totalorder %v2939_v24, %v4450_v10 }
 0x158   : > { %v2002_v21 = vadd.f32 %v1938_v6, %v1806_v4  ;;  %v1446_v19 = vadd.f32 %v1382_v40, %v1250_v25  ;;  %v823_v61 = vadd.f32 %v759_v17, %v563_v18  ;;  %v955_v63 = vsel %vm889_vm4, %v3023_v54, 0.0 }
 0x159   : > { %v1151_v29 = vsel %vm1085_vm5, %v3026_v55, 0.0  ;;  %vm1281_vm6 = vcmp.eq.s32.totalorder %v2944_v28, %v4450_v10  ;;  %vm1477_vm7 = vcmp.eq.s32.totalorder %v2946_v30, %v4450_v10  ;;  %vm1673_vm9 = vcmp.eq.s32.totalorder %v2957_v35, %v4450_v10 }
 0x15a   : > { %v2198_v5 = vadd.f32 %v2134_v38, %v2002_v21  ;;  %v1642_v51 = vadd.f32 %v1578_v9, %v1446_v19  ;;  %v1970_v6 = vsel %vm1904_vm2, %v3211_v14, 0.0  ;;  %v1019_v26 = vadd.f32 %v955_v63, %v823_v61 }
 0x15b   : > { %v2166_v15 = vsel %vm2100_vm3, %v3248_v2, 0.0  ;;  %v1347_v37 = vsel %vm1281_vm6, %v3033_v57, 0.0  ;;  %v1543_v8 = vsel %vm1477_vm7, %v3036_v58, 0.0  ;;  %v1739_v3 = vsel %vm1673_vm9, %v3039_v59, 0.0 }
 0x15c   : > { %2311 = vmatpush.msra.mxu2 %v2198_v5  ;;  %v1838_v38 = vadd.f32 %v1774_v31, %v1642_v51  ;;  %v1215_v40 = vadd.f32 %v1151_v29, %v1019_v26  ;;  %vm1869_vm14 = vcmp.eq.s32.totalorder %v2961_v36, %v4450_v10  ;;  %vm2065_vm8 = vcmp.eq.s32.totalorder %v4333_v16, %v4450_v10 }
 0x15d   : > { %vm529_vm0 = vcmp.eq.s32.totalorder %v2933_v20, %v4460_v60  ;;  %vm725_vm11 = vcmp.eq.s32.totalorder %v2935_v22, %v4460_v60  ;;  %vm921_vm12 = vcmp.eq.s32.totalorder %v2937_v23, %v4460_v60  ;;  %vm1117_vm13 = vcmp.eq.s32.totalorder %v2939_v24, %v4460_v60 }
 0x15e   : > { %v2034_v62 = vadd.f32 %v1970_v6, %v1838_v38  ;;  %v1411_v9 = vadd.f32 %v1347_v37, %v1215_v40  ;;  %v595_v31 = vsel %vm529_vm0, %v3017_v52, 0.0  ;;  %v791_v4 = vsel %vm725_vm11, %v3020_v53, 0.0 }
 0x15f   : > { %v1935_v25 = vsel %vm1869_vm14, %v3061_v0, 0.0  ;;  %v855_v18 = vadd.f32 %v791_v4, %v595_v31  ;;  %v987_v17 = vsel %vm921_vm12, %v3023_v54, 0.0  ;;  %vm1313_vm10 = vcmp.eq.s32.totalorder %v2944_v28, %v4460_v60 }
 0x160   : > { %v2230_v21 = vadd.f32 %v2166_v15, %v2034_v62  ;;  %v1607_v19 = vadd.f32 %v1543_v8, %v1411_v9  ;;  %v1183_v61 = vsel %vm1117_vm13, %v3026_v55, 0.0  ;;  %vm1509_vm15 = vcmp.eq.s32.totalorder %v2946_v30, %v4460_v60 }
 0x161   : > { %v2131_v63 = vsel %vm2065_vm8, %v3089_v7, 0.0  ;;  %v1051_v29 = vadd.f32 %v987_v17, %v855_v18  ;;  %v1379_v5 = vsel %vm1313_vm10, %v3033_v57, 0.0  ;;  %vm1705_vm1 = vcmp.eq.s32.totalorder %v2957_v35, %v4460_v60 }
 0x162   : > { %2334 = vmatpush.msra.mxu3 %v2230_v21  ;;  %v1803_v51 = vadd.f32 %v1739_v3, %v1607_v19  ;;  %v1575_v6 = vsel %vm1509_vm15, %v3036_v58, 0.0  ;;  %v1771_v26 = vsel %vm1705_vm1, %v3039_v59, 0.0  ;;  %vm1901_vm2 = vcmp.eq.s32.totalorder %v2961_v36, %v4460_v60 }
 0x163   : > { %v1247_v15 = vadd.f32 %v1183_v61, %v1051_v29  ;;  %vm2097_vm3 = vcmp.eq.s32.totalorder %v4333_v16, %v4460_v60  ;;  %vm498_vm4 = vcmp.eq.s32.totalorder %v2974_v39, %v4450_v10  ;;  %vm694_vm5 = vcmp.eq.s32.totalorder %v2976_v41, %v4450_v10 }
 0x164   : > { %v1999_v37 = vadd.f32 %v1935_v25, %v1803_v51  ;;  %v564_v8 = vsel %vm498_vm4, %v3150_v32, 0.0  ;;  %v760_v3 = vsel %vm694_vm5, %v3153_v33, 0.0  ;;  %vm890_vm6 = vcmp.eq.s32.totalorder %v2978_v42, %v4450_v10 }
 0x165   : > { %v1443_v38 = vadd.f32 %v1379_v5, %v1247_v15  ;;  %v824_v40 = vadd.f32 %v760_v3, %v564_v8  ;;  %v956_v62 = vsel %vm890_vm6, %v3156_v34, 0.0  ;;  %vm1086_vm7 = vcmp.eq.s32.totalorder %v2992_v44, %v4450_v10 }
 0x166   : > { %v2195_v9 = vadd.f32 %v2131_v63, %v1999_v37  ;;  %v1152_v31 = vsel %vm1086_vm7, %v3163_v43, 0.0  ;;  %vm1282_vm9 = vcmp.eq.s32.totalorder %v2996_v45, %v4450_v10  ;;  %vm1478_vm14 = vcmp.eq.s32.totalorder %v2998_v46, %v4450_v10 }
 0x167   : > { %v1639_v4 = vadd.f32 %v1575_v6, %v1443_v38  ;;  %v1967_v25 = vsel %vm1901_vm2, %v3061_v0, 0.0  ;;  %v1020_v18 = vadd.f32 %v956_v62, %v824_v40  ;;  %v2163_v17 = vsel %vm2097_vm3, %v3089_v7, 0.0 }
 0x168   : > { %2266 = vmatpush.msra.mxu0 %v2195_v9  ;;  %v1348_v21 = vsel %vm1282_vm9, %v3166_v49, 0.0  ;;  %v1544_v19 = vsel %vm1478_vm14, %v3185_v1, 0.0  ;;  %vm530_vm8 = vcmp.eq.s32.totalorder %v2974_v39, %v4460_v60  ;;  %vm1674_vm0 = vcmp.eq.s32.totalorder %v3000_v47, %v4450_v10 }
 0x169   : > { %v1835_v61 = vadd.f32 %v1771_v26, %v1639_v4  ;;  %v1216_v63 = vadd.f32 %v1152_v31, %v1020_v18  ;;  %vm1870_vm11 = vcmp.eq.s32.totalorder %v3011_v50, %v4450_v10  ;;  %vm2066_vm12 = vcmp.eq.s32.totalorder %v4526_v12, %v4450_v10 }
 0x16a   : > { %v596_v29 = vsel %vm530_vm8, %v3150_v32, 0.0  ;;  %vm726_vm13 = vcmp.eq.s32.totalorder %v2976_v41, %v4460_v60  ;;  %vm922_vm10 = vcmp.eq.s32.totalorder %v2978_v42, %v4460_v60  ;;  %v1740_v15 = vsel %vm1674_vm0, %v3208_v11, 0.0 }
 0x16b   : > { %v2031_v5 = vadd.f32 %v1967_v25, %v1835_v61  ;;  %v1412_v51 = vadd.f32 %v1348_v21, %v1216_v63  ;;  %v792_v6 = vsel %vm726_vm13, %v3153_v33, 0.0  ;;  %v988_v26 = vsel %vm922_vm10, %v3156_v34, 0.0 }
 0x16c   : > { %v856_v37 = vadd.f32 %v792_v6, %v596_v29  ;;  %vm1118_vm15 = vcmp.eq.s32.totalorder %v2992_v44, %v4460_v60  ;;  %vm1314_vm1 = vcmp.eq.s32.totalorder %v2996_v45, %v4460_v60  ;;  %vm1510_vm2 = vcmp.eq.s32.totalorder %v2998_v46, %v4460_v60 }
 0x16d   : > { %v2227_v8 = vadd.f32 %v2163_v17, %v2031_v5  ;;  %v1608_v3 = vadd.f32 %v1544_v19, %v1412_v51  ;;  %v1184_v38 = vsel %vm1118_vm15, %v3163_v43, 0.0  ;;  %v1936_v40 = vsel %vm1870_vm11, %v3211_v14, 0.0 }
 0x16e   : > { %v1052_v62 = vadd.f32 %v988_v26, %v856_v37  ;;  %vm1706_vm3 = vcmp.eq.s32.totalorder %v3000_v47, %v4460_v60  ;;  %vm1902_vm4 = vcmp.eq.s32.totalorder %v3011_v50, %v4460_v60  ;;  %v2132_v31 = vsel %vm2066_vm12, %v3248_v2, 0.0 }
 0x16f   : > { %2289 = vmatpush.msra.mxu1 %v2227_v8  ;;  %v1804_v9 = vadd.f32 %v1740_v15, %v1608_v3  ;;  %v1380_v4 = vsel %vm1314_vm1, %v3166_v49, 0.0  ;;  %vm2098_vm5 = vcmp.eq.s32.totalorder %v4526_v12, %v4460_v60  ;;  %v1576_v18 = vsel %vm1510_vm2, %v3185_v1, 0.0 }
 0x170   : > { %v1248_v25 = vadd.f32 %v1184_v38, %v1052_v62  ;;  %v1772_v17 = vsel %vm1706_vm3, %v3208_v11, 0.0  ;;  %v4690_v21 = vadd.s32 24, %v2927_v13  ;;  %v1968_v61 = vsel %vm1902_vm4, %v3211_v14, 0.0 }
 0x171   : > { %v2000_v19 = vadd.f32 %v1936_v40, %v1804_v9  ;;  %v2164_v63 = vsel %vm2098_vm5, %v3248_v2, 0.0  ;;  %v4695_v10 = vadd.s32 152, %v2927_v13  ;;  %v4716_v8 = vadd.s32 16, %v2927_v13 }
 0x172   : > { %v1444_v29 = vadd.f32 %v1380_v4, %v1248_v25  ;;  %vm495_vm6 = vcmp.eq.s32.totalorder %v2933_v20, %v4690_v21  ;;  %vm691_vm7 = vcmp.eq.s32.totalorder %v2935_v22, %v4690_v21  ;;  %vm887_vm9 = vcmp.eq.s32.totalorder %v2937_v23, %v4690_v21 }
 0x173   : > { %v2196_v60 = vadd.f32 %v2132_v31, %v2000_v19  ;;  %v561_v5 = vsel %vm495_vm6, %v3017_v52, 0.0  ;;  %v757_v51 = vsel %vm691_vm7, %v3020_v53, 0.0  ;;  %v953_v6 = vsel %vm887_vm9, %v3023_v54, 0.0 }
 0x174   : > { %v1640_v26 = vadd.f32 %v1576_v18, %v1444_v29  ;;  %v821_v15 = vadd.f32 %v757_v51, %v561_v5  ;;  %vm1083_vm14 = vcmp.eq.s32.totalorder %v2939_v24, %v4690_v21  ;;  %vm1279_vm8 = vcmp.eq.s32.totalorder %v2944_v28, %v4690_v21 }
 0x175   : > { %2312 = vmatpush.msra.mxu2 %v2196_v60  ;;  %v1149_v37 = vsel %vm1083_vm14, %v3026_v55, 0.0  ;;  %vm1475_vm0 = vcmp.eq.s32.totalorder %v2946_v30, %v4690_v21  ;;  %vm1671_vm11 = vcmp.eq.s32.totalorder %v2957_v35, %v4690_v21  ;;  %v1345_v40 = vsel %vm1279_vm8, %v3033_v57, 0.0 }
 0x176   : > { %v1836_v3 = vadd.f32 %v1772_v17, %v1640_v26  ;;  %v1017_v38 = vadd.f32 %v953_v6, %v821_v15  ;;  %v4720_v62 = vadd.s32 144, %v2927_v13  ;;  %v1541_v9 = vsel %vm1475_vm0, %v3036_v58, 0.0 }
 0x177   : > { %v1737_v31 = vsel %vm1671_vm11, %v3039_v59, 0.0  ;;  %vm527_vm12 = vcmp.eq.s32.totalorder %v2933_v20, %v4695_v10  ;;  %vm723_vm13 = vcmp.eq.s32.totalorder %v2935_v22, %v4695_v10  ;;  %vm1867_vm10 = vcmp.eq.s32.totalorder %v2961_v36, %v4690_v21 }
 0x178   : > { %v2032_v4 = vadd.f32 %v1968_v61, %v1836_v3  ;;  %v1213_v25 = vadd.f32 %v1149_v37, %v1017_v38  ;;  %vm2063_vm15 = vcmp.eq.s32.totalorder %v4333_v16, %v4690_v21  ;;  %v593_v18 = vsel %vm527_vm12, %v3017_v52, 0.0 }
 0x179   : > { %v789_v17 = vsel %vm723_vm13, %v3020_v53, 0.0  ;;  %vm919_vm1 = vcmp.eq.s32.totalorder %v2937_v23, %v4695_v10  ;;  %vm1115_vm2 = vcmp.eq.s32.totalorder %v2939_v24, %v4695_v10  ;;  %vm1311_vm3 = vcmp.eq.s32.totalorder %v2944_v28, %v4695_v10 }
 0x17a   : > { %v2228_v19 = vadd.f32 %v2164_v63, %v2032_v4  ;;  %v1409_v29 = vadd.f32 %v1345_v40, %v1213_v25  ;;  %v853_v61 = vadd.f32 %v789_v17, %v593_v18  ;;  %v985_v60 = vsel %vm919_vm1, %v3023_v54, 0.0 }
 0x17b   : > { %v1181_v5 = vsel %vm1115_vm2, %v3026_v55, 0.0  ;;  %vm1507_vm4 = vcmp.eq.s32.totalorder %v2946_v30, %v4695_v10  ;;  %vm1703_vm5 = vcmp.eq.s32.totalorder %v2957_v35, %v4695_v10  ;;  %v1933_v63 = vsel %vm1867_vm10, %v3061_v0, 0.0 }
 0x17c   : > { %2335 = vmatpush.msra.mxu3 %v2228_v19  ;;  %v1605_v51 = vadd.f32 %v1541_v9, %v1409_v29  ;;  %v2129_v6 = vsel %vm2063_vm15, %v3089_v7, 0.0  ;;  %v1049_v26 = vadd.f32 %v985_v60, %v853_v61  ;;  %v1377_v15 = vsel %vm1311_vm3, %v3033_v57, 0.0 }
 0x17d   : > { %v1573_v37 = vsel %vm1507_vm4, %v3036_v58, 0.0  ;;  %v1769_v3 = vsel %vm1703_vm5, %v3039_v59, 0.0  ;;  %vm496_vm6 = vcmp.eq.s32.totalorder %v2974_v39, %v4690_v21  ;;  %vm1899_vm7 = vcmp.eq.s32.totalorder %v2961_v36, %v4695_v10 }
 0x17e   : > { %v1801_v38 = vadd.f32 %v1737_v31, %v1605_v51  ;;  %v1245_v40 = vadd.f32 %v1181_v5, %v1049_v26  ;;  %vm2095_vm9 = vcmp.eq.s32.totalorder %v4333_v16, %v4695_v10  ;;  %v562_v9 = vsel %vm496_vm6, %v3150_v32, 0.0 }
 0x17f   : > { %vm692_vm14 = vcmp.eq.s32.totalorder %v2976_v41, %v4690_v21  ;;  %vm888_vm8 = vcmp.eq.s32.totalorder %v2978_v42, %v4690_v21  ;;  %vm1084_vm0 = vcmp.eq.s32.totalorder %v2992_v44, %v4690_v21  ;;  %v1965_v17 = vsel %vm1899_vm7, %v3061_v0, 0.0 }
 0x180   : > { %v1997_v4 = vadd.f32 %v1933_v63, %v1801_v38  ;;  %v1441_v31 = vadd.f32 %v1377_v15, %v1245_v40  ;;  %v758_v25 = vsel %vm692_vm14, %v3153_v33, 0.0  ;;  %v954_v18 = vsel %vm888_vm8, %v3156_v34, 0.0 }
 0x181   : > { %v822_v19 = vadd.f32 %v758_v25, %v562_v9  ;;  %vm1280_vm11 = vcmp.eq.s32.totalorder %v2996_v45, %v4690_v21  ;;  %vm1476_vm12 = vcmp.eq.s32.totalorder %v2998_v46, %v4690_v21  ;;  %v2161_v60 = vsel %vm2095_vm9, %v3089_v7, 0.0 }
 0x182   : > { %v2193_v29 = vadd.f32 %v2129_v6, %v1997_v4  ;;  %v1637_v61 = vadd.f32 %v1573_v37, %v1441_v31  ;;  %v1150_v5 = vsel %vm1084_vm0, %v3163_v43, 0.0  ;;  %v1346_v63 = vsel %vm1280_vm11, %v3166_v49, 0.0 }
 0x183   : > { %v1018_v51 = vadd.f32 %v954_v18, %v822_v19  ;;  %v1542_v26 = vsel %vm1476_vm12, %v3185_v1, 0.0  ;;  %vm1672_vm13 = vcmp.eq.s32.totalorder %v3000_v47, %v4690_v21  ;;  %vm1868_vm10 = vcmp.eq.s32.totalorder %v3011_v50, %v4690_v21 }
 0x184   : > { %2267 = vmatpush.msra.mxu0 %v2193_v29  ;;  %v1833_v15 = vadd.f32 %v1769_v3, %v1637_v61  ;;  %v1738_v38 = vsel %vm1672_vm13, %v3208_v11, 0.0  ;;  %vm2064_vm15 = vcmp.eq.s32.totalorder %v4526_v12, %v4690_v21  ;;  %vm528_vm1 = vcmp.eq.s32.totalorder %v2974_v39, %v4695_v10 }
 0x185   : > { %v1214_v6 = vadd.f32 %v1150_v5, %v1018_v51  ;;  %vm724_vm2 = vcmp.eq.s32.totalorder %v2976_v41, %v4695_v10  ;;  %vm920_vm3 = vcmp.eq.s32.totalorder %v2978_v42, %v4695_v10  ;;  %v594_v3 = vsel %vm528_vm1, %v3150_v32, 0.0 }
 0x186   : > { %v2029_v37 = vadd.f32 %v1965_v17, %v1833_v15  ;;  %v790_v40 = vsel %vm724_vm2, %v3153_v33, 0.0  ;;  %v986_v9 = vsel %vm920_vm3, %v3156_v34, 0.0  ;;  %vm1116_vm4 = vcmp.eq.s32.totalorder %v2992_v44, %v4695_v10 }
 0x187   : > { %v1410_v4 = vadd.f32 %v1346_v63, %v1214_v6  ;;  %v854_v31 = vadd.f32 %v790_v40, %v594_v3  ;;  %vm1312_vm5 = vcmp.eq.s32.totalorder %v2996_v45, %v4695_v10  ;;  %v1934_v18 = vsel %vm1868_vm10, %v3211_v14, 0.0 }
 0x188   : > { %v2225_v25 = vadd.f32 %v2161_v60, %v2029_v37  ;;  %v1182_v19 = vsel %vm1116_vm4, %v3163_v43, 0.0  ;;  %vm1508_vm6 = vcmp.eq.s32.totalorder %v2998_v46, %v4695_v10  ;;  %v2130_v29 = vsel %vm2064_vm15, %v3248_v2, 0.0 }
 0x189   : > { %v1606_v17 = vadd.f32 %v1542_v26, %v1410_v4  ;;  %v1050_v61 = vadd.f32 %v986_v9, %v854_v31  ;;  %vm1704_vm7 = vcmp.eq.s32.totalorder %v3000_v47, %v4695_v10  ;;  %v1378_v60 = vsel %vm1312_vm5, %v3166_v49, 0.0 }
 0x18a   : > { %2290 = vmatpush.msra.mxu1 %v2225_v25  ;;  %v1574_v5 = vsel %vm1508_vm6, %v3185_v1, 0.0  ;;  %v1770_v51 = vsel %vm1704_vm7, %v3208_v11, 0.0  ;;  %vm493_vm9 = vcmp.eq.s32.totalorder %v2933_v20, %v4716_v8  ;;  %vm1900_vm14 = vcmp.eq.s32.totalorder %v3011_v50, %v4695_v10 }
 0x18b   : > { %v1802_v63 = vadd.f32 %v1738_v38, %v1606_v17  ;;  %v1246_v26 = vadd.f32 %v1182_v19, %v1050_v61  ;;  %vm2096_vm8 = vcmp.eq.s32.totalorder %v4526_v12, %v4695_v10  ;;  %v559_v21 = vsel %vm493_vm9, %v3017_v52, 0.0 }
 0x18c   : > { %vm689_vm0 = vcmp.eq.s32.totalorder %v2935_v22, %v4716_v8  ;;  %vm885_vm11 = vcmp.eq.s32.totalorder %v2937_v23, %v4716_v8  ;;  %vm1081_vm12 = vcmp.eq.s32.totalorder %v2939_v24, %v4716_v8  ;;  %v1966_v3 = vsel %vm1900_vm14, %v3211_v14, 0.0 }
 0x18d   : > { %v1998_v15 = vadd.f32 %v1934_v18, %v1802_v63  ;;  %v1442_v38 = vadd.f32 %v1378_v60, %v1246_v26  ;;  %v755_v6 = vsel %vm689_vm0, %v3020_v53, 0.0  ;;  %v951_v37 = vsel %vm885_vm11, %v3023_v54, 0.0 }
 0x18e   : > { %v819_v10 = vadd.f32 %v755_v6, %v559_v21  ;;  %vm1277_vm13 = vcmp.eq.s32.totalorder %v2944_v28, %v4716_v8  ;;  %vm1473_vm10 = vcmp.eq.s32.totalorder %v2946_v30, %v4716_v8  ;;  %v2162_v4 = vsel %vm2096_vm8, %v3248_v2, 0.0 }
 0x18f   : > { %v2194_v40 = vadd.f32 %v2130_v29, %v1998_v15  ;;  %v1638_v9 = vadd.f32 %v1574_v5, %v1442_v38  ;;  %v1147_v31 = vsel %vm1081_vm12, %v3026_v55, 0.0  ;;  %v1343_v18 = vsel %vm1277_vm13, %v3033_v57, 0.0 }
 0x190   : > { %v1015_v25 = vadd.f32 %v951_v37, %v819_v10  ;;  %v1539_v19 = vsel %vm1473_vm10, %v3036_v58, 0.0  ;;  %vm1669_vm15 = vcmp.eq.s32.totalorder %v2957_v35, %v4716_v8  ;;  %vm1865_vm1 = vcmp.eq.s32.totalorder %v2961_v36, %v4716_v8 }
 0x191   : > { %2313 = vmatpush.msra.mxu2 %v2194_v40  ;;  %v1834_v17 = vadd.f32 %v1770_v51, %v1638_v9  ;;  %v1735_v61 = vsel %vm1669_vm15, %v3039_v59, 0.0  ;;  %vm2061_vm2 = vcmp.eq.s32.totalorder %v4333_v16, %v4716_v8  ;;  %vm525_vm3 = vcmp.eq.s32.totalorder %v2933_v20, %v4720_v62 }
 0x192   : > { %v1211_v29 = vadd.f32 %v1147_v31, %v1015_v25  ;;  %vm721_vm4 = vcmp.eq.s32.totalorder %v2935_v22, %v4720_v62  ;;  %vm917_vm5 = vcmp.eq.s32.totalorder %v2937_v23, %v4720_v62  ;;  %v591_v5 = vsel %vm525_vm3, %v3017_v52, 0.0 }
 0x193   : > { %v2030_v60 = vadd.f32 %v1966_v3, %v1834_v17  ;;  %v787_v51 = vsel %vm721_vm4, %v3020_v53, 0.0  ;;  %v983_v63 = vsel %vm917_vm5, %v3023_v54, 0.0  ;;  %vm1113_vm6 = vcmp.eq.s32.totalorder %v2939_v24, %v4720_v62 }
 0x194   : > { %v1407_v26 = vadd.f32 %v1343_v18, %v1211_v29  ;;  %v851_v21 = vadd.f32 %v787_v51, %v591_v5  ;;  %vm1309_vm7 = vcmp.eq.s32.totalorder %v2944_v28, %v4720_v62  ;;  %v1931_v38 = vsel %vm1865_vm1, %v3061_v0, 0.0 }
 0x195   : > { %v2226_v15 = vadd.f32 %v2162_v4, %v2030_v60  ;;  %v1179_v6 = vsel %vm1113_vm6, %v3026_v55, 0.0  ;;  %vm1505_vm9 = vcmp.eq.s32.totalorder %v2946_v30, %v4720_v62  ;;  %v2127_v3 = vsel %vm2061_vm2, %v3089_v7, 0.0 }
 0x196   : > { %v1603_v37 = vadd.f32 %v1539_v19, %v1407_v26  ;;  %v1047_v10 = vadd.f32 %v983_v63, %v851_v21  ;;  %vm1701_vm14 = vcmp.eq.s32.totalorder %v2957_v35, %v4720_v62  ;;  %v1375_v40 = vsel %vm1309_vm7, %v3033_v57, 0.0 }
 0x197   : > { %2336 = vmatpush.msra.mxu3 %v2226_v15  ;;  %v1571_v9 = vsel %vm1505_vm9, %v3036_v58, 0.0  ;;  %v1767_v4 = vsel %vm1701_vm14, %v3039_v59, 0.0  ;;  %vm494_vm8 = vcmp.eq.s32.totalorder %v2974_v39, %v4716_v8  ;;  %vm1897_vm0 = vcmp.eq.s32.totalorder %v2961_v36, %v4720_v62 }
 0x198   : > { %v1799_v31 = vadd.f32 %v1735_v61, %v1603_v37  ;;  %v1243_v25 = vadd.f32 %v1179_v6, %v1047_v10  ;;  %vm2093_vm11 = vcmp.eq.s32.totalorder %v4333_v16, %v4720_v62  ;;  %v560_v18 = vsel %vm494_vm8, %v3150_v32, 0.0 }
 0x199   : > { %vm690_vm12 = vcmp.eq.s32.totalorder %v2976_v41, %v4716_v8  ;;  %vm886_vm13 = vcmp.eq.s32.totalorder %v2978_v42, %v4716_v8  ;;  %vm1082_vm10 = vcmp.eq.s32.totalorder %v2992_v44, %v4716_v8  ;;  %v1963_v60 = vsel %vm1897_vm0, %v3061_v0, 0.0 }
 0x19a   : > { %v1995_v19 = vadd.f32 %v1931_v38, %v1799_v31  ;;  %v1439_v17 = vadd.f32 %v1375_v40, %v1243_v25  ;;  %v756_v61 = vsel %vm690_vm12, %v3153_v33, 0.0  ;;  %v952_v29 = vsel %vm886_vm13, %v3156_v34, 0.0 }
 0x19b   : > { %v820_v16 = vadd.f32 %v756_v61, %v560_v18  ;;  %vm1278_vm15 = vcmp.eq.s32.totalorder %v2996_v45, %v4716_v8  ;;  %vm1474_vm1 = vcmp.eq.s32.totalorder %v2998_v46, %v4716_v8  ;;  %v2159_v63 = vsel %vm2093_vm11, %v3089_v7, 0.0 }
 0x19c   : > { %v2191_v5 = vadd.f32 %v2127_v3, %v1995_v19  ;;  %v1635_v51 = vadd.f32 %v1571_v9, %v1439_v17  ;;  %v1148_v26 = vsel %vm1082_vm10, %v3163_v43, 0.0  ;;  %v1344_v15 = vsel %vm1278_vm15, %v3166_v49, 0.0 }
 0x19d   : > { %v1016_v21 = vadd.f32 %v952_v29, %v820_v16  ;;  %v1540_v38 = vsel %vm1474_vm1, %v3185_v1, 0.0  ;;  %vm1670_vm2 = vcmp.eq.s32.totalorder %v3000_v47, %v4716_v8  ;;  %vm1866_vm3 = vcmp.eq.s32.totalorder %v3011_v50, %v4716_v8 }
 0x19e   : > { %2268 = vmatpush.msra.mxu0 %v2191_v5  ;;  %v1831_v6 = vadd.f32 %v1767_v4, %v1635_v51  ;;  %v1736_v37 = vsel %vm1670_vm2, %v3208_v11, 0.0  ;;  %vm2062_vm4 = vcmp.eq.s32.totalorder %v4526_v12, %v4716_v8  ;;  %vm526_vm5 = vcmp.eq.s32.totalorder %v2974_v39, %v4720_v62 }
 0x19f   : > { %v1212_v3 = vadd.f32 %v1148_v26, %v1016_v21  ;;  %vm722_vm6 = vcmp.eq.s32.totalorder %v2976_v41, %v4720_v62  ;;  %vm918_vm7 = vcmp.eq.s32.totalorder %v2978_v42, %v4720_v62  ;;  %v592_v40 = vsel %vm526_vm5, %v3150_v32, 0.0 }
 0x1a0   : > { %v2027_v10 = vadd.f32 %v1963_v60, %v1831_v6  ;;  %v788_v9 = vsel %vm722_vm6, %v3153_v33, 0.0  ;;  %v984_v4 = vsel %vm918_vm7, %v3156_v34, 0.0  ;;  %vm1114_vm9 = vcmp.eq.s32.totalorder %v2992_v44, %v4720_v62 }
 0x1a1   : > { %v1408_v31 = vadd.f32 %v1344_v15, %v1212_v3  ;;  %v852_v25 = vadd.f32 %v788_v9, %v592_v40  ;;  %vm1310_vm14 = vcmp.eq.s32.totalorder %v2996_v45, %v4720_v62  ;;  %v1932_v19 = vsel %vm1866_vm3, %v3211_v14, 0.0 }
 0x1a2   : > { %v2223_v18 = vadd.f32 %v2159_v63, %v2027_v10  ;;  %v1180_v17 = vsel %vm1114_vm9, %v3163_v43, 0.0  ;;  %vm1506_vm8 = vcmp.eq.s32.totalorder %v2998_v46, %v4720_v62  ;;  %v2128_v29 = vsel %vm2062_vm4, %v3248_v2, 0.0 }
 0x1a3   : > { %v1604_v61 = vadd.f32 %v1540_v38, %v1408_v31  ;;  %v1048_v60 = vadd.f32 %v984_v4, %v852_v25  ;;  %vm1702_vm0 = vcmp.eq.s32.totalorder %v3000_v47, %v4720_v62  ;;  %v1376_v16 = vsel %vm1310_vm14, %v3166_v49, 0.0 }
 0x1a4   : > { %2291 = vmatpush.msra.mxu1 %v2223_v18  ;;  %v1572_v5 = vsel %vm1506_vm8, %v3185_v1, 0.0  ;;  %v1768_v51 = vsel %vm1702_vm0, %v3208_v11, 0.0  ;;  %v4929_v63 = vadd.s32 8, %v2927_v13  ;;  %vm1898_vm11 = vcmp.eq.s32.totalorder %v3011_v50, %v4720_v62 }
 0x1a5   : > { %v1800_v26 = vadd.f32 %v1736_v37, %v1604_v61  ;;  %v1244_v21 = vadd.f32 %v1180_v17, %v1048_v60  ;;  %vm2094_vm12 = vcmp.eq.s32.totalorder %v4526_v12, %v4720_v62  ;;  %v1964_v37 = vsel %vm1898_vm11, %v3211_v14, 0.0  ;;  %v4963_v61 = vld [vmem:[%s2920_s18 + $0x10] ss:$0 sm:$0xff] }
 0x1a6   : > { %vm491_vm13 = vcmp.eq.s32.totalorder %v2933_v20, %v4929_v63  ;;  %vm687_vm10 = vcmp.eq.s32.totalorder %v2935_v22, %v4929_v63  ;;  %vm883_vm15 = vcmp.eq.s32.totalorder %v2937_v23, %v4929_v63  ;;  %vm1079_vm1 = vcmp.eq.s32.totalorder %v2939_v24, %v4929_v63 }
 0x1a7   : > { %v1996_v8 = vadd.f32 %v1932_v19, %v1800_v26  ;;  %v1440_v15 = vadd.f32 %v1376_v16, %v1244_v21  ;;  %v557_v38 = vsel %vm491_vm13, %v3017_v52, 0.0  ;;  %v753_v6 = vsel %vm687_vm10, %v3020_v53, 0.0 }
 0x1a8   : > { %v817_v3 = vadd.f32 %v753_v6, %v557_v38  ;;  %v949_v10 = vsel %vm883_vm15, %v3023_v54, 0.0  ;;  %vm1275_vm2 = vcmp.eq.s32.totalorder %v2944_v28, %v4929_v63  ;;  %v1145_v4 = vsel %vm1079_vm1, %v3026_v55, 0.0 }
 0x1a9   : > { %v2192_v40 = vadd.f32 %v2128_v29, %v1996_v8  ;;  %v1636_v9 = vadd.f32 %v1572_v5, %v1440_v15  ;;  %vm1471_vm3 = vcmp.eq.s32.totalorder %v2946_v30, %v4929_v63  ;;  %v2160_v31 = vsel %vm2094_vm12, %v3248_v2, 0.0 }
 0x1aa   : > { %v1013_v25 = vadd.f32 %v949_v10, %v817_v3  ;;  %vm1667_vm4 = vcmp.eq.s32.totalorder %v2957_v35, %v4929_v63  ;;  %vm1863_vm5 = vcmp.eq.s32.totalorder %v2961_v36, %v4929_v63  ;;  %v1341_v19 = vsel %vm1275_vm2, %v3033_v57, 0.0 }
 0x1ab   : > { %2314 = vmatpush.msra.mxu2 %v2192_v40  ;;  %v1832_v18 = vadd.f32 %v1768_v51, %v1636_v9  ;;  %v1537_v17 = vsel %vm1471_vm3, %v3036_v58, 0.0  ;;  %vm2059_vm6 = vcmp.eq.s32.totalorder %v4963_v61, %v4929_v63  ;;  %v1733_v29 = vsel %vm1667_vm4, %v3039_v59, 0.0 }
 0x1ac   : > { %v1209_v62 = vadd.f32 %v1145_v4, %v1013_v25  ;;  %v1929_v60 = vsel %vm1863_vm5, %v3061_v0, 0.0  ;;  %v4970_v16 = vadd.s32 136, %v2927_v13  ;;  %v2125_v51 = vsel %vm2059_vm6, %v3089_v7, 0.0 }
 0x1ad   : > { %v2028_v5 = vadd.f32 %v1964_v37, %v1832_v18  ;;  %vm492_vm7 = vcmp.eq.s32.totalorder %v2974_v39, %v4929_v63  ;;  %vm688_vm9 = vcmp.eq.s32.totalorder %v2976_v41, %v4929_v63  ;;  %vm884_vm15 = vcmp.eq.s32.totalorder %v2978_v42, %v4929_v63 }
 0x1ae   : > { %v1405_v26 = vadd.f32 %v1341_v19, %v1209_v62  ;;  %vm523_vm14 = vcmp.eq.s32.totalorder %v2933_v20, %v4970_v16  ;;  %vm719_vm8 = vcmp.eq.s32.totalorder %v2935_v22, %v4970_v16  ;;  %vm915_vm0 = vcmp.eq.s32.totalorder %v2937_v23, %v4970_v16 }
 0x1af   : > { %v2224_v21 = vadd.f32 %v2160_v31, %v2028_v5  ;;  %v589_v8 = vsel %vm523_vm14, %v3017_v52, 0.0  ;;  %v785_v15 = vsel %vm719_vm8, %v3020_v53, 0.0  ;;  %v981_v38 = vsel %vm915_vm0, %v3023_v54, 0.0 }
 0x1b0   : > { %v1601_v6 = vadd.f32 %v1537_v17, %v1405_v26  ;;  %v849_v37 = vadd.f32 %v785_v15, %v589_v8  ;;  %vm1111_vm11 = vcmp.eq.s32.totalorder %v2939_v24, %v4970_v16  ;;  %vm1307_vm12 = vcmp.eq.s32.totalorder %v2944_v28, %v4970_v16 }
 0x1b1   : > { %2337 = vmatpush.msra.mxu3 %v2224_v21  ;;  %v1177_v3 = vsel %vm1111_vm11, %v3026_v55, 0.0  ;;  %vm1503_vm13 = vcmp.eq.s32.totalorder %v2946_v30, %v4970_v16  ;;  %vm1699_vm10 = vcmp.eq.s32.totalorder %v2957_v35, %v4970_v16  ;;  %v1373_v9 = vsel %vm1307_vm12, %v3033_v57, 0.0 }
 0x1b2   : > { %v1797_v10 = vadd.f32 %v1733_v29, %v1601_v6  ;;  %v1045_v40 = vadd.f32 %v981_v38, %v849_v37  ;;  %v558_v4 = vsel %vm492_vm7, %v3150_v32, 0.0  ;;  %v1569_v31 = vsel %vm1503_vm13, %v3036_v58, 0.0 }
 0x1b3   : > { %v1765_v25 = vsel %vm1699_vm10, %v3039_v59, 0.0  ;;  %vm1895_vm1 = vcmp.eq.s32.totalorder %v2961_v36, %v4970_v16  ;;  %v754_v18 = vsel %vm688_vm9, %v3153_v33, 0.0  ;;  %vm2091_vm2 = vcmp.eq.s32.totalorder %v4963_v61, %v4970_v16 }
 0x1b4   : > { %v1993_v19 = vadd.f32 %v1929_v60, %v1797_v10  ;;  %v1241_v17 = vadd.f32 %v1177_v3, %v1045_v40  ;;  %v950_v62 = vsel %vm884_vm15, %v3156_v34, 0.0  ;;  %v818_v29 = vadd.f32 %v754_v18, %v558_v4 }
 0x1b5   : > { %vm1080_vm3 = vcmp.eq.s32.totalorder %v2992_v44, %v4929_v63  ;;  %vm1276_vm4 = vcmp.eq.s32.totalorder %v2996_v45, %v4929_v63  ;;  %vm1472_vm5 = vcmp.eq.s32.totalorder %v2998_v46, %v4929_v63  ;;  %v1961_v60 = vsel %vm1895_vm1, %v3061_v0, 0.0 }
 0x1b6   : > { %v2189_v5 = vadd.f32 %v2125_v51, %v1993_v19  ;;  %v1437_v26 = vadd.f32 %v1373_v9, %v1241_v17  ;;  %v1146_v21 = vsel %vm1080_vm3, %v3163_v43, 0.0  ;;  %v2157_v8 = vsel %vm2091_vm2, %v3089_v7, 0.0 }
 0x1b7   : > { %v1014_v15 = vadd.f32 %v950_v62, %v818_v29  ;;  %v1342_v38 = vsel %vm1276_vm4, %v3166_v49, 0.0  ;;  %vm1668_vm6 = vcmp.eq.s32.totalorder %v3000_v47, %v4929_v63  ;;  %v1538_v37 = vsel %vm1472_vm5, %v3185_v1, 0.0 }
 0x1b8   : > { %2269 = vmatpush.msra.mxu0 %v2189_v5  ;;  %v1633_v6 = vadd.f32 %v1569_v31, %v1437_v26  ;;  %v1734_v3 = vsel %vm1668_vm6, %v3208_v11, 0.0  ;;  %vm1864_vm7 = vcmp.eq.s32.totalorder %v3011_v50, %v4929_v63  ;;  %vm2060_vm9 = vcmp.eq.s32.totalorder %v4526_v12, %v4929_v63 }
 0x1b9   : > { %v1210_v51 = vadd.f32 %v1146_v21, %v1014_v15  ;;  %vm524_vm14 = vcmp.eq.s32.totalorder %v2974_v39, %v4970_v16  ;;  %vm720_vm8 = vcmp.eq.s32.totalorder %v2976_v41, %v4970_v16  ;;  %vm916_vm0 = vcmp.eq.s32.totalorder %v2978_v42, %v4970_v16 }
 0x1ba   : > { %v1829_v10 = vadd.f32 %v1765_v25, %v1633_v6  ;;  %v590_v40 = vsel %vm524_vm14, %v3150_v32, 0.0  ;;  %v786_v9 = vsel %vm720_vm8, %v3153_v33, 0.0  ;;  %v982_v18 = vsel %vm916_vm0, %v3156_v34, 0.0 }
 0x1bb   : > { %v1406_v4 = vadd.f32 %v1342_v38, %v1210_v51  ;;  %v850_v31 = vadd.f32 %v786_v9, %v590_v40  ;;  %vm1112_vm11 = vcmp.eq.s32.totalorder %v2992_v44, %v4970_v16  ;;  %vm1308_vm12 = vcmp.eq.s32.totalorder %v2996_v45, %v4970_v16 }
 0x1bc   : > { %v2025_v19 = vadd.f32 %v1961_v60, %v1829_v10  ;;  %v1178_v17 = vsel %vm1112_vm11, %v3163_v43, 0.0  ;;  %vm1504_vm13 = vcmp.eq.s32.totalorder %v2998_v46, %v4970_v16  ;;  %v1930_v62 = vsel %vm1864_vm7, %v3211_v14, 0.0 }
 0x1bd   : > { %v1602_v25 = vadd.f32 %v1538_v37, %v1406_v4  ;;  %v2126_v29 = vsel %vm2060_vm9, %v3248_v2, 0.0  ;;  %v1046_v5 = vadd.f32 %v982_v18, %v850_v31  ;;  %v1374_v60 = vsel %vm1308_vm12, %v3166_v49, 0.0 }
 0x1be   : > { %v2221_v26 = vadd.f32 %v2157_v8, %v2025_v19  ;;  %v1570_v21 = vsel %vm1504_vm13, %v3185_v1, 0.0  ;;  %vm1700_vm10 = vcmp.eq.s32.totalorder %v3000_v47, %v4970_v16  ;;  %vm1896_vm15 = vcmp.eq.s32.totalorder %v3011_v50, %v4970_v16 }
 0x1bf   : > { %v1798_v15 = vadd.f32 %v1734_v3, %v1602_v25  ;;  %v1242_v38 = vadd.f32 %v1178_v17, %v1046_v5  ;;  %vm2092_vm1 = vcmp.eq.s32.totalorder %v4526_v12, %v4970_v16  ;;  %v1766_v63 = vsel %vm1700_vm10, %v3208_v11, 0.0 }
 0x1c0   : > { %2292 = vmatpush.msra.mxu1 %v2221_v26  ;;  %vm489_vm2 = vcmp.eq.s32.totalorder %v2933_v20, %v2927_v13  ;;  %vm685_vm3 = vcmp.eq.s32.totalorder %v2935_v22, %v2927_v13  ;;  %vm881_vm4 = vcmp.eq.s32.totalorder %v2937_v23, %v2927_v13  ;;  %vm1077_vm5 = vcmp.eq.s32.totalorder %v2939_v24, %v2927_v13 }
 0x1c1   : > { %v1994_v8 = vadd.f32 %v1930_v62, %v1798_v15  ;;  %v1438_v6 = vadd.f32 %v1374_v60, %v1242_v38  ;;  %v555_v37 = vsel %vm489_vm2, %v3017_v52, 0.0  ;;  %v751_v3 = vsel %vm685_vm3, %v3020_v53, 0.0 }
 0x1c2   : > { %v815_v51 = vadd.f32 %v751_v3, %v555_v37  ;;  %v947_v10 = vsel %vm881_vm4, %v3023_v54, 0.0  ;;  %vm1273_vm6 = vcmp.eq.s32.totalorder %v2944_v28, %v2927_v13  ;;  %v1143_v4 = vsel %vm1077_vm5, %v3026_v55, 0.0 }
 0x1c3   : > { %v2190_v40 = vadd.f32 %v2126_v29, %v1994_v8  ;;  %v1634_v9 = vadd.f32 %v1570_v21, %v1438_v6  ;;  %v1962_v31 = vsel %vm1896_vm15, %v3211_v14, 0.0  ;;  %vm1469_vm7 = vcmp.eq.s32.totalorder %v2946_v30, %v2927_v13 }
 0x1c4   : > { %v1011_v18 = vadd.f32 %v947_v10, %v815_v51  ;;  %vm1665_vm9 = vcmp.eq.s32.totalorder %v2957_v35, %v2927_v13  ;;  %v2158_v17 = vsel %vm2092_vm1, %v3248_v2, 0.0  ;;  %v1339_v25 = vsel %vm1273_vm6, %v3033_v57, 0.0  ;;  %v2251_v10 = vld [vmem:[%s5146_s27] sm:$0xff] }
 0x1c5   : > { %2315 = vmatpush.msra.mxu2 %v2190_v40  ;;  %v1830_v19 = vadd.f32 %v1766_v63, %v1634_v9  ;;  %vm1861_vm14 = vcmp.eq.s32.totalorder %v2961_v36, %v2927_v13  ;;  %v1535_v29 = vsel %vm1469_vm7, %v3036_v58, 0.0  ;;  %v1731_v5 = vsel %vm1665_vm9, %v3039_v59, 0.0 }
 0x1c6   : > { %v1207_v62 = vadd.f32 %v1143_v4, %v1011_v18  ;;  %v5096_v26 = vadd.s32 128, %v2927_v13  ;;  %vm2057_vm8 = vcmp.eq.s32.totalorder %v4963_v61, %v2927_v13  ;;  %vm490_vm0 = vcmp.eq.s32.totalorder %v2974_v39, %v2927_v13 }
 0x1c7   : > { %v2026_v60 = vadd.f32 %v1962_v31, %v1830_v19  ;;  %vm686_vm11 = vcmp.eq.s32.totalorder %v2976_v41, %v2927_v13  ;;  %vm882_vm4 = vcmp.eq.s32.totalorder %v2978_v42, %v2927_v13  ;;  %vm1078_vm7 = vcmp.eq.s32.totalorder %v2992_v44, %v2927_v13 }
 0x1c8   : > { %v1403_v12 = vadd.f32 %v1339_v25, %v1207_v62  ;;  %vm521_vm12 = vcmp.eq.s32.totalorder %v2933_v20, %v5096_v26  ;;  %vm717_vm13 = vcmp.eq.s32.totalorder %v2935_v22, %v5096_v26  ;;  %vm913_vm10 = vcmp.eq.s32.totalorder %v2937_v23, %v5096_v26 }
 0x1c9   : > { %v2222_v16 = vadd.f32 %v2158_v17, %v2026_v60  ;;  %v587_v21 = vsel %vm521_vm12, %v3017_v52, 0.0  ;;  %v783_v15 = vsel %vm717_vm13, %v3020_v53, 0.0  ;;  %v979_v38 = vsel %vm913_vm10, %v3023_v54, 0.0 }
 0x1ca   : > { %v1599_v63 = vadd.f32 %v1535_v29, %v1403_v12  ;;  %v847_v8 = vadd.f32 %v783_v15, %v587_v21  ;;  %vm1109_vm15 = vcmp.eq.s32.totalorder %v2939_v24, %v5096_v26  ;;  %vm1305_vm1 = vcmp.eq.s32.totalorder %v2944_v28, %v5096_v26 }
 0x1cb   : > { %2338 = vmatpush.msra.mxu3 %v2222_v16  ;;  %v1927_v20 = vsel %vm1861_vm14, %v3061_v0, 0.0  ;;  %v2123_v22 = vsel %vm2057_vm8, %v3089_v7, 0.0  ;;  %v1175_v23 = vsel %vm1109_vm15, %v3026_v55, 0.0  ;;  %vm1501_vm2 = vcmp.eq.s32.totalorder %v2946_v30, %v5096_v26 }
 0x1cc   : > { %v1795_v24 = vadd.f32 %v1731_v5, %v1599_v63  ;;  %v1043_v52 = vadd.f32 %v979_v38, %v847_v8  ;;  %v1371_v28 = vsel %vm1305_vm1, %v3033_v57, 0.0  ;;  %v556_v53 = vsel %vm490_vm0, %v3150_v32, 0.0  ;;  %v2253_v5 = vld [vmem:[%s5146_s27 + $0x10] sm:$0xff] }
 0x1cd   : > { %v1567_v54 = vsel %vm1501_vm2, %v3036_v58, 0.0  ;;  %vm1697_vm3 = vcmp.eq.s32.totalorder %v2957_v35, %v5096_v26  ;;  %v752_v55 = vsel %vm686_vm11, %v3153_v33, 0.0  ;;  %vm1893_vm5 = vcmp.eq.s32.totalorder %v2961_v36, %v5096_v26 }
 0x1ce   : > { %v1991_v30 = vadd.f32 %v1927_v20, %v1795_v24  ;;  %v1239_v57 = vadd.f32 %v1175_v23, %v1043_v52  ;;  %vm2089_vm6 = vcmp.eq.s32.totalorder %v4963_v61, %v5096_v26  ;;  %v816_v35 = vadd.f32 %v752_v55, %v556_v53  ;;  %v5341_v24 = vld [vmem:[#allocation5_spill] sm:$0xff] }
 0x1cf   : > { %v948_v58 = vsel %vm882_vm4, %v3156_v34, 0.0  ;;  %vm1274_vm9 = vcmp.eq.s32.totalorder %v2996_v45, %v2927_v13  ;;  %v1763_v3 = vsel %vm1697_vm3, %v3039_v59, 0.0  ;;  %v1144_v51 = vsel %vm1078_vm7, %v3163_v43, 0.0 }
 0x1d0   : > { %v2187_v6 = vadd.f32 %v2123_v22, %v1991_v30  ;;  %v1435_v37 = vadd.f32 %v1371_v28, %v1239_v57  ;;  %v1959_v36 = vsel %vm1893_vm5, %v3061_v0, 0.0  ;;  %v1012_v40 = vadd.f32 %v948_v58, %v816_v35 }
 0x1d1   : > { %vm1470_vm14 = vcmp.eq.s32.totalorder %v2998_v46, %v2927_v13  ;;  %vm1666_vm8 = vcmp.eq.s32.totalorder %v3000_v47, %v2927_v13  ;;  %v2155_v4 = vsel %vm2089_vm6, %v3089_v7, 0.0  ;;  %v1340_v59 = vsel %vm1274_vm9, %v3166_v49, 0.0 }
 0x1d2   : > { %2270 = vmatpush.msra.mxu0 %v2187_v6  ;;  %v1631_v9 = vadd.f32 %v1567_v54, %v1435_v37  ;;  %vm1862_vm0 = vcmp.eq.s32.totalorder %v3011_v50, %v2927_v13  ;;  %v1208_v0 = vadd.f32 %v1144_v51, %v1012_v40  ;;  %v1536_v31 = vsel %vm1470_vm14, %v3185_v1, 0.0 }
 0x1d3   : > { %vm522_vm11 = vcmp.eq.s32.totalorder %v2974_v39, %v5096_v26  ;;  %vm718_vm12 = vcmp.eq.s32.totalorder %v2976_v41, %v5096_v26  ;;  %2271 = vmatmul.f32.vlgmr.msra.gmra.mxu0 %v2251_v10  ;;  %v1732_v61 = vsel %vm1666_vm8, %v3208_v11, 0.0  ;;  %vm914_vm13 = vcmp.eq.s32.totalorder %v2978_v42, %v5096_v26 }
 0x1d4   : > { %v1827_v18 = vadd.f32 %v1763_v3, %v1631_v9  ;;  %v588_v7 = vsel %vm522_vm11, %v3150_v32, 0.0  ;;  %v784_v19 = vsel %vm718_vm12, %v3153_v33, 0.0  ;;  %v1404_v17 = vadd.f32 %v1340_v59, %v1208_v0  ;;  %v2734_v33 = vld [vmem:[%s2920_s18 + $0x18] ss:$0 sm:$0xff] }
 0x1d5   : > { %v848_v25 = vadd.f32 %v784_v19, %v588_v7  ;;  %vm1110_vm10 = vcmp.eq.s32.totalorder %v2992_v44, %v5096_v26  ;;  %v980_v41 = vsel %vm914_vm13, %v3156_v34, 0.0  ;;  %vm1306_vm15 = vcmp.eq.s32.totalorder %v2996_v45, %v5096_v26 }
 0x1d6   : > { %v2023_v39 = vadd.f32 %v1959_v36, %v1827_v18  ;;  %v1176_v62 = vsel %vm1110_vm10, %v3163_v43, 0.0  ;;  %v1600_v32 = vadd.f32 %v1536_v31, %v1404_v17  ;;  %vm2058_vm1 = vcmp.eq.s32.totalorder %v2734_v33, %v2927_v13  ;;  %v2252_v43 = vld [vmem:[%s5146_s27 + $0x8] sm:$0xff] }
 0x1d7   : > { %v1044_v29 = vadd.f32 %v980_v41, %v848_v25  ;;  %vm1502_vm2 = vcmp.eq.s32.totalorder %v2998_v46, %v5096_v26  ;;  %v1928_v44 = vsel %vm1862_vm0, %v3211_v14, 0.0  ;;  %v1372_v34 = vsel %vm1306_vm15, %v3166_v49, 0.0  ;;  %v2361_v41 = vld [vmem:[%s5315_s5 + $0x10] sm:$0xff] }
 0x1d8   : > { %v2219_v42 = vadd.f32 %v2155_v4, %v2023_v39  ;;  %v1796_v60 = vadd.f32 %v1732_v61, %v1600_v32  ;;  %vm1698_vm3 = vcmp.eq.s32.totalorder %v3000_v47, %v5096_v26  ;;  %v2124_v12 = vsel %vm2058_vm1, %v3248_v2, 0.0  ;;  %v2353_v32 = vld [vmem:[%s5220_s8 + $0x10] sm:$0xff] }
 0x1d9   : > { %v1240_v45 = vadd.f32 %v1176_v62, %v1044_v29  ;;  %v1568_v46 = vsel %vm1502_vm2, %v3185_v1, 0.0  ;;  %vm1894_vm4 = vcmp.eq.s32.totalorder %v3011_v50, %v5096_v26  ;;  %v1764_v13 = vsel %vm1698_vm3, %v3208_v11, 0.0  ;;  %v2254_v1 = vld [vmem:[%s5146_s27 + $0x18] sm:$0xff]  ;;  %v2359_v62 = vld [vmem:[%s5315_s5] sm:$0xff]  ;;  %s2487_s27 = sshll.u32 %s2484_s19, 4  ;;  %s2488_s27 = int_to_ptr.hbm [resolvable:$true] %s2487_s27 }
 0x1da   : > { %2293 = vmatpush.msra.mxu1 %v2219_v42  ;;  %v1992_v16 = vadd.f32 %v1928_v44, %v1796_v60  ;;  %vm2090_vm5 = vcmp.eq.s32.totalorder %v2734_v33, %v5096_v26  ;;  %v1960_v47 = vsel %vm1894_vm4, %v3211_v14, 0.0  ;;  %vm5339_vm6 = vcmask 1040384   ;;  %v2351_v42 = vld [vmem:[%s5220_s8] sm:$0xff]  ;;  %s2749_s28 = sshra.s32 %s2488_s27, 4  ;;  %s2750_s28 = int_to_ptr.hbm [resolvable:$true] %s2749_s28 }
 0x1db   : > { %v1436_v21 = vadd.f32 %v1372_v34, %v1240_v45  ;;  %2294 = vmatmul.f32.vlgmr.msra.gmra.mxu1 %v2252_v43  ;;  %2274 = vmatmul.f32.gmra.mxu0 %v2253_v5  ;;  %v2156_v63 = vsel %vm2090_vm5, %v3248_v2, 0.0  ;;  %v406_v50 = vsel %vm5339_vm6, %v3030_v56, 0.0  ;;  %vm5340_vm7 = vmmov %vm5339_vm6  ;;  %v2815_v33 = vmov 0   ;;  %v2357_v34 = vld [vmem:[%s5314_s4 + $0x10] sm:$0xff]  ;;  %s2751_s30 = scalar_lea.hbm %s2750_s28, 64  ;;  %p2756_p1 = scmp.lt.s32.totalorder %s2750_s28, %s5316_s6 }
 0x1dc   : > { %v2188_v49 = vadd.f32 %v2124_v12, %v1992_v16  ;;  %v407_v11 = vadd.f32 %v3002_v48, %v406_v50  ;;  %v414_v2 = vsel %vm5340_vm7, %v3225_v27, 0.0  ;;  %2714 = vset.pattern.permute.xlu1 %v2815_v33  ;;  %2713 = vset.pattern.permute.xlu0 %v2815_v33  ;;  %vm2383_vm11 = vcmask 261120   ;;  %v2362_v12 = vld [vmem:[%s5315_s5 + $0x18] sm:$0xff]  ;;  %p2752_p12 = scmp.ne.s32.totalorder %s2750_s28, %s2751_s30  ;;  %p2757_p2 = scmp.lt.s32.totalorder %s2755_s14, %s2751_s30 }
 0x1dd   : > { %v1632_v15 = vadd.f32 %v1568_v46, %v1436_v21  ;;  %v415_v52 = vadd.f32 %v5341_v24, %v414_v2  ;;  %2375 = vperm.xlu1 %2714, %v2361_v41   ;;  %2365 = vperm.xlu0 %2713, %v2359_v62   ;;  %v2360_v46 = vld [vmem:[%s5315_s5 + $0x8] sm:$0xff]  ;;  %v2354_v50 = vld [vmem:[%s5220_s8 + $0x18] sm:$0xff] }
 0x1de   : > { %2316 = vmatpush.msra.mxu2 %v2188_v49  ;;  %v408_v26 = vrot.slane %v407_v11, 4  ;;  %p2753_p13 = pnand %p2752_p12, %p2893_p4  ;;  %p2758_p3 = por %p2757_p2, %p2756_p1 }
 0x1df   : > { %v1828_v38 = vadd.f32 %v1764_v13, %v1632_v15  ;;  %2317 = vmatmul.f32.vlgmr.msra.gmra.mxu2 %v2251_v10  ;;  %v416_v53 = vrot.slane %v415_v52, 4  ;;  %v2358_v15 = vld [vmem:[%s5314_s4 + $0x18] sm:$0xff] }
 0x1e0   : > { %v409_v14 = vadd.f32 %v408_v26, %v407_v11  ;;  %v2352_v11 = vld [vmem:[%s5220_s8 + $0x8] sm:$0xff]  ;;  %s5261_s8 = scalar_lea.vmem [#allocation2], %s2620_s12  ;;  %p2754_p0 = pneg %p2753_p13 }
 0x1e1   : > { %v2024_v8 = vadd.f32 %v1960_v47, %v1828_v38  ;;  %v417_v55 = vadd.f32 %v416_v53, %v415_v52  ;;  %v2356_v47 = vld [vmem:[%s5314_s4 + $0x8] sm:$0xff]  ;;  %s2485_s20 = sshll.u32 %s5261_s8, 4  ;;  %s2486_s20 = int_to_ptr.vmem [resolvable:$true] %s2485_s20 }
 0x1e2   : > { %v410_v22 = vrot.slane %v409_v14, 2  ;;  %p2759_p5 = pnand %p2758_p3, %p2754_p0 }
 0x1e3   : > { %v2220_v20 = vadd.f32 %v2156_v63, %v2024_v8  ;;  %2297 = vmatmul.f32.gmra.mxu1 %v2254_v1  ;;  %v418_v30 = vrot.slane %v417_v55, 2 }
 0x1e4   : > { %v411_v23 = vadd.f32 %v410_v22, %v409_v14 }
 0x1e5   : > { %2339 = vmatpush.msra.mxu3 %v2220_v20  ;;  %v419_v57 = vadd.f32 %v418_v30, %v417_v55  ;;  %2380 = vperm.xlu1 %2714, %v2362_v12  }
 0x1e6   : > { %2340 = vmatmul.f32.vlgmr.msra.gmra.mxu3 %v2252_v43  ;;  %v412_v28 = vrot.slane %v411_v23, 1  ;;  %v2355_v43 = vld [vmem:[%s5314_s4] sm:$0xff]  ;;  %2370 = vperm.xlu0 %2713, %v2360_v46  }
 0x1e7   : > { %2320 = vmatmul.f32.gmra.mxu2 %v2253_v5  ;;  %v420_v58 = vrot.slane %v419_v57, 1 }
 0x1e8   : > { %v413_v54 = vadd.f32 %v412_v28, %v411_v23 }
 0x1e9   : > { %v421_v6 = vadd.f32 %v420_v58, %v419_v57 }
 0x1ea   : > { %2725 = vrcp.f32 %v413_v54  ;;  %vm427_vm9 = vweird.f32 %v413_v54  ;;  %v433_v27 = vand.u32 2147483648, %v413_v54  ;;  %v431_v36 = vand.u32 2147483647, %v413_v54 }
 0x1eb   : > { %2727 = vrcp.f32 %v421_v6  ;;  %vm441_vm12 = vweird.f32 %v421_v6  ;;  %v447_v5 = vand.u32 2147483648, %v421_v6  ;;  %v445_v45 = vand.u32 2147483647, %v421_v6 }
 0x1ec   : > { %v434_v4 = vor.u32 1.1754944e-38, %v433_v27  ;;  %vm432_vm0 = vcmp.eq.f32.partialorder %v431_v36, 8.507059e+37 }
 0x1ed   : > { %v448_v21 = vor.u32 1.1754944e-38, %v447_v5  ;;  %vm446_vm15 = vcmp.eq.f32.partialorder %v445_v45, 8.507059e+37 }
 0x1ee   : > { %2343 = vmatmul.f32.gmra.mxu3 %v2254_v1 }
 0x1f0   : > { %v2726_v35 = vpop.eup %2725 }
 0x1f1   : > { %v423_v56 = vmul.f32 %v2726_v35, %v413_v54  ;;  %vm428_vm14 = vweird.f32 %v2726_v35  ;;  %v2728_v40 = vpop.eup %2727 }
 0x1f2   : > { %vm429_vm8 = vmor %vm427_vm9, %vm428_vm14  ;;  %v437_v31 = vmul.f32 %v2728_v40, %v421_v6  ;;  %vm442_vm13 = vweird.f32 %v2728_v40 }
 0x1f3   : > { %v424_v48 = vsub.f32 1.0, %v423_v56  ;;  %vm443_vm10 = vmor %vm441_vm12, %vm442_vm13 }
 0x1f4   : > { %v438_v17 = vsub.f32 1.0, %v437_v31 }
 0x1f5   : > { %v425_v3 = vmul.f32 %v2726_v35, %v424_v48 }
 0x1f6   : > { %v439_v29 = vmul.f32 %v2728_v40, %v438_v17 }
 0x1f7   : > { %v426_v10 = vadd.f32 %v2726_v35, %v425_v3 }
 0x1f8   : > { %v440_v60 = vadd.f32 %v2728_v40, %v439_v29 }
 0x1f9   : > { %v430_v59 = vsel %vm429_vm8, %v2726_v35, %v426_v10 }
 0x1fa   : > { %v435_v7 = vsel %vm432_vm0, %v434_v4, %v430_v59  ;;  %v444_v13 = vsel %vm443_vm10, %v2728_v40, %v440_v60 }
 0x1fb   : > { %v449_v1 = vsel %vm446_vm15, %v448_v21, %v444_v13 }
 0x24f   : > { %v2366_v26 = vpop.permute.xlu0 %2365  ;;  %v2376_v23 = vpop.permute.xlu1 %2375 }
 0x250   : > { %v2272_v37 = vpop.f32.mrf.mxu0 }
 0x257   : > { %v2381_v57 = vpop.permute.xlu1 %2380 }
 0x258   : > { %v2295_v51 = vpop.f32.mrf.mxu1  ;;  %v2275_v9 = vpop.f32.mrf.mxu0 }
 0x259   : > { %v2296_v18 = vadd.f32 %v2295_v51, %v2272_v37  ;;  %v2371_v52 = vpop.permute.xlu0 %2370 }
 0x25b   : > { %v2347_v39 = vmul.f32 %v2296_v18, %v435_v7 }
 0x260   : > { %v2298_v0 = vpop.f32.mrf.mxu1 }
 0x261   : > { %v2299_v61 = vadd.f32 %v2298_v0, %v2275_v9 }
 0x262   : > { %v2318_v25 = vpop.f32.mrf.mxu2 }
 0x263   : > { %v2349_v19 = vmul.f32 %v2299_v61, %v435_v7 }
 0x265   : > { %2408 = vmatpush.msrb.mxu0 %v2349_v19  ;;  %2647 = vmatpush.msrb.mxu2 %v2349_v19 }
 0x267   : > { %2409 = vmatpush.msrb.mxu0 %v2347_v39  ;;  %2648 = vmatpush.msrb.mxu2 %v2347_v39 }
 0x269   : > { %v2341_v44 = vpop.f32.mrf.mxu3  ;;  %2649 = vmatpush.msrb.mxu2 %v2353_v32  ;;  %2410 = vmatpush.msrb.mxu0 %v2353_v32 }
 0x26a   : > { %v2321_v16 = vpop.f32.mrf.mxu2  ;;  %v2342_v38 = vadd.f32 %v2341_v44, %v2318_v25 }
 0x26b   : > { %2650 = vmatpush.msrb.mxu2 %v2351_v42  ;;  %2411 = vmatpush.msrb.mxu0 %v2351_v42 }
 0x26c   : > { %2631 = vmatmul.msk.f32.vlgmr.msrb.gmra.mxu2 %vm2383_vm11, %v2357_v34  ;;  %2629 = vmatmul.msk.f32.vlgmr.msrb.gmra.mxu0 %vm2383_vm11, %v2355_v43  ;;  %v2348_v20 = vmul.f32 %v2342_v38, %v449_v1 }
 0x271   : > { %v2344_v49 = vpop.f32.mrf.mxu3 }
 0x272   : > { %v2345_v63 = vadd.f32 %v2344_v49, %v2321_v16 }
 0x274   : > { %v2350_v8 = vmul.f32 %v2345_v63, %v449_v1  ;;  %2632 = vmatmul.msk.f32.gmra.mxu2 %vm2383_vm11, %v2358_v15  ;;  %2630 = vmatmul.msk.f32.gmra.mxu0 %vm2383_vm11, %v2356_v47 }
 0x276   : > { %2437 = vmatpush.msrb.mxu1 %v2350_v8  ;;  %2651 = vmatpush.msrb.mxu3 %v2350_v8 }
 0x278   : > { %2438 = vmatpush.msrb.mxu1 %v2348_v20  ;;  %2652 = vmatpush.msrb.mxu3 %v2348_v20 }
 0x27a   : > { %2653 = vmatpush.msrb.mxu3 %v2354_v50  ;;  %2439 = vmatpush.msrb.mxu1 %v2354_v50 }
 0x27c   : > { %2654 = vmatpush.msrb.mxu3 %v2352_v11  ;;  %2440 = vmatpush.msrb.mxu1 %v2352_v11 }
 0x27d   : > { %2635 = vmatmul.msk.f32.vlgmr.msrb.gmra.mxu3 %vm2383_vm11, %v2357_v34  ;;  %2633 = vmatmul.msk.f32.vlgmr.msrb.gmra.mxu1 %vm2383_vm11, %v2355_v43 }
 0x285   : > { %2636 = vmatmul.msk.f32.gmra.mxu3 %vm2383_vm11, %v2358_v15  ;;  %2634 = vmatmul.msk.f32.gmra.mxu1 %vm2383_vm11, %v2356_v47 }
 0x2e9   : > { %v2413_v14 = vpop.f32.mrf.mxu0 }
 0x2ea   : > { %v2414_v22 = vadd.f32 %v2413_v14, %v2366_v26 }
 0x2ec   : > { %v2454_v2 = vmax.f32 %v2414_v22, 0.0 }
 0x2ee   : > { %2462 = vst [vmem:[%s5261_s8] sm:$0xff] %v2454_v2 }
 0x2ef   : > { %v2419_v24 = vpop.f32.mrf.mxu2 }
 0x2f0   : > { %v2420_v28 = vadd.f32 %v2419_v24, %v2376_v23 }
 0x2f1   : > { %v2416_v53 = vpop.f32.mrf.mxu0 }
 0x2f2   : > { %v2458_v54 = vmax.f32 %v2420_v28, 0.0  ;;  %v2417_v55 = vadd.f32 %v2416_v53, %v2371_v52 }
 0x2f4   : > { %2466 = vst [vmem:[%s5261_s8 + $0x20] sm:$0xff] %v2458_v54  ;;  %v2456_v30 = vmax.f32 %v2417_v55, 0.0 }
 0x2f6   : > { %2464 = vst [vmem:[%s5261_s8 + $0x10] sm:$0xff] %v2456_v30 }
 0x2f7   : > { %v2422_v35 = vpop.f32.mrf.mxu2 }
 0x2f8   : > { %v2423_v56 = vadd.f32 %v2422_v35, %v2381_v57 }
 0x2fa   : > { %v2442_v58 = vpop.f32.mrf.mxu1  ;;  %v2460_v48 = vmax.f32 %v2423_v56, 0.0 }
 0x2fb   : > { %v2443_v6 = vadd.f32 %v2442_v58, %v2366_v26 }
 0x2fc   : > { %2468 = vst [vmem:[%s5261_s8 + $0x30] sm:$0xff] %v2460_v48 }
 0x2fd   : > { %v2455_v37 = vmax.f32 %v2443_v6, 0.0 }
 0x2ff   : > { %2463 = vst [vmem:[%s5261_s8 + $0x8] sm:$0xff] %v2455_v37 }
 0x300   : > { %v2448_v3 = vpop.f32.mrf.mxu3 }
 0x301   : > { %v2449_v51 = vadd.f32 %v2448_v3, %v2376_v23 }
 0x302   : > { %v2445_v27 = vpop.f32.mrf.mxu1 }
 0x303   : > { %v2459_v10 = vmax.f32 %v2449_v51, 0.0  ;;  %v2446_v36 = vadd.f32 %v2445_v27, %v2371_v52 }
 0x305   : > { %2467 = vst [vmem:[%s5261_s8 + $0x28] sm:$0xff] %v2459_v10  ;;  %v2457_v40 = vmax.f32 %v2446_v36, 0.0 }
 0x307   : > { %2465 = vst [vmem:[%s5261_s8 + $0x18] sm:$0xff] %v2457_v40 }
 0x308   : > { %v2451_v9 = vpop.f32.mrf.mxu3 }
 0x309   : > { %v2452_v4 = vadd.f32 %v2451_v9, %v2381_v57 }
 0x30b   : > { %v2461_v59 = vmax.f32 %v2452_v4, 0.0 }
 0x30d   : > { %2469 = vst [vmem:[%s5261_s8 + $0x38] sm:$0xff] %v2461_v59 }
 0x30e   : > { %2762 = shalt.err (!%p2759_p5)
}
 0x30f   : > { %s2816_s15 = smov 256   ;;  %s2817_s8 = smov 16  }
 0x310   : > { %2655 = dma.vmem_to_hbm [thread:$0]  (%p2893_p4), %s2486_s20, 1024, %s2488_s27, %s2471_s24, %s2816_s15, %s2816_s15, %s2817_s8  }
 0x311 PF: > { %p2661_p6 = scmp.ge.s32.totalorder %s2813_s26, 2  ;;  %s2502_s17 = sand.u32 1, %s2793_s21  }
 0x312   : > { %s2503_s18 = scalar_lea.sflag [#allocation3], %s2502_s17 }
 0x313   : > { %p2658_p7 = pnand %p2661_p6, %p2900_p8 }
 0x315   : > { %p2659_p9 = pneg %p2658_p7 }
 0x317   : > { %2788 = dma.done.wait (%p2659_p9), %s2503_s18, 1024  }
 0x318   : > { %2790 = vsyncadd (%p2659_p9), %s2503_s18, 4294966272  ;;  %s19_s26 = sadd.s32 1, %s2813_s26   ;;  %s5342_s21 = smov %s2797_s22 }
 0x319   : > { %p16_p10 = scmp.ge.s32.totalorder %s19_s26, 4   ;;  %s5343_s22 = smov %s2801_s23 }
 0x31a   : > { %s5344_s23 = smov %s2906_s10  ;;  %s5345_s24 = smov %s2809_s25 }
 0x31b   : > { %s5346_s25 = smov %s5348_s29  ;;  %18 = sbr.rel (!%p16_p10) target bundleno = 4 (0x4), region = 88 }
 0x320   :  { %2509 = vsyncpa [#allocation3], 1 }
 0x321   :  { %2511 = vsyncpa [#allocation3 + $0x1], 1 }

</bundles_post_ra>
